<compile_context>
chip_gen: v7x
topology: tpu7x:2x2x1
jax: 0.10.0
libtpu: 0.0.40
codegen_flags: <defaults>
</compile_context>

<pallas_src>
import functools
import math

import numpy as np
import jax
import jax.numpy as jnp
from jax import lax
from jax.experimental import pallas as pl
from jax.experimental.pallas import tpu as pltpu  # noqa: F401  (kept for TPU-specific tuning hooks)

F32 = jnp.float32


# ----------------------------- pallas_call helper ------------------------------

def _zero_map(nd):
    return lambda i: (0,) * nd


def _vmem_call(kernel, args, out_shape):
    """Single-grid-step pallas_call; every operand is a whole-array VMEM block."""
    multi = isinstance(out_shape, (tuple, list))
    shapes = tuple(out_shape) if multi else (out_shape,)
    out_specs = tuple(pl.BlockSpec(s.shape, _zero_map(len(s.shape))) for s in shapes)
    return pl.pallas_call(
        kernel,
        out_shape=shapes if multi else shapes[0],
        grid=(1,),
        in_specs=[pl.BlockSpec(a.shape, _zero_map(a.ndim)) for a in args],
        out_specs=out_specs if multi else out_specs[0],
    )(*args)


# ------------------------- static helper matrices (host) -----------------------

@functools.lru_cache(maxsize=None)
def _decomp_matrix(L, k):
    """(L, L) matrix A with A @ x == edge-replicated moving average (window k)."""
    pad = (k - 1) // 2
    A = np.zeros((L, L), np.float32)
    for t in range(L):
        for j in range(k):
            s = min(max(t + j - pad, 0), L - 1)
            A[t, s] += 1.0 / k
    return jnp.asarray(A)


@functools.lru_cache(maxsize=None)
def _dft_matrices(L):
    """Symmetric real-DFT matrices C[m,t]=cos(2*pi*m*t/L), S[m,t]=sin(2*pi*m*t/L)."""
    m = np.arange(L)
    ang = 2.0 * np.pi * np.outer(m, m) / float(L)
    return (jnp.asarray(np.cos(ang).astype(np.float32)),
            jnp.asarray(np.sin(ang).astype(np.float32)))


@functools.lru_cache(maxsize=None)
def _shift_matrices(L):
    """Circular shifts: (Pprev @ x)[t] = x[(t-1)%L], (Pnext @ x)[t] = x[(t+1)%L]."""
    idx = np.arange(L)
    prev = np.zeros((L, L), np.float32)
    nxt = np.zeros((L, L), np.float32)
    prev[idx, (idx - 1) % L] = 1.0
    nxt[idx, (idx + 1) % L] = 1.0
    return jnp.asarray(prev), jnp.asarray(nxt)


def _top_k_for(cfg, L):
    return int(cfg["factor"] * math.log(L))


# ------------------------- in-kernel building blocks ---------------------------

def _activate(x, act):
    if act == "relu":
        return jnp.maximum(x, 0.0)
    if act == "gelu":
        # exact (erf) form, matching PyTorch F.gelu default
        return 0.5 * x * (1.0 + lax.erf(x * (1.0 / math.sqrt(2.0))))
    return x


def _f32_iota(shape, dim):
    return lax.broadcasted_iota(jnp.int32, shape, dim).astype(F32)


def _decomp_split(z2, A, B, L):
    """series_decomp on a merged (B*L, C) slab -> (seasonal, trend)."""
    seas, trend = [], []
    for b in range(B):
        zb = z2[b * L:(b + 1) * L, :]
        tb = jnp.dot(A, zb, preferred_element_type=F32)
        seas.append(zb - tb)
        trend.append(tb)
    return jnp.concatenate(seas, axis=0), jnp.concatenate(trend, axis=0)


def _circular_conv3(x2, w0, w1, w2, pprev, pnext, B, L):
    """Conv1d(kernel=3, circular padding, no bias); taps ordered [t-1, t, t+1]."""
    u0 = jnp.dot(x2, w0, preferred_element_type=F32)
    u1 = jnp.dot(x2, w1, preferred_element_type=F32)
    u2 = jnp.dot(x2, w2, preferred_element_type=F32)
    outs = []
    for b in range(B):
        lo, hi = b * L, (b + 1) * L
        outs.append(jnp.dot(pprev, u0[lo:hi, :], preferred_element_type=F32)
                    + u1[lo:hi, :]
                    + jnp.dot(pnext, u2[lo:hi, :], preferred_element_type=F32))
    return jnp.concatenate(outs, axis=0)


def _my_layernorm(x2, gamma, beta, B, L):
    """my_Layernorm: LayerNorm over channels, then subtract per-sequence time mean."""
    mu = jnp.mean(x2, axis=1, keepdims=True)
    var = jnp.mean((x2 - mu) ** 2, axis=1, keepdims=True)
    xh = (x2 - mu) * lax.rsqrt(var + 1e-5) * gamma + beta
    parts = []
    for b in range(B):
        xb = xh[b * L:(b + 1) * L, :]
        parts.append(xb - jnp.mean(xb, axis=0, keepdims=True))
    return jnp.concatenate(parts, axis=0)


def _autocorrelation_block(x2, src2, wq, bq, wk, bk, wv, bv, wo, bo,
                           cmt, smt, A, *, B, L, S, d, top_k):
    """AutoCorrelationLayer (training-mode delay agg) + residual + series_decomp.

    x2: (B*L, d) queries source, src2: (B*S, d) keys/values source (== x2 for
    self-attention).  The circular correlation mean_value is computed exactly
    with real-DFT matmuls; the top-k delay selection, softmax and the circulant
    aggregation matrix are built in-kernel (no HBM temporaries).
    Returns (seasonal, trend) of series_decomp(x + attention_out), merged (B*L, d).
    """
    q2 = jnp.dot(x2, wq, preferred_element_type=F32) + bq
    k2 = jnp.dot(src2, wk, preferred_element_type=F32) + bk
    v2 = jnp.dot(src2, wv, preferred_element_type=F32) + bv

    vs, mvs = [], []
    for b in range(B):
        qb = q2[b * L:(b + 1) * L, :]
        kb = k2[b * S:(b + 1) * S, :]
        vb = v2[b * S:(b + 1) * S, :]
        if S > L:                       # reference truncates keys/values to L
            kb = kb[:L, :]
            vb = vb[:L, :]
        elif S < L:                     # reference zero-pads keys/values to L
            pad = jnp.zeros((L - S, d), F32)
            kb = jnp.concatenate([kb, pad], axis=0)
            vb = jnp.concatenate([vb, pad], axis=0)
        # mean_value[tau] = (1/d) * sum_t <q[t], k[(t-tau)%L]>, via real DFT matmuls
        cq = jnp.dot(cmt, qb, preferred_element_type=F32)
        sq = jnp.dot(smt, qb, preferred_element_type=F32)
        ck = jnp.dot(cmt, kb, preferred_element_type=F32)
        sk = jnp.dot(smt, kb, preferred_element_type=F32)
        pre = jnp.sum(cq * ck + sq * sk, axis=1, keepdims=True)   # (L, 1)
        pim = jnp.sum(cq * sk - sq * ck, axis=1, keepdims=True)   # (L, 1)
        mv = (jnp.dot(cmt, pre, preferred_element_type=F32)
              - jnp.dot(smt, pim, preferred_element_type=F32)) * (1.0 / float(L * d))
        vs.append(vb)
        mvs.append(mv)

    if top_k > 0:
        # shared top-k delays from the batch-mean correlation (training-mode agg)
        mv_mean = mvs[0]
        for b in range(1, B):
            mv_mean = mv_mean + mvs[b]
        mv_mean = mv_mean * (1.0 / float(B))
        iota_l = _f32_iota((L, 1), 0)
        remaining = mv_mean
        idxs = []
        for _ in range(top_k):
            m = jnp.max(remaining, axis=0, keepdims=True)                 # (1, 1)
            cand = jnp.where(remaining >= m, iota_l, jnp.float32(L))
            idx = jnp.min(cand, axis=0, keepdims=True)                    # (1, 1)
            idxs.append(idx)
            remaining = jnp.where(iota_l == idx, jnp.float32(-1e30), remaining)

        # circulant aggregation: agg[t] = sum_i corr_i * v[(t + delay_i) % L]
        ti = _f32_iota((L, L), 0)
        si = _f32_iota((L, L), 1)
        dd = si - ti
        dmod = jnp.where(dd < 0.0, dd + float(L), dd)                     # (s-t) mod L
        aggs = []
        for b in range(B):
            ws = []
            for i in range(top_k):
                sel = jnp.where(iota_l == idxs[i], mvs[b], 0.0)
                ws.append(jnp.sum(sel, axis=0, keepdims=True))            # (1, 1)
            wmax = ws[0]
            for i in range(1, top_k):
                wmax = jnp.maximum(wmax, ws[i])
            es = [jnp.exp(w - wmax) for w in ws]
            den = es[0]
            for i in range(1, top_k):
                den = den + es[i]
            Wb = jnp.zeros((L, L), F32)
            for i in range(top_k):
                Wb = Wb + jnp.where(dmod == idxs[i], es[i] / den, 0.0)
            aggs.append(jnp.dot(Wb, vs[b], preferred_element_type=F32))
        agg2 = jnp.concatenate(aggs, axis=0)                              # (B*L, d)
    else:
        agg2 = jnp.zeros_like(x2)

    z2 = x2 + jnp.dot(agg2, wo, preferred_element_type=F32) + bo
    return _decomp_split(z2, A, B, L)


def _ffn_block(x2, w1, w2, A, *, B, L, act):
    """conv1(k=1, no bias) -> act -> conv2(k=1, no bias) -> residual -> series_decomp."""
    h = _activate(jnp.dot(x2, w1, preferred_element_type=F32), act)
    y = jnp.dot(h, w2, preferred_element_type=F32)
    return _decomp_split(x2 + y, A, B, L)


# ----------------------------------- kernels -----------------------------------

def _embed_kernel(x_ref, xm_ref, w0_ref, w1_ref, w2_ref, wt_ref, pprev_ref, pnext_ref,
                  o_ref, *, B, L):
    x2 = x_ref[...].astype(F32)
    tok = _circular_conv3(x2, w0_ref[...], w1_ref[...], w2_ref[...],
                          pprev_ref[...], pnext_ref[...], B, L)
    tim = jnp.dot(xm_ref[...].astype(F32), wt_ref[...], preferred_element_type=F32)
    o_ref[...] = (tok + tim).astype(o_ref.dtype)


def _decomp_embed_kernel(x_ref, xm_ref, w0_ref, w1_ref, w2_ref, wt_ref,
                         pprev_ref, pnext_ref, a_ref, o_ref, t_ref, *, B, L):
    # series_decomp(x_dec) fused with the decoder embedding of the seasonal part.
    x2 = x_ref[...].astype(F32)
    seas2, trend2 = _decomp_split(x2, a_ref[...], B, L)
    tok = _circular_conv3(seas2, w0_ref[...], w1_ref[...], w2_ref[...],
                          pprev_ref[...], pnext_ref[...], B, L)
    tim = jnp.dot(xm_ref[...].astype(F32), wt_ref[...], preferred_element_type=F32)
    o_ref[...] = (tok + tim).astype(o_ref.dtype)
    t_ref[...] = trend2.astype(t_ref.dtype)


def _encoder_layer_kernel(x_ref, wq_ref, bq_ref, wk_ref, bk_ref, wv_ref, bv_ref,
                          wo_ref, bo_ref, w1_ref, w2_ref,
                          cmt_ref, smt_ref, a_ref, g_ref, beta_ref,
                          o_ref, *, B, L, d, top_k, act, apply_norm):
    x2 = x_ref[...].astype(F32)
    A = a_ref[...]
    s1, _ = _autocorrelation_block(
        x2, x2, wq_ref[...], bq_ref[...], wk_ref[...], bk_ref[...],
        wv_ref[...], bv_ref[...], wo_ref[...], bo_ref[...],
        cmt_ref[...], smt_ref[...], A, B=B, L=L, S=L, d=d, top_k=top_k)
    s2, _ = _ffn_block(s1, w1_ref[...], w2_ref[...], A, B=B, L=L, act=act)
    if apply_norm:  # Encoder's my_Layernorm fused into the last layer's kernel
        s2 = _my_layernorm(s2, g_ref[...].astype(F32), beta_ref[...].astype(F32), B, L)
    o_ref[...] = s2.astype(o_ref.dtype)


def _decoder_layer_kernel(x_ref, cross_ref, trend_ref,
                          swq_ref, sbq_ref, swk_ref, sbk_ref, swv_ref, sbv_ref,
                          swo_ref, sbo_ref,
                          cwq_ref, cbq_ref, cwk_ref, cbk_ref, cwv_ref, cbv_ref,
                          cwo_ref, cbo_ref,
                          w1_ref, w2_ref, t0_ref, t1_ref, t2_ref,
                          cmt_ref, smt_ref, a_ref, pprev_ref, pnext_ref,
                          xo_ref, to_ref, *, B, L, S, d, top_k, act):
    x2 = x_ref[...].astype(F32)
    c2 = cross_ref[...].astype(F32)
    cmt = cmt_ref[...]
    smt = smt_ref[...]
    A = a_ref[...]
    s1, t1 = _autocorrelation_block(
        x2, x2, swq_ref[...], sbq_ref[...], swk_ref[...], sbk_ref[...],
        swv_ref[...], sbv_ref[...], swo_ref[...], sbo_ref[...],
        cmt, smt, A, B=B, L=L, S=L, d=d, top_k=top_k)
    s2, t2 = _autocorrelation_block(
        s1, c2, cwq_ref[...], cbq_ref[...], cwk_ref[...], cbk_ref[...],
        cwv_ref[...], cbv_ref[...], cwo_ref[...], cbo_ref[...],
        cmt, smt, A, B=B, L=L, S=S, d=d, top_k=top_k)
    s3, t3 = _ffn_block(s2, w1_ref[...], w2_ref[...], A, B=B, L=L, act=act)
    rt = t1 + t2 + t3
    proj = _circular_conv3(rt, t0_ref[...], t1_ref_val(t1_ref), t2_ref[...],
                           pprev_ref[...], pnext_ref[...], B, L)
    xo_ref[...] = s3.astype(xo_ref.dtype)
    to_ref[...] = (trend_ref[...].astype(F32) + proj).astype(to_ref.dtype)


def t1_ref_val(r):
    return r[...]


def _final_kernel(x_ref, g_ref, b_ref, w_ref, pb_ref, trend_ref, o_ref, *, B, L):
    # my_Layernorm -> Linear(d_model, c_out) -> + accumulated trend (decoder tail)
    x2 = x_ref[...].astype(F32)
    xh = _my_layernorm(x2, g_ref[...].astype(F32), b_ref[...].astype(F32), B, L)
    y = jnp.dot(xh, w_ref[...], preferred_element_type=F32) + pb_ref[...]
    o_ref[...] = (y + trend_ref[...].astype(F32)).astype(o_ref.dtype)


# ---------------------------------- forward ------------------------------------

def autoformer_forward(params, cfg, x_enc, x_mark_enc, x_dec, x_mark_dec):
    B, Lenc, _ = x_enc.shape
    Ldec = x_dec.shape[1]
    d = cfg["d_model"]
    c_out = cfg["c_out"]
    act = cfg["activation"]

    A_enc = _decomp_matrix(Lenc, cfg["moving_avg"])
    A_dec = _decomp_matrix(Ldec, cfg["moving_avg"])
    cmt_e, smt_e = _dft_matrices(Lenc)
    cmt_d, smt_d = _dft_matrices(Ldec)
    pprev_e, pnext_e = _shift_matrices(Lenc)
    pprev_d, pnext_d = _shift_matrices(Ldec)

    # NOTE: the reference computes mean/zeros/decomp(x_enc) whose results are unused.

    # ---- encoder embedding
    x_enc2 = x_enc.reshape(B * Lenc, -1)
    xm_enc2 = x_mark_enc.reshape(B * Lenc, -1)
    ep = params["enc_emb"]
    enc2 = _vmem_call(
        functools.partial(_embed_kernel, B=B, L=Lenc),
        [x_enc2, xm_enc2, ep["w_tap0"], ep["w_tap1"], ep["w_tap2"], ep["time_w"],
         pprev_e, pnext_e],
        jax.ShapeDtypeStruct((B * Lenc, d), x_enc.dtype))

    # ---- encoder layers (norm fused into the last layer)
    enc_p = params["encoder"]
    n_enc = len(enc_p["layers"])
    for li, lp in enumerate(enc_p["layers"]):
        a = lp["attn"]
        enc2 = _vmem_call(
            functools.partial(_encoder_layer_kernel, B=B, L=Lenc, d=d,
                              top_k=_top_k_for(cfg, Lenc), act=act,
                              apply_norm=(li == n_enc - 1)),
            [enc2, a["wq"], a["bq"], a["wk"], a["bk"], a["wv"], a["bv"], a["wo"], a["bo"],
             lp["conv1_w"], lp["conv2_w"], cmt_e, smt_e, A_enc,
             enc_p["norm_g"], enc_p["norm_b"]],
            jax.ShapeDtypeStruct((B * Lenc, d), x_enc.dtype))

    # ---- decoder embedding (fused with series_decomp of x_dec)
    x_dec2 = x_dec.reshape(B * Ldec, -1)
    xm_dec2 = x_mark_dec.reshape(B * Ldec, -1)
    dp = params["dec_emb"]
    dec2, trend2 = _vmem_call(
        functools.partial(_decomp_embed_kernel, B=B, L=Ldec),
        [x_dec2, xm_dec2, dp["w_tap0"], dp["w_tap1"], dp["w_tap2"], dp["time_w"],
         pprev_d, pnext_d, A_dec],
        (jax.ShapeDtypeStruct((B * Ldec, d), x_dec.dtype),
         jax.ShapeDtypeStruct((B * Ldec, x_dec.shape[2]), x_dec.dtype)))

    # ---- decoder layers
    dec_p = params["decoder"]
    for lp in dec_p["layers"]:
        s = lp["self_attn"]
        c = lp["cross_attn"]
        t = lp["trend_proj"]
        dec2, trend2 = _vmem_call(
            functools.partial(_decoder_layer_kernel, B=B, L=Ldec, S=Lenc, d=d,
                              top_k=_top_k_for(cfg, Ldec), act=act),
            [dec2, enc2, trend2,
             s["wq"], s["bq"], s["wk"], s["bk"], s["wv"], s["bv"], s["wo"], s["bo"],
             c["wq"], c["bq"], c["wk"], c["bk"], c["wv"], c["bv"], c["wo"], c["bo"],
             lp["conv1_w"], lp["conv2_w"],
             t["w_tap0"], t["w_tap1"], t["w_tap2"],
             cmt_d, smt_d, A_dec, pprev_d, pnext_d],
            (jax.ShapeDtypeStruct((B * Ldec, d), x_dec.dtype),
             jax.ShapeDtypeStruct((B * Ldec, c_out), x_dec.dtype)))

    # ---- final: my_Layernorm -> Linear(d_model, c_out) -> + trend
    out2 = _vmem_call(
        functools.partial(_final_kernel, B=B, L=Ldec),
        [dec2, dec_p["norm_g"], dec_p["norm_b"], dec_p["proj_w"], dec_p["proj_b"], trend2],
        jax.ShapeDtypeStruct((B * Ldec, c_out), x_dec.dtype))
    out = out2.reshape(B, Ldec, c_out)
    return out[:, -cfg["pred_len"]:, :]


# ------------------------------- parameter init ---------------------------------

def init_params(key, cfg):
    d_model, d_ff = cfg["d_model"], cfg["d_ff"]
    enc_in, dec_in, c_out, d_mark = cfg["enc_in"], cfg["dec_in"], cfg["c_out"], cfg["mark_dim"]
    keys = iter(jax.random.split(key, 512))

    def nrm(shape, scale=0.1):
        return jax.random.normal(next(keys), shape, jnp.float32) * scale

    def attn_params():
        return {"wq": nrm((d_model, d_model)), "bq": nrm((1, d_model)),
                "wk": nrm((d_model, d_model)), "bk": nrm((1, d_model)),
                "wv": nrm((d_model, d_model)), "bv": nrm((1, d_model)),
                "wo": nrm((d_model, d_model)), "bo": nrm((1, d_model))}

    def conv3_params(c_in, c_o):
        # circular conv1d(k=3, no bias): one (c_in, c_o) matrix per tap [t-1, t, t+1]
        return {"w_tap0": nrm((c_in, c_o)), "w_tap1": nrm((c_in, c_o)),
                "w_tap2": nrm((c_in, c_o))}

    def emb_params(c_in):
        p = conv3_params(c_in, d_model)
        p["time_w"] = nrm((d_mark, d_model))
        return p

    enc_layers = [{"attn": attn_params(),
                   "conv1_w": nrm((d_model, d_ff)),
                   "conv2_w": nrm((d_ff, d_model))}
                  for _ in range(cfg["e_layers"])]
    dec_layers = [{"self_attn": attn_params(),
                   "cross_attn": attn_params(),
                   "conv1_w": nrm((d_model, d_ff)),
                   "conv2_w": nrm((d_ff, d_model)),
                   "trend_proj": conv3_params(d_model, c_out)}
                  for _ in range(cfg["d_layers"])]
    return {
        "enc_emb": emb_params(enc_in),
        "dec_emb": emb_params(dec_in),
        "encoder": {"layers": enc_layers,
                    "norm_g": jnp.ones((1, d_model), jnp.float32),
                    "norm_b": jnp.zeros((1, d_model), jnp.float32)},
        "decoder": {"layers": dec_layers,
                    "norm_g": jnp.ones((1, d_model), jnp.float32),
                    "norm_b": jnp.zeros((1, d_model), jnp.float32),
                    "proj_w": nrm((d_model, c_out)),
                    "proj_b": nrm((1, c_out))},
    }


# ------------------------------------- main --------------------------------------

if __name__ == "__main__":
    cfg = dict(seq_len=16, label_len=8, pred_len=8,
               enc_in=4, dec_in=4, c_out=4,
               d_model=32, n_heads=4, e_layers=1, d_layers=1, d_ff=32,
               moving_avg=5, factor=1, dropout=0.0, activation="relu",
               output_attention=False, mark_dim=4)

    key = jax.random.PRNGKey(0)
    kp, k1, k2, k3, k4 = jax.random.split(key, 5)
    params = init_params(kp, cfg)

    B = 2
    dec_len = cfg["label_len"] + cfg["pred_len"]
    x_enc = jax.random.normal(k1, (B, cfg["seq_len"], cfg["enc_in"]), jnp.float32)
    x_mark_enc = jax.random.normal(k2, (B, cfg["seq_len"], cfg["mark_dim"]), jnp.float32)
    x_dec = jax.random.normal(k3, (B, dec_len, cfg["dec_in"]), jnp.float32)
    x_mark_dec = jax.random.normal(k4, (B, dec_len, cfg["mark_dim"]), jnp.float32)

    fwd = jax.jit(functools.partial(autoformer_forward, params, cfg))
    out = fwd(x_enc, x_mark_enc, x_dec, x_mark_dec)
    out = jax.block_until_ready(out)
    assert out.shape == (B, cfg["pred_len"], cfg["c_out"]), out.shape
    assert bool(jnp.all(jnp.isfinite(out)))
    print("KERNEL_OK")
</pallas_src>

<mosaic_0001>
module attributes {stable_mosaic.version = 11 : i64} {
  func.func @_embed_kernel(%arg0: i32, %arg1: memref<32x4xf32, #tpu.memory_space<vmem>>, %arg2: memref<32x4xf32, #tpu.memory_space<vmem>>, %arg3: memref<4x32xf32, #tpu.memory_space<vmem>>, %arg4: memref<4x32xf32, #tpu.memory_space<vmem>>, %arg5: memref<4x32xf32, #tpu.memory_space<vmem>>, %arg6: memref<4x32xf32, #tpu.memory_space<vmem>>, %arg7: memref<16x16xf32, #tpu.memory_space<vmem>>, %arg8: memref<16x16xf32, #tpu.memory_space<vmem>>, %arg9: memref<32x32xf32, #tpu.memory_space<vmem>>) attributes {dimension_semantics = [#tpu.dimension_semantics<arbitrary>], iteration_bounds = array<i64: 1>, scalar_prefetch = 0 : i64, scratch_operands = 0 : i64, tpu.core_type = #tpu.core_type<tc>, window_params = [{pipeline_mode = #tpu.pipeline_mode<synchronous>, transform_indices = @transform_0, window_bounds = array<i64: 32, 4>}, {pipeline_mode = #tpu.pipeline_mode<synchronous>, transform_indices = @transform_1, window_bounds = array<i64: 32, 4>}, {pipeline_mode = #tpu.pipeline_mode<synchronous>, transform_indices = @transform_2, window_bounds = array<i64: 4, 32>}, {pipeline_mode = #tpu.pipeline_mode<synchronous>, transform_indices = @transform_3, window_bounds = array<i64: 4, 32>}, {pipeline_mode = #tpu.pipeline_mode<synchronous>, transform_indices = @transform_4, window_bounds = array<i64: 4, 32>}, {pipeline_mode = #tpu.pipeline_mode<synchronous>, transform_indices = @transform_5, window_bounds = array<i64: 4, 32>}, {pipeline_mode = #tpu.pipeline_mode<synchronous>, transform_indices = @transform_6, window_bounds = array<i64: 16, 16>}, {pipeline_mode = #tpu.pipeline_mode<synchronous>, transform_indices = @transform_7, window_bounds = array<i64: 16, 16>}, {pipeline_mode = #tpu.pipeline_mode<synchronous>, transform_indices = @transform_8, window_bounds = array<i64: 32, 32>}]} {
    %c0 = arith.constant 0 : index
    %c0_0 = arith.constant 0 : index
    %0 = vector.load %arg1[%c0, %c0_0] : memref<32x4xf32, #tpu.memory_space<vmem>>, vector<32x4xf32>
    %c0_1 = arith.constant 0 : index
    %c0_2 = arith.constant 0 : index
    %1 = vector.load %arg3[%c0_1, %c0_2] : memref<4x32xf32, #tpu.memory_space<vmem>>, vector<4x32xf32>
    %c0_3 = arith.constant 0 : index
    %c0_4 = arith.constant 0 : index
    %2 = vector.load %arg4[%c0_3, %c0_4] : memref<4x32xf32, #tpu.memory_space<vmem>>, vector<4x32xf32>
    %c0_5 = arith.constant 0 : index
    %c0_6 = arith.constant 0 : index
    %3 = vector.load %arg5[%c0_5, %c0_6] : memref<4x32xf32, #tpu.memory_space<vmem>>, vector<4x32xf32>
    %c0_7 = arith.constant 0 : index
    %c0_8 = arith.constant 0 : index
    %4 = vector.load %arg7[%c0_7, %c0_8] : memref<16x16xf32, #tpu.memory_space<vmem>>, vector<16x16xf32>
    %c0_9 = arith.constant 0 : index
    %c0_10 = arith.constant 0 : index
    %5 = vector.load %arg8[%c0_9, %c0_10] : memref<16x16xf32, #tpu.memory_space<vmem>>, vector<16x16xf32>
    %cst = arith.constant dense<0.000000e+00> : vector<32x32xf32>
    %6 = tpu.matmul %0, %1, %cst {dimension_numbers = #tpu.dot_dimension_numbers<[1], [0], [0], [1], [0, 0, 1, 1], [], []>} : vector<32x4xf32>, vector<4x32xf32>, vector<32x32xf32> -> vector<32x32xf32>
    %cst_11 = arith.constant dense<0.000000e+00> : vector<32x32xf32>
    %7 = tpu.matmul %0, %2, %cst_11 {dimension_numbers = #tpu.dot_dimension_numbers<[1], [0], [0], [1], [0, 0, 1, 1], [], []>} : vector<32x4xf32>, vector<4x32xf32>, vector<32x32xf32> -> vector<32x32xf32>
    %cst_12 = arith.constant dense<0.000000e+00> : vector<32x32xf32>
    %8 = tpu.matmul %0, %3, %cst_12 {dimension_numbers = #tpu.dot_dimension_numbers<[1], [0], [0], [1], [0, 0, 1, 1], [], []>} : vector<32x4xf32>, vector<4x32xf32>, vector<32x32xf32> -> vector<32x32xf32>
    %9 = vector.extract_strided_slice %6 {offsets = [0, 0], sizes = [16, 32], strides = [1, 1]} : vector<32x32xf32> to vector<16x32xf32>
    %cst_13 = arith.constant dense<0.000000e+00> : vector<16x32xf32>
    %10 = tpu.matmul %4, %9, %cst_13 {dimension_numbers = #tpu.dot_dimension_numbers<[1], [0], [0], [1], [0, 0, 1, 1], [], []>} : vector<16x16xf32>, vector<16x32xf32>, vector<16x32xf32> -> vector<16x32xf32>
    %11 = vector.extract_strided_slice %7 {offsets = [0, 0], sizes = [16, 32], strides = [1, 1]} : vector<32x32xf32> to vector<16x32xf32>
    %12 = arith.addf %10, %11 : vector<16x32xf32>
    %13 = vector.extract_strided_slice %8 {offsets = [0, 0], sizes = [16, 32], strides = [1, 1]} : vector<32x32xf32> to vector<16x32xf32>
    %cst_14 = arith.constant dense<0.000000e+00> : vector<16x32xf32>
    %14 = tpu.matmul %5, %13, %cst_14 {dimension_numbers = #tpu.dot_dimension_numbers<[1], [0], [0], [1], [0, 0, 1, 1], [], []>} : vector<16x16xf32>, vector<16x32xf32>, vector<16x32xf32> -> vector<16x32xf32>
    %15 = arith.addf %12, %14 : vector<16x32xf32>
    %16 = vector.extract_strided_slice %6 {offsets = [16, 0], sizes = [16, 32], strides = [1, 1]} : vector<32x32xf32> to vector<16x32xf32>
    %cst_15 = arith.constant dense<0.000000e+00> : vector<16x32xf32>
    %17 = tpu.matmul %4, %16, %cst_15 {dimension_numbers = #tpu.dot_dimension_numbers<[1], [0], [0], [1], [0, 0, 1, 1], [], []>} : vector<16x16xf32>, vector<16x32xf32>, vector<16x32xf32> -> vector<16x32xf32>
    %18 = vector.extract_strided_slice %7 {offsets = [16, 0], sizes = [16, 32], strides = [1, 1]} : vector<32x32xf32> to vector<16x32xf32>
    %19 = arith.addf %17, %18 : vector<16x32xf32>
    %20 = vector.extract_strided_slice %8 {offsets = [16, 0], sizes = [16, 32], strides = [1, 1]} : vector<32x32xf32> to vector<16x32xf32>
    %cst_16 = arith.constant dense<0.000000e+00> : vector<16x32xf32>
    %21 = tpu.matmul %5, %20, %cst_16 {dimension_numbers = #tpu.dot_dimension_numbers<[1], [0], [0], [1], [0, 0, 1, 1], [], []>} : vector<16x16xf32>, vector<16x32xf32>, vector<16x32xf32> -> vector<16x32xf32>
    %22 = arith.addf %19, %21 : vector<16x32xf32>
    %23 = tpu.concatenate %15, %22 in 0 : vector<16x32xf32>, vector<16x32xf32> -> vector<32x32xf32>
    %c0_17 = arith.constant 0 : index
    %c0_18 = arith.constant 0 : index
    %24 = vector.load %arg2[%c0_17, %c0_18] : memref<32x4xf32, #tpu.memory_space<vmem>>, vector<32x4xf32>
    %c0_19 = arith.constant 0 : index
    %c0_20 = arith.constant 0 : index
    %25 = vector.load %arg6[%c0_19, %c0_20] : memref<4x32xf32, #tpu.memory_space<vmem>>, vector<4x32xf32>
    %cst_21 = arith.constant dense<0.000000e+00> : vector<32x32xf32>
    %26 = tpu.matmul %24, %25, %cst_21 {dimension_numbers = #tpu.dot_dimension_numbers<[1], [0], [0], [1], [0, 0, 1, 1], [], []>} : vector<32x4xf32>, vector<4x32xf32>, vector<32x32xf32> -> vector<32x32xf32>
    %27 = arith.addf %23, %26 : vector<32x32xf32>
    %c0_22 = arith.constant 0 : index
    %c0_23 = arith.constant 0 : index
    %28 = vector.load %arg9[%c0_22, %c0_23] : memref<32x32xf32, #tpu.memory_space<vmem>>, vector<32x32xf32>
    tpu.vector_store %arg9[%c0_22, %c0_23], %27 {strides = array<i32>} : memref<32x32xf32, #tpu.memory_space<vmem>>, vector<32x32xf32>,
    return
  }
  func.func @transform_0(%arg0: i32) -> (i32, i32) {
    %c0_i32 = arith.constant 0 : i32
    %c0_i32_0 = arith.constant 0 : i32
    %c0_i32_1 = arith.constant 0 : i32
    return %c0_i32, %c0_i32_0 : i32, i32
  }
  func.func @transform_1(%arg0: i32) -> (i32, i32) {
    %c0_i32 = arith.constant 0 : i32
    %c0_i32_0 = arith.constant 0 : i32
    %c0_i32_1 = arith.constant 0 : i32
    return %c0_i32, %c0_i32_0 : i32, i32
  }
  func.func @transform_2(%arg0: i32) -> (i32, i32) {
    %c0_i32 = arith.constant 0 : i32
    %c0_i32_0 = arith.constant 0 : i32
    %c0_i32_1 = arith.constant 0 : i32
    return %c0_i32, %c0_i32_0 : i32, i32
  }
  func.func @transform_3(%arg0: i32) -> (i32, i32) {
    %c0_i32 = arith.constant 0 : i32
    %c0_i32_0 = arith.constant 0 : i32
    %c0_i32_1 = arith.constant 0 : i32
    return %c0_i32, %c0_i32_0 : i32, i32
  }
  func.func @transform_4(%arg0: i32) -> (i32, i32) {
    %c0_i32 = arith.constant 0 : i32
    %c0_i32_0 = arith.constant 0 : i32
    %c0_i32_1 = arith.constant 0 : i32
    return %c0_i32, %c0_i32_0 : i32, i32
  }
  func.func @transform_5(%arg0: i32) -> (i32, i32) {
    %c0_i32 = arith.constant 0 : i32
    %c0_i32_0 = arith.constant 0 : i32
    %c0_i32_1 = arith.constant 0 : i32
    return %c0_i32, %c0_i32_0 : i32, i32
  }
  func.func @transform_6(%arg0: i32) -> (i32, i32) {
    %c0_i32 = arith.constant 0 : i32
    %c0_i32_0 = arith.constant 0 : i32
    %c0_i32_1 = arith.constant 0 : i32
    return %c0_i32, %c0_i32_0 : i32, i32
  }
  func.func @transform_7(%arg0: i32) -> (i32, i32) {
    %c0_i32 = arith.constant 0 : i32
    %c0_i32_0 = arith.constant 0 : i32
    %c0_i32_1 = arith.constant 0 : i32
    return %c0_i32, %c0_i32_0 : i32, i32
  }
  func.func @transform_8(%arg0: i32) -> (i32, i32) {
    %c0_i32 = arith.constant 0 : i32
    %c0_i32_0 = arith.constant 0 : i32
    %c0_i32_1 = arith.constant 0 : i32
    return %c0_i32, %c0_i32_0 : i32, i32
  }
}

module attributes {stable_mosaic.version = 11 : i64} {
  func.func @_encoder_layer_kernel(%arg0: i32, %arg1: memref<32x32xf32, #tpu.memory_space<vmem>>, %arg2: memref<32x32xf32, #tpu.memory_space<vmem>>, %arg3: memref<1x32xf32, #tpu.memory_space<vmem>>, %arg4: memref<32x32xf32, #tpu.memory_space<vmem>>, %arg5: memref<1x32xf32, #tpu.memory_space<vmem>>, %arg6: memref<32x32xf32, #tpu.memory_space<vmem>>, %arg7: memref<1x32xf32, #tpu.memory_space<vmem>>, %arg8: memref<32x32xf32, #tpu.memory_space<vmem>>, %arg9: memref<1x32xf32, #tpu.memory_space<vmem>>, %arg10: memref<32x32xf32, #tpu.memory_space<vmem>>, %arg11: memref<32x32xf32, #tpu.memory_space<vmem>>, %arg12: memref<16x16xf32, #tpu.memory_space<vmem>>, %arg13: memref<16x16xf32, #tpu.memory_space<vmem>>, %arg14: memref<16x16xf32, #tpu.memory_space<vmem>>, %arg15: memref<1x32xf32, #tpu.memory_space<vmem>>, %arg16: memref<1x32xf32, #tpu.memory_space<vmem>>, %arg17: memref<32x32xf32, #tpu.memory_space<vmem>>) attributes {dimension_semantics = [#tpu.dimension_semantics<arbitrary>], iteration_bounds = array<i64: 1>, scalar_prefetch = 0 : i64, scratch_operands = 0 : i64, tpu.core_type = #tpu.core_type<tc>, window_params = [{pipeline_mode = #tpu.pipeline_mode<synchronous>, transform_indices = @transform_0, window_bounds = array<i64: 32, 32>}, {pipeline_mode = #tpu.pipeline_mode<synchronous>, transform_indices = @transform_1, window_bounds = array<i64: 32, 32>}, {pipeline_mode = #tpu.pipeline_mode<synchronous>, transform_indices = @transform_2, window_bounds = array<i64: 1, 32>}, {pipeline_mode = #tpu.pipeline_mode<synchronous>, transform_indices = @transform_3, window_bounds = array<i64: 32, 32>}, {pipeline_mode = #tpu.pipeline_mode<synchronous>, transform_indices = @transform_4, window_bounds = array<i64: 1, 32>}, {pipeline_mode = #tpu.pipeline_mode<synchronous>, transform_indices = @transform_5, window_bounds = array<i64: 32, 32>}, {pipeline_mode = #tpu.pipeline_mode<synchronous>, transform_indices = @transform_6, window_bounds = array<i64: 1, 32>}, {pipeline_mode = #tpu.pipeline_mode<synchronous>, transform_indices = @transform_7, window_bounds = array<i64: 32, 32>}, {pipeline_mode = #tpu.pipeline_mode<synchronous>, transform_indices = @transform_8, window_bounds = array<i64: 1, 32>}, {pipeline_mode = #tpu.pipeline_mode<synchronous>, transform_indices = @transform_9, window_bounds = array<i64: 32, 32>}, {pipeline_mode = #tpu.pipeline_mode<synchronous>, transform_indices = @transform_10, window_bounds = array<i64: 32, 32>}, {pipeline_mode = #tpu.pipeline_mode<synchronous>, transform_indices = @transform_11, window_bounds = array<i64: 16, 16>}, {pipeline_mode = #tpu.pipeline_mode<synchronous>, transform_indices = @transform_12, window_bounds = array<i64: 16, 16>}, {pipeline_mode = #tpu.pipeline_mode<synchronous>, transform_indices = @transform_13, window_bounds = array<i64: 16, 16>}, {pipeline_mode = #tpu.pipeline_mode<synchronous>, transform_indices = @transform_14, window_bounds = array<i64: 1, 32>}, {pipeline_mode = #tpu.pipeline_mode<synchronous>, transform_indices = @transform_15, window_bounds = array<i64: 1, 32>}, {pipeline_mode = #tpu.pipeline_mode<synchronous>, transform_indices = @transform_16, window_bounds = array<i64: 32, 32>}]} {
    %c0 = arith.constant 0 : index
    %c0_0 = arith.constant 0 : index
    %0 = vector.load %arg1[%c0, %c0_0] : memref<32x32xf32, #tpu.memory_space<vmem>>, vector<32x32xf32>
    %c0_1 = arith.constant 0 : index
    %c0_2 = arith.constant 0 : index
    %1 = vector.load %arg14[%c0_1, %c0_2] : memref<16x16xf32, #tpu.memory_space<vmem>>, vector<16x16xf32>
    %c0_3 = arith.constant 0 : index
    %c0_4 = arith.constant 0 : index
    %2 = vector.load %arg2[%c0_3, %c0_4] : memref<32x32xf32, #tpu.memory_space<vmem>>, vector<32x32xf32>
    %c0_5 = arith.constant 0 : index
    %c0_6 = arith.constant 0 : index
    %3 = vector.load %arg3[%c0_5, %c0_6] : memref<1x32xf32, #tpu.memory_space<vmem>>, vector<1x32xf32>
    %c0_7 = arith.constant 0 : index
    %c0_8 = arith.constant 0 : index
    %4 = vector.load %arg4[%c0_7, %c0_8] : memref<32x32xf32, #tpu.memory_space<vmem>>, vector<32x32xf32>
    %c0_9 = arith.constant 0 : index
    %c0_10 = arith.constant 0 : index
    %5 = vector.load %arg5[%c0_9, %c0_10] : memref<1x32xf32, #tpu.memory_space<vmem>>, vector<1x32xf32>
    %c0_11 = arith.constant 0 : index
    %c0_12 = arith.constant 0 : index
    %6 = vector.load %arg6[%c0_11, %c0_12] : memref<32x32xf32, #tpu.memory_space<vmem>>, vector<32x32xf32>
    %c0_13 = arith.constant 0 : index
    %c0_14 = arith.constant 0 : index
    %7 = vector.load %arg7[%c0_13, %c0_14] : memref<1x32xf32, #tpu.memory_space<vmem>>, vector<1x32xf32>
    %c0_15 = arith.constant 0 : index
    %c0_16 = arith.constant 0 : index
    %8 = vector.load %arg8[%c0_15, %c0_16] : memref<32x32xf32, #tpu.memory_space<vmem>>, vector<32x32xf32>
    %c0_17 = arith.constant 0 : index
    %c0_18 = arith.constant 0 : index
    %9 = vector.load %arg9[%c0_17, %c0_18] : memref<1x32xf32, #tpu.memory_space<vmem>>, vector<1x32xf32>
    %c0_19 = arith.constant 0 : index
    %c0_20 = arith.constant 0 : index
    %10 = vector.load %arg12[%c0_19, %c0_20] : memref<16x16xf32, #tpu.memory_space<vmem>>, vector<16x16xf32>
    %c0_21 = arith.constant 0 : index
    %c0_22 = arith.constant 0 : index
    %11 = vector.load %arg13[%c0_21, %c0_22] : memref<16x16xf32, #tpu.memory_space<vmem>>, vector<16x16xf32>
    %cst = arith.constant dense<0.000000e+00> : vector<32x32xf32>
    %12 = tpu.matmul %0, %2, %cst {dimension_numbers = #tpu.dot_dimension_numbers<[1], [0], [0], [1], [0, 0, 1, 1], [], []>} : vector<32x32xf32>, vector<32x32xf32>, vector<32x32xf32> -> vector<32x32xf32>
    %13 = vector.broadcast %3 : vector<1x32xf32> to vector<32x32xf32>
    %14 = arith.addf %12, %13 : vector<32x32xf32>
    %cst_23 = arith.constant dense<0.000000e+00> : vector<32x32xf32>
    %15 = tpu.matmul %0, %4, %cst_23 {dimension_numbers = #tpu.dot_dimension_numbers<[1], [0], [0], [1], [0, 0, 1, 1], [], []>} : vector<32x32xf32>, vector<32x32xf32>, vector<32x32xf32> -> vector<32x32xf32>
    %16 = vector.broadcast %5 : vector<1x32xf32> to vector<32x32xf32>
    %17 = arith.addf %15, %16 : vector<32x32xf32>
    %cst_24 = arith.constant dense<0.000000e+00> : vector<32x32xf32>
    %18 = tpu.matmul %0, %6, %cst_24 {dimension_numbers = #tpu.dot_dimension_numbers<[1], [0], [0], [1], [0, 0, 1, 1], [], []>} : vector<32x32xf32>, vector<32x32xf32>, vector<32x32xf32> -> vector<32x32xf32>
    %19 = vector.broadcast %7 : vector<1x32xf32> to vector<32x32xf32>
    %20 = arith.addf %18, %19 : vector<32x32xf32>
    %21 = vector.extract_strided_slice %14 {offsets = [0, 0], sizes = [16, 32], strides = [1, 1]} : vector<32x32xf32> to vector<16x32xf32>
    %22 = vector.extract_strided_slice %17 {offsets = [0, 0], sizes = [16, 32], strides = [1, 1]} : vector<32x32xf32> to vector<16x32xf32>
    %23 = vector.extract_strided_slice %20 {offsets = [0, 0], sizes = [16, 32], strides = [1, 1]} : vector<32x32xf32> to vector<16x32xf32>
    %cst_25 = arith.constant dense<0.000000e+00> : vector<16x32xf32>
    %24 = tpu.matmul %10, %21, %cst_25 {dimension_numbers = #tpu.dot_dimension_numbers<[1], [0], [0], [1], [0, 0, 1, 1], [], []>} : vector<16x16xf32>, vector<16x32xf32>, vector<16x32xf32> -> vector<16x32xf32>
    %cst_26 = arith.constant dense<0.000000e+00> : vector<16x32xf32>
    %25 = tpu.matmul %11, %21, %cst_26 {dimension_numbers = #tpu.dot_dimension_numbers<[1], [0], [0], [1], [0, 0, 1, 1], [], []>} : vector<16x16xf32>, vector<16x32xf32>, vector<16x32xf32> -> vector<16x32xf32>
    %cst_27 = arith.constant dense<0.000000e+00> : vector<16x32xf32>
    %26 = tpu.matmul %10, %22, %cst_27 {dimension_numbers = #tpu.dot_dimension_numbers<[1], [0], [0], [1], [0, 0, 1, 1], [], []>} : vector<16x16xf32>, vector<16x32xf32>, vector<16x32xf32> -> vector<16x32xf32>
    %cst_28 = arith.constant dense<0.000000e+00> : vector<16x32xf32>
    %27 = tpu.matmul %11, %22, %cst_28 {dimension_numbers = #tpu.dot_dimension_numbers<[1], [0], [0], [1], [0, 0, 1, 1], [], []>} : vector<16x16xf32>, vector<16x32xf32>, vector<16x32xf32> -> vector<16x32xf32>
    %28 = arith.mulf %24, %26 : vector<16x32xf32>
    %29 = arith.mulf %25, %27 : vector<16x32xf32>
    %30 = arith.addf %28, %29 : vector<16x32xf32>
    %cst_29 = arith.constant dense<0.000000e+00> : vector<16xf32>
    %31 = vector.multi_reduction <add>, %30, %cst_29 [1] : vector<16x32xf32> to vector<16xf32>
    %32 = vector.shape_cast %31 : vector<16xf32> to vector<16x1xf32>
    %33 = arith.mulf %24, %27 : vector<16x32xf32>
    %34 = arith.mulf %25, %26 : vector<16x32xf32>
    %35 = arith.subf %33, %34 : vector<16x32xf32>
    %cst_30 = arith.constant dense<0.000000e+00> : vector<16xf32>
    %36 = vector.multi_reduction <add>, %35, %cst_30 [1] : vector<16x32xf32> to vector<16xf32>
    %37 = vector.shape_cast %36 : vector<16xf32> to vector<16x1xf32>
    %cst_31 = arith.constant dense<0.000000e+00> : vector<16x1xf32>
    %38 = tpu.matmul %10, %32, %cst_31 {dimension_numbers = #tpu.dot_dimension_numbers<[1], [0], [0], [1], [0, 0, 1, 1], [], []>} : vector<16x16xf32>, vector<16x1xf32>, vector<16x1xf32> -> vector<16x1xf32>
    %cst_32 = arith.constant dense<0.000000e+00> : vector<16x1xf32>
    %39 = tpu.matmul %11, %37, %cst_32 {dimension_numbers = #tpu.dot_dimension_numbers<[1], [0], [0], [1], [0, 0, 1, 1], [], []>} : vector<16x16xf32>, vector<16x1xf32>, vector<16x1xf32> -> vector<16x1xf32>
    %40 = arith.subf %38, %39 : vector<16x1xf32>
    %cst_33 = arith.constant 0.001953125 : f32
    %41 = vector.broadcast %cst_33 : f32 to vector<16x1xf32>
    %42 = arith.mulf %40, %41 : vector<16x1xf32>
    %43 = vector.extract_strided_slice %14 {offsets = [16, 0], sizes = [16, 32], strides = [1, 1]} : vector<32x32xf32> to vector<16x32xf32>
    %44 = vector.extract_strided_slice %17 {offsets = [16, 0], sizes = [16, 32], strides = [1, 1]} : vector<32x32xf32> to vector<16x32xf32>
    %45 = vector.extract_strided_slice %20 {offsets = [16, 0], sizes = [16, 32], strides = [1, 1]} : vector<32x32xf32> to vector<16x32xf32>
    %cst_34 = arith.constant dense<0.000000e+00> : vector<16x32xf32>
    %46 = tpu.matmul %10, %43, %cst_34 {dimension_numbers = #tpu.dot_dimension_numbers<[1], [0], [0], [1], [0, 0, 1, 1], [], []>} : vector<16x16xf32>, vector<16x32xf32>, vector<16x32xf32> -> vector<16x32xf32>
    %cst_35 = arith.constant dense<0.000000e+00> : vector<16x32xf32>
    %47 = tpu.matmul %11, %43, %cst_35 {dimension_numbers = #tpu.dot_dimension_numbers<[1], [0], [0], [1], [0, 0, 1, 1], [], []>} : vector<16x16xf32>, vector<16x32xf32>, vector<16x32xf32> -> vector<16x32xf32>
    %cst_36 = arith.constant dense<0.000000e+00> : vector<16x32xf32>
    %48 = tpu.matmul %10, %44, %cst_36 {dimension_numbers = #tpu.dot_dimension_numbers<[1], [0], [0], [1], [0, 0, 1, 1], [], []>} : vector<16x16xf32>, vector<16x32xf32>, vector<16x32xf32> -> vector<16x32xf32>
    %cst_37 = arith.constant dense<0.000000e+00> : vector<16x32xf32>
    %49 = tpu.matmul %11, %44, %cst_37 {dimension_numbers = #tpu.dot_dimension_numbers<[1], [0], [0], [1], [0, 0, 1, 1], [], []>} : vector<16x16xf32>, vector<16x32xf32>, vector<16x32xf32> -> vector<16x32xf32>
    %50 = arith.mulf %46, %48 : vector<16x32xf32>
    %51 = arith.mulf %47, %49 : vector<16x32xf32>
    %52 = arith.addf %50, %51 : vector<16x32xf32>
    %cst_38 = arith.constant dense<0.000000e+00> : vector<16xf32>
    %53 = vector.multi_reduction <add>, %52, %cst_38 [1] : vector<16x32xf32> to vector<16xf32>
    %54 = vector.shape_cast %53 : vector<16xf32> to vector<16x1xf32>
    %55 = arith.mulf %46, %49 : vector<16x32xf32>
    %56 = arith.mulf %47, %48 : vector<16x32xf32>
    %57 = arith.subf %55, %56 : vector<16x32xf32>
    %cst_39 = arith.constant dense<0.000000e+00> : vector<16xf32>
    %58 = vector.multi_reduction <add>, %57, %cst_39 [1] : vector<16x32xf32> to vector<16xf32>
    %59 = vector.shape_cast %58 : vector<16xf32> to vector<16x1xf32>
    %cst_40 = arith.constant dense<0.000000e+00> : vector<16x1xf32>
    %60 = tpu.matmul %10, %54, %cst_40 {dimension_numbers = #tpu.dot_dimension_numbers<[1], [0], [0], [1], [0, 0, 1, 1], [], []>} : vector<16x16xf32>, vector<16x1xf32>, vector<16x1xf32> -> vector<16x1xf32>
    %cst_41 = arith.constant dense<0.000000e+00> : vector<16x1xf32>
    %61 = tpu.matmul %11, %59, %cst_41 {dimension_numbers = #tpu.dot_dimension_numbers<[1], [0], [0], [1], [0, 0, 1, 1], [], []>} : vector<16x16xf32>, vector<16x1xf32>, vector<16x1xf32> -> vector<16x1xf32>
    %62 = arith.subf %60, %61 : vector<16x1xf32>
    %cst_42 = arith.constant 0.001953125 : f32
    %63 = vector.broadcast %cst_42 : f32 to vector<16x1xf32>
    %64 = arith.mulf %62, %63 : vector<16x1xf32>
    %65 = arith.addf %42, %64 : vector<16x1xf32>
    %cst_43 = arith.constant 5.000000e-01 : f32
    %66 = vector.broadcast %cst_43 : f32 to vector<16x1xf32>
    %67 = arith.mulf %65, %66 : vector<16x1xf32>
    %68 = tpu.iota {dimensions = array<i32: 0>} : vector<16x1xi32>
    %69 = arith.sitofp %68 : vector<16x1xi32> to vector<16x1xf32>
    %cst_44 = arith.constant dense<0xFF800000> : vector<1xf32>
    %70 = vector.multi_reduction <maximumf>, %67, %cst_44 [0] : vector<16x1xf32> to vector<1xf32>
    %71 = vector.shape_cast %70 : vector<1xf32> to vector<1x1xf32>
    %72 = vector.broadcast %71 : vector<1x1xf32> to vector<16x1xf32>
    %73 = arith.cmpf oge, %67, %72 : vector<16x1xf32>
    %cst_45 = arith.constant 1.600000e+01 : f32
    %74 = vector.broadcast %cst_45 : f32 to vector<16x1xf32>
    %75 = arith.select %73, %69, %74 : vector<16x1xi1>, vector<16x1xf32>
    %cst_46 = arith.constant dense<0x7F800000> : vector<1xf32>
    %76 = vector.multi_reduction <minimumf>, %75, %cst_46 [0] : vector<16x1xf32> to vector<1xf32>
    %77 = vector.shape_cast %76 : vector<1xf32> to vector<1x1xf32>
    %78 = vector.broadcast %77 : vector<1x1xf32> to vector<16x1xf32>
    %79 = arith.cmpf oeq, %69, %78 : vector<16x1xf32>
    %cst_47 = arith.constant -1.000000e+30 : f32
    %80 = vector.broadcast %cst_47 : f32 to vector<16x1xf32>
    %81 = arith.select %79, %80, %67 : vector<16x1xi1>, vector<16x1xf32>
    %cst_48 = arith.constant dense<0xFF800000> : vector<1xf32>
    %82 = vector.multi_reduction <maximumf>, %81, %cst_48 [0] : vector<16x1xf32> to vector<1xf32>
    %83 = vector.shape_cast %82 : vector<1xf32> to vector<1x1xf32>
    %84 = vector.broadcast %83 : vector<1x1xf32> to vector<16x1xf32>
    %85 = arith.cmpf oge, %81, %84 : vector<16x1xf32>
    %cst_49 = arith.constant 1.600000e+01 : f32
    %86 = vector.broadcast %cst_49 : f32 to vector<16x1xf32>
    %87 = arith.select %85, %69, %86 : vector<16x1xi1>, vector<16x1xf32>
    %cst_50 = arith.constant dense<0x7F800000> : vector<1xf32>
    %88 = vector.multi_reduction <minimumf>, %87, %cst_50 [0] : vector<16x1xf32> to vector<1xf32>
    %89 = vector.shape_cast %88 : vector<1xf32> to vector<1x1xf32>
    %90 = tpu.iota {dimensions = array<i32: 0>} : vector<16x16xi32>
    %91 = arith.sitofp %90 : vector<16x16xi32> to vector<16x16xf32>
    %92 = tpu.iota {dimensions = array<i32: 1>} : vector<16x16xi32>
    %93 = arith.sitofp %92 : vector<16x16xi32> to vector<16x16xf32>
    %94 = arith.subf %93, %91 : vector<16x16xf32>
    %cst_51 = arith.constant 0.000000e+00 : f32
    %95 = vector.broadcast %cst_51 : f32 to vector<16x16xf32>
    %96 = arith.cmpf olt, %94, %95 : vector<16x16xf32>
    %cst_52 = arith.constant 1.600000e+01 : f32
    %97 = vector.broadcast %cst_52 : f32 to vector<16x16xf32>
    %98 = arith.addf %94, %97 : vector<16x16xf32>
    %99 = arith.select %96, %98, %94 : vector<16x16xi1>, vector<16x16xf32>
    %100 = vector.broadcast %77 : vector<1x1xf32> to vector<16x1xf32>
    %101 = arith.cmpf oeq, %69, %100 : vector<16x1xf32>
    %cst_53 = arith.constant 0.000000e+00 : f32
    %102 = vector.broadcast %cst_53 : f32 to vector<16x1xf32>
    %103 = arith.select %101, %42, %102 : vector<16x1xi1>, vector<16x1xf32>
    %cst_54 = arith.constant dense<0.000000e+00> : vector<1xf32>
    %104 = vector.multi_reduction <add>, %103, %cst_54 [0] : vector<16x1xf32> to vector<1xf32>
    %105 = vector.shape_cast %104 : vector<1xf32> to vector<1x1xf32>
    %106 = vector.broadcast %89 : vector<1x1xf32> to vector<16x1xf32>
    %107 = arith.cmpf oeq, %69, %106 : vector<16x1xf32>
    %cst_55 = arith.constant 0.000000e+00 : f32
    %108 = vector.broadcast %cst_55 : f32 to vector<16x1xf32>
    %109 = arith.select %107, %42, %108 : vector<16x1xi1>, vector<16x1xf32>
    %cst_56 = arith.constant dense<0.000000e+00> : vector<1xf32>
    %110 = vector.multi_reduction <add>, %109, %cst_56 [0] : vector<16x1xf32> to vector<1xf32>
    %111 = vector.shape_cast %110 : vector<1xf32> to vector<1x1xf32>
    %112 = arith.maximumf %105, %111 : vector<1x1xf32>
    %113 = arith.subf %105, %112 : vector<1x1xf32>
    %114 = math.exp %113 : vector<1x1xf32>
    %115 = arith.subf %111, %112 : vector<1x1xf32>
    %116 = math.exp %115 : vector<1x1xf32>
    %117 = arith.addf %114, %116 : vector<1x1xf32>
    %cst_57 = arith.constant 0.000000e+00 : f32
    %118 = vector.broadcast %cst_57 : f32 to vector<16x16xf32>
    %119 = vector.broadcast %77 : vector<1x1xf32> to vector<16x16xf32>
    %120 = arith.cmpf oeq, %99, %119 : vector<16x16xf32>
    %121 = arith.divf %114, %117 : vector<1x1xf32>
    %cst_58 = arith.constant 0.000000e+00 : f32
    %122 = vector.shape_cast %121 : vector<1x1xf32> to vector<1x1xf32>
    %123 = vector.broadcast %122 : vector<1x1xf32> to vector<16x16xf32>
    %124 = vector.broadcast %cst_58 : f32 to vector<16x16xf32>
    %125 = arith.select %120, %123, %124 : vector<16x16xi1>, vector<16x16xf32>
    %126 = arith.addf %118, %125 : vector<16x16xf32>
    %127 = vector.broadcast %89 : vector<1x1xf32> to vector<16x16xf32>
    %128 = arith.cmpf oeq, %99, %127 : vector<16x16xf32>
    %129 = arith.divf %116, %117 : vector<1x1xf32>
    %cst_59 = arith.constant 0.000000e+00 : f32
    %130 = vector.shape_cast %129 : vector<1x1xf32> to vector<1x1xf32>
    %131 = vector.broadcast %130 : vector<1x1xf32> to vector<16x16xf32>
    %132 = vector.broadcast %cst_59 : f32 to vector<16x16xf32>
    %133 = arith.select %128, %131, %132 : vector<16x16xi1>, vector<16x16xf32>
    %134 = arith.addf %126, %133 : vector<16x16xf32>
    %cst_60 = arith.constant dense<0.000000e+00> : vector<16x32xf32>
    %135 = tpu.matmul %134, %23, %cst_60 {dimension_numbers = #tpu.dot_dimension_numbers<[1], [0], [0], [1], [0, 0, 1, 1], [], []>} : vector<16x16xf32>, vector<16x32xf32>, vector<16x32xf32> -> vector<16x32xf32>
    %136 = vector.broadcast %77 : vector<1x1xf32> to vector<16x1xf32>
    %137 = arith.cmpf oeq, %69, %136 : vector<16x1xf32>
    %cst_61 = arith.constant 0.000000e+00 : f32
    %138 = vector.broadcast %cst_61 : f32 to vector<16x1xf32>
    %139 = arith.select %137, %64, %138 : vector<16x1xi1>, vector<16x1xf32>
    %cst_62 = arith.constant dense<0.000000e+00> : vector<1xf32>
    %140 = vector.multi_reduction <add>, %139, %cst_62 [0] : vector<16x1xf32> to vector<1xf32>
    %141 = vector.shape_cast %140 : vector<1xf32> to vector<1x1xf32>
    %142 = vector.broadcast %89 : vector<1x1xf32> to vector<16x1xf32>
    %143 = arith.cmpf oeq, %69, %142 : vector<16x1xf32>
    %cst_63 = arith.constant 0.000000e+00 : f32
    %144 = vector.broadcast %cst_63 : f32 to vector<16x1xf32>
    %145 = arith.select %143, %64, %144 : vector<16x1xi1>, vector<16x1xf32>
    %cst_64 = arith.constant dense<0.000000e+00> : vector<1xf32>
    %146 = vector.multi_reduction <add>, %145, %cst_64 [0] : vector<16x1xf32> to vector<1xf32>
    %147 = vector.shape_cast %146 : vector<1xf32> to vector<1x1xf32>
    %148 = arith.maximumf %141, %147 : vector<1x1xf32>
    %149 = arith.subf %141, %148 : vector<1x1xf32>
    %150 = math.exp %149 : vector<1x1xf32>
    %151 = arith.subf %147, %148 : vector<1x1xf32>
    %152 = math.exp %151 : vector<1x1xf32>
    %153 = arith.addf %150, %152 : vector<1x1xf32>
    %cst_65 = arith.constant 0.000000e+00 : f32
    %154 = vector.broadcast %cst_65 : f32 to vector<16x16xf32>
    %155 = vector.broadcast %77 : vector<1x1xf32> to vector<16x16xf32>
    %156 = arith.cmpf oeq, %99, %155 : vector<16x16xf32>
    %157 = arith.divf %150, %153 : vector<1x1xf32>
    %cst_66 = arith.constant 0.000000e+00 : f32
    %158 = vector.shape_cast %157 : vector<1x1xf32> to vector<1x1xf32>
    %159 = vector.broadcast %158 : vector<1x1xf32> to vector<16x16xf32>
    %160 = vector.broadcast %cst_66 : f32 to vector<16x16xf32>
    %161 = arith.select %156, %159, %160 : vector<16x16xi1>, vector<16x16xf32>
    %162 = arith.addf %154, %161 : vector<16x16xf32>
    %163 = vector.broadcast %89 : vector<1x1xf32> to vector<16x16xf32>
    %164 = arith.cmpf oeq, %99, %163 : vector<16x16xf32>
    %165 = arith.divf %152, %153 : vector<1x1xf32>
    %cst_67 = arith.constant 0.000000e+00 : f32
    %166 = vector.shape_cast %165 : vector<1x1xf32> to vector<1x1xf32>
    %167 = vector.broadcast %166 : vector<1x1xf32> to vector<16x16xf32>
    %168 = vector.broadcast %cst_67 : f32 to vector<16x16xf32>
    %169 = arith.select %164, %167, %168 : vector<16x16xi1>, vector<16x16xf32>
    %170 = arith.addf %162, %169 : vector<16x16xf32>
    %cst_68 = arith.constant dense<0.000000e+00> : vector<16x32xf32>
    %171 = tpu.matmul %170, %45, %cst_68 {dimension_numbers = #tpu.dot_dimension_numbers<[1], [0], [0], [1], [0, 0, 1, 1], [], []>} : vector<16x16xf32>, vector<16x32xf32>, vector<16x32xf32> -> vector<16x32xf32>
    %172 = tpu.concatenate %135, %171 in 0 : vector<16x32xf32>, vector<16x32xf32> -> vector<32x32xf32>
    %cst_69 = arith.constant dense<0.000000e+00> : vector<32x32xf32>
    %173 = tpu.matmul %172, %8, %cst_69 {dimension_numbers = #tpu.dot_dimension_numbers<[1], [0], [0], [1], [0, 0, 1, 1], [], []>} : vector<32x32xf32>, vector<32x32xf32>, vector<32x32xf32> -> vector<32x32xf32>
    %174 = arith.addf %0, %173 : vector<32x32xf32>
    %175 = vector.broadcast %9 : vector<1x32xf32> to vector<32x32xf32>
    %176 = arith.addf %174, %175 : vector<32x32xf32>
    %177 = vector.extract_strided_slice %176 {offsets = [0, 0], sizes = [16, 32], strides = [1, 1]} : vector<32x32xf32> to vector<16x32xf32>
    %cst_70 = arith.constant dense<0.000000e+00> : vector<16x32xf32>
    %178 = tpu.matmul %1, %177, %cst_70 {dimension_numbers = #tpu.dot_dimension_numbers<[1], [0], [0], [1], [0, 0, 1, 1], [], []>} : vector<16x16xf32>, vector<16x32xf32>, vector<16x32xf32> -> vector<16x32xf32>
    %179 = arith.subf %177, %178 : vector<16x32xf32>
    %180 = vector.extract_strided_slice %176 {offsets = [16, 0], sizes = [16, 32], strides = [1, 1]} : vector<32x32xf32> to vector<16x32xf32>
    %cst_71 = arith.constant dense<0.000000e+00> : vector<16x32xf32>
    %181 = tpu.matmul %1, %180, %cst_71 {dimension_numbers = #tpu.dot_dimension_numbers<[1], [0], [0], [1], [0, 0, 1, 1], [], []>} : vector<16x16xf32>, vector<16x32xf32>, vector<16x32xf32> -> vector<16x32xf32>
    %182 = arith.subf %180, %181 : vector<16x32xf32>
    %183 = tpu.concatenate %179, %182 in 0 : vector<16x32xf32>, vector<16x32xf32> -> vector<32x32xf32>
    %c0_72 = arith.constant 0 : index
    %c0_73 = arith.constant 0 : index
    %184 = vector.load %arg10[%c0_72, %c0_73] : memref<32x32xf32, #tpu.memory_space<vmem>>, vector<32x32xf32>
    %c0_74 = arith.constant 0 : index
    %c0_75 = arith.constant 0 : index
    %185 = vector.load %arg11[%c0_74, %c0_75] : memref<32x32xf32, #tpu.memory_space<vmem>>, vector<32x32xf32>
    %cst_76 = arith.constant dense<0.000000e+00> : vector<32x32xf32>
    %186 = tpu.matmul %183, %184, %cst_76 {dimension_numbers = #tpu.dot_dimension_numbers<[1], [0], [0], [1], [0, 0, 1, 1], [], []>} : vector<32x32xf32>, vector<32x32xf32>, vector<32x32xf32> -> vector<32x32xf32>
    %cst_77 = arith.constant 0.000000e+00 : f32
    %187 = vector.broadcast %cst_77 : f32 to vector<32x32xf32>
    %188 = arith.maximumf %186, %187 : vector<32x32xf32>
    %cst_78 = arith.constant dense<0.000000e+00> : vector<32x32xf32>
    %189 = tpu.matmul %188, %185, %cst_78 {dimension_numbers = #tpu.dot_dimension_numbers<[1], [0], [0], [1], [0, 0, 1, 1], [], []>} : vector<32x32xf32>, vector<32x32xf32>, vector<32x32xf32> -> vector<32x32xf32>
    %190 = arith.addf %183, %189 : vector<32x32xf32>
    %191 = vector.extract_strided_slice %190 {offsets = [0, 0], sizes = [16, 32], strides = [1, 1]} : vector<32x32xf32> to vector<16x32xf32>
    %cst_79 = arith.constant dense<0.000000e+00> : vector<16x32xf32>
    %192 = tpu.matmul %1, %191, %cst_79 {dimension_numbers = #tpu.dot_dimension_numbers<[1], [0], [0], [1], [0, 0, 1, 1], [], []>} : vector<16x16xf32>, vector<16x32xf32>, vector<16x32xf32> -> vector<16x32xf32>
    %193 = arith.subf %191, %192 : vector<16x32xf32>
    %194 = vector.extract_strided_slice %190 {offsets = [16, 0], sizes = [16, 32], strides = [1, 1]} : vector<32x32xf32> to vector<16x32xf32>
    %cst_80 = arith.constant dense<0.000000e+00> : vector<16x32xf32>
    %195 = tpu.matmul %1, %194, %cst_80 {dimension_numbers = #tpu.dot_dimension_numbers<[1], [0], [0], [1], [0, 0, 1, 1], [], []>} : vector<16x16xf32>, vector<16x32xf32>, vector<16x32xf32> -> vector<16x32xf32>
    %196 = arith.subf %194, %195 : vector<16x32xf32>
    %197 = tpu.concatenate %193, %196 in 0 : vector<16x32xf32>, vector<16x32xf32> -> vector<32x32xf32>
    %c0_81 = arith.constant 0 : index
    %c0_82 = arith.constant 0 : index
    %198 = vector.load %arg15[%c0_81, %c0_82] : memref<1x32xf32, #tpu.memory_space<vmem>>, vector<1x32xf32>
    %c0_83 = arith.constant 0 : index
    %c0_84 = arith.constant 0 : index
    %199 = vector.load %arg16[%c0_83, %c0_84] : memref<1x32xf32, #tpu.memory_space<vmem>>, vector<1x32xf32>
    %cst_85 = arith.constant dense<0.000000e+00> : vector<32xf32>
    %200 = vector.multi_reduction <add>, %197, %cst_85 [1] : vector<32x32xf32> to vector<32xf32>
    %201 = vector.shape_cast %200 : vector<32xf32> to vector<32x1xf32>
    %cst_86 = arith.constant 3.200000e+01 : f32
    %202 = vector.broadcast %cst_86 : f32 to vector<32x1xf32>
    %203 = arith.divf %201, %202 : vector<32x1xf32>
    %204 = vector.broadcast %203 : vector<32x1xf32> to vector<32x32xf32>
    %205 = arith.subf %197, %204 : vector<32x32xf32>
    %206 = arith.mulf %205, %205 : vector<32x32xf32>
    %cst_87 = arith.constant dense<0.000000e+00> : vector<32xf32>
    %207 = vector.multi_reduction <add>, %206, %cst_87 [1] : vector<32x32xf32> to vector<32xf32>
    %208 = vector.shape_cast %207 : vector<32xf32> to vector<32x1xf32>
    %cst_88 = arith.constant 3.200000e+01 : f32
    %209 = vector.broadcast %cst_88 : f32 to vector<32x1xf32>
    %210 = arith.divf %208, %209 : vector<32x1xf32>
    %211 = vector.broadcast %203 : vector<32x1xf32> to vector<32x32xf32>
    %212 = arith.subf %197, %211 : vector<32x32xf32>
    %cst_89 = arith.constant 9.99999974E-6 : f32
    %213 = vector.broadcast %cst_89 : f32 to vector<32x1xf32>
    %214 = arith.addf %210, %213 : vector<32x1xf32>
    %215 = math.rsqrt %214 : vector<32x1xf32>
    %216 = vector.broadcast %215 : vector<32x1xf32> to vector<32x32xf32>
    %217 = arith.mulf %212, %216 : vector<32x32xf32>
    %218 = vector.broadcast %198 : vector<1x32xf32> to vector<32x32xf32>
    %219 = arith.mulf %217, %218 : vector<32x32xf32>
    %220 = vector.broadcast %199 : vector<1x32xf32> to vector<32x32xf32>
    %221 = arith.addf %219, %220 : vector<32x32xf32>
    %222 = vector.extract_strided_slice %221 {offsets = [0, 0], sizes = [16, 32], strides = [1, 1]} : vector<32x32xf32> to vector<16x32xf32>
    %cst_90 = arith.constant dense<0.000000e+00> : vector<32xf32>
    %223 = vector.multi_reduction <add>, %222, %cst_90 [0] : vector<16x32xf32> to vector<32xf32>
    %224 = vector.shape_cast %223 : vector<32xf32> to vector<1x32xf32>
    %cst_91 = arith.constant 1.600000e+01 : f32
    %225 = vector.broadcast %cst_91 : f32 to vector<1x32xf32>
    %226 = arith.divf %224, %225 : vector<1x32xf32>
    %227 = vector.broadcast %226 : vector<1x32xf32> to vector<16x32xf32>
    %228 = arith.subf %222, %227 : vector<16x32xf32>
    %229 = vector.extract_strided_slice %221 {offsets = [16, 0], sizes = [16, 32], strides = [1, 1]} : vector<32x32xf32> to vector<16x32xf32>
    %cst_92 = arith.constant dense<0.000000e+00> : vector<32xf32>
    %230 = vector.multi_reduction <add>, %229, %cst_92 [0] : vector<16x32xf32> to vector<32xf32>
    %231 = vector.shape_cast %230 : vector<32xf32> to vector<1x32xf32>
    %cst_93 = arith.constant 1.600000e+01 : f32
    %232 = vector.broadcast %cst_93 : f32 to vector<1x32xf32>
    %233 = arith.divf %231, %232 : vector<1x32xf32>
    %234 = vector.broadcast %233 : vector<1x32xf32> to vector<16x32xf32>
    %235 = arith.subf %229, %234 : vector<16x32xf32>
    %236 = tpu.concatenate %228, %235 in 0 : vector<16x32xf32>, vector<16x32xf32> -> vector<32x32xf32>
    %c0_94 = arith.constant 0 : index
    %c0_95 = arith.constant 0 : index
    %237 = vector.load %arg17[%c0_94, %c0_95] : memref<32x32xf32, #tpu.memory_space<vmem>>, vector<32x32xf32>
    tpu.vector_store %arg17[%c0_94, %c0_95], %236 {strides = array<i32>} : memref<32x32xf32, #tpu.memory_space<vmem>>, vector<32x32xf32>,
    return
  }
  func.func @transform_0(%arg0: i32) -> (i32, i32) {
    %c0_i32 = arith.constant 0 : i32
    %c0_i32_0 = arith.constant 0 : i32
    %c0_i32_1 = arith.constant 0 : i32
    return %c0_i32, %c0_i32_0 : i32, i32
  }
  func.func @transform_1(%arg0: i32) -> (i32, i32) {
    %c0_i32 = arith.constant 0 : i32
    %c0_i32_0 = arith.constant 0 : i32
    %c0_i32_1 = arith.constant 0 : i32
    return %c0_i32, %c0_i32_0 : i32, i32
  }
  func.func @transform_2(%arg0: i32) -> (i32, i32) {
    %c0_i32 = arith.constant 0 : i32
    %c0_i32_0 = arith.constant 0 : i32
    %c0_i32_1 = arith.constant 0 : i32
    return %c0_i32, %c0_i32_0 : i32, i32
  }
  func.func @transform_3(%arg0: i32) -> (i32, i32) {
    %c0_i32 = arith.constant 0 : i32
    %c0_i32_0 = arith.constant 0 : i32
    %c0_i32_1 = arith.constant 0 : i32
    return %c0_i32, %c0_i32_0 : i32, i32
  }
  func.func @transform_4(%arg0: i32) -> (i32, i32) {
    %c0_i32 = arith.constant 0 : i32
    %c0_i32_0 = arith.constant 0 : i32
    %c0_i32_1 = arith.constant 0 : i32
    return %c0_i32, %c0_i32_0 : i32, i32
  }
  func.func @transform_5(%arg0: i32) -> (i32, i32) {
    %c0_i32 = arith.constant 0 : i32
    %c0_i32_0 = arith.constant 0 : i32
    %c0_i32_1 = arith.constant 0 : i32
    return %c0_i32, %c0_i32_0 : i32, i32
  }
  func.func @transform_6(%arg0: i32) -> (i32, i32) {
    %c0_i32 = arith.constant 0 : i32
    %c0_i32_0 = arith.constant 0 : i32
    %c0_i32_1 = arith.constant 0 : i32
    return %c0_i32, %c0_i32_0 : i32, i32
  }
  func.func @transform_7(%arg0: i32) -> (i32, i32) {
    %c0_i32 = arith.constant 0 : i32
    %c0_i32_0 = arith.constant 0 : i32
    %c0_i32_1 = arith.constant 0 : i32
    return %c0_i32, %c0_i32_0 : i32, i32
  }
  func.func @transform_8(%arg0: i32) -> (i32, i32) {
    %c0_i32 = arith.constant 0 : i32
    %c0_i32_0 = arith.constant 0 : i32
    %c0_i32_1 = arith.constant 0 : i32
    return %c0_i32, %c0_i32_0 : i32, i32
  }
  func.func @transform_9(%arg0: i32) -> (i32, i32) {
    %c0_i32 = arith.constant 0 : i32
    %c0_i32_0 = arith.constant 0 : i32
    %c0_i32_1 = arith.constant 0 : i32
    return %c0_i32, %c0_i32_0 : i32, i32
  }
  func.func @transform_10(%arg0: i32) -> (i32, i32) {
    %c0_i32 = arith.constant 0 : i32
    %c0_i32_0 = arith.constant 0 : i32
    %c0_i32_1 = arith.constant 0 : i32
    return %c0_i32, %c0_i32_0 : i32, i32
  }
  func.func @transform_11(%arg0: i32) -> (i32, i32) {
    %c0_i32 = arith.constant 0 : i32
    %c0_i32_0 = arith.constant 0 : i32
    %c0_i32_1 = arith.constant 0 : i32
    return %c0_i32, %c0_i32_0 : i32, i32
  }
  func.func @transform_12(%arg0: i32) -> (i32, i32) {
    %c0_i32 = arith.constant 0 : i32
    %c0_i32_0 = arith.constant 0 : i32
    %c0_i32_1 = arith.constant 0 : i32
    return %c0_i32, %c0_i32_0 : i32, i32
  }
  func.func @transform_13(%arg0: i32) -> (i32, i32) {
    %c0_i32 = arith.constant 0 : i32
    %c0_i32_0 = arith.constant 0 : i32
    %c0_i32_1 = arith.constant 0 : i32
    return %c0_i32, %c0_i32_0 : i32, i32
  }
  func.func @transform_14(%arg0: i32) -> (i32, i32) {
    %c0_i32 = arith.constant 0 : i32
    %c0_i32_0 = arith.constant 0 : i32
    %c0_i32_1 = arith.constant 0 : i32
    return %c0_i32, %c0_i32_0 : i32, i32
  }
  func.func @transform_15(%arg0: i32) -> (i32, i32) {
    %c0_i32 = arith.constant 0 : i32
    %c0_i32_0 = arith.constant 0 : i32
    %c0_i32_1 = arith.constant 0 : i32
    return %c0_i32, %c0_i32_0 : i32, i32
  }
  func.func @transform_16(%arg0: i32) -> (i32, i32) {
    %c0_i32 = arith.constant 0 : i32
    %c0_i32_0 = arith.constant 0 : i32
    %c0_i32_1 = arith.constant 0 : i32
    return %c0_i32, %c0_i32_0 : i32, i32
  }
}

module attributes {stable_mosaic.version = 11 : i64} {
  func.func @_decomp_embed_kernel(%arg0: i32, %arg1: memref<32x4xf32, #tpu.memory_space<vmem>>, %arg2: memref<32x4xf32, #tpu.memory_space<vmem>>, %arg3: memref<4x32xf32, #tpu.memory_space<vmem>>, %arg4: memref<4x32xf32, #tpu.memory_space<vmem>>, %arg5: memref<4x32xf32, #tpu.memory_space<vmem>>, %arg6: memref<4x32xf32, #tpu.memory_space<vmem>>, %arg7: memref<16x16xf32, #tpu.memory_space<vmem>>, %arg8: memref<16x16xf32, #tpu.memory_space<vmem>>, %arg9: memref<16x16xf32, #tpu.memory_space<vmem>>, %arg10: memref<32x32xf32, #tpu.memory_space<vmem>>, %arg11: memref<32x4xf32, #tpu.memory_space<vmem>>) attributes {dimension_semantics = [#tpu.dimension_semantics<arbitrary>], iteration_bounds = array<i64: 1>, scalar_prefetch = 0 : i64, scratch_operands = 0 : i64, tpu.core_type = #tpu.core_type<tc>, window_params = [{pipeline_mode = #tpu.pipeline_mode<synchronous>, transform_indices = @transform_0, window_bounds = array<i64: 32, 4>}, {pipeline_mode = #tpu.pipeline_mode<synchronous>, transform_indices = @transform_1, window_bounds = array<i64: 32, 4>}, {pipeline_mode = #tpu.pipeline_mode<synchronous>, transform_indices = @transform_2, window_bounds = array<i64: 4, 32>}, {pipeline_mode = #tpu.pipeline_mode<synchronous>, transform_indices = @transform_3, window_bounds = array<i64: 4, 32>}, {pipeline_mode = #tpu.pipeline_mode<synchronous>, transform_indices = @transform_4, window_bounds = array<i64: 4, 32>}, {pipeline_mode = #tpu.pipeline_mode<synchronous>, transform_indices = @transform_5, window_bounds = array<i64: 4, 32>}, {pipeline_mode = #tpu.pipeline_mode<synchronous>, transform_indices = @transform_6, window_bounds = array<i64: 16, 16>}, {pipeline_mode = #tpu.pipeline_mode<synchronous>, transform_indices = @transform_7, window_bounds = array<i64: 16, 16>}, {pipeline_mode = #tpu.pipeline_mode<synchronous>, transform_indices = @transform_8, window_bounds = array<i64: 16, 16>}, {pipeline_mode = #tpu.pipeline_mode<synchronous>, transform_indices = @transform_9, window_bounds = array<i64: 32, 32>}, {pipeline_mode = #tpu.pipeline_mode<synchronous>, transform_indices = @transform_10, window_bounds = array<i64: 32, 4>}]} {
    %c0 = arith.constant 0 : index
    %c0_0 = arith.constant 0 : index
    %0 = vector.load %arg1[%c0, %c0_0] : memref<32x4xf32, #tpu.memory_space<vmem>>, vector<32x4xf32>
    %c0_1 = arith.constant 0 : index
    %c0_2 = arith.constant 0 : index
    %1 = vector.load %arg9[%c0_1, %c0_2] : memref<16x16xf32, #tpu.memory_space<vmem>>, vector<16x16xf32>
    %2 = vector.extract_strided_slice %0 {offsets = [0, 0], sizes = [16, 4], strides = [1, 1]} : vector<32x4xf32> to vector<16x4xf32>
    %cst = arith.constant dense<0.000000e+00> : vector<16x4xf32>
    %3 = tpu.matmul %1, %2, %cst {dimension_numbers = #tpu.dot_dimension_numbers<[1], [0], [0], [1], [0, 0, 1, 1], [], []>} : vector<16x16xf32>, vector<16x4xf32>, vector<16x4xf32> -> vector<16x4xf32>
    %4 = arith.subf %2, %3 : vector<16x4xf32>
    %5 = vector.extract_strided_slice %0 {offsets = [16, 0], sizes = [16, 4], strides = [1, 1]} : vector<32x4xf32> to vector<16x4xf32>
    %cst_3 = arith.constant dense<0.000000e+00> : vector<16x4xf32>
    %6 = tpu.matmul %1, %5, %cst_3 {dimension_numbers = #tpu.dot_dimension_numbers<[1], [0], [0], [1], [0, 0, 1, 1], [], []>} : vector<16x16xf32>, vector<16x4xf32>, vector<16x4xf32> -> vector<16x4xf32>
    %7 = arith.subf %5, %6 : vector<16x4xf32>
    %8 = tpu.concatenate %4, %7 in 0 : vector<16x4xf32>, vector<16x4xf32> -> vector<32x4xf32>
    %9 = tpu.concatenate %3, %6 in 0 : vector<16x4xf32>, vector<16x4xf32> -> vector<32x4xf32>
    %c0_4 = arith.constant 0 : index
    %c0_5 = arith.constant 0 : index
    %10 = vector.load %arg3[%c0_4, %c0_5] : memref<4x32xf32, #tpu.memory_space<vmem>>, vector<4x32xf32>
    %c0_6 = arith.constant 0 : index
    %c0_7 = arith.constant 0 : index
    %11 = vector.load %arg4[%c0_6, %c0_7] : memref<4x32xf32, #tpu.memory_space<vmem>>, vector<4x32xf32>
    %c0_8 = arith.constant 0 : index
    %c0_9 = arith.constant 0 : index
    %12 = vector.load %arg5[%c0_8, %c0_9] : memref<4x32xf32, #tpu.memory_space<vmem>>, vector<4x32xf32>
    %c0_10 = arith.constant 0 : index
    %c0_11 = arith.constant 0 : index
    %13 = vector.load %arg7[%c0_10, %c0_11] : memref<16x16xf32, #tpu.memory_space<vmem>>, vector<16x16xf32>
    %c0_12 = arith.constant 0 : index
    %c0_13 = arith.constant 0 : index
    %14 = vector.load %arg8[%c0_12, %c0_13] : memref<16x16xf32, #tpu.memory_space<vmem>>, vector<16x16xf32>
    %cst_14 = arith.constant dense<0.000000e+00> : vector<32x32xf32>
    %15 = tpu.matmul %8, %10, %cst_14 {dimension_numbers = #tpu.dot_dimension_numbers<[1], [0], [0], [1], [0, 0, 1, 1], [], []>} : vector<32x4xf32>, vector<4x32xf32>, vector<32x32xf32> -> vector<32x32xf32>
    %cst_15 = arith.constant dense<0.000000e+00> : vector<32x32xf32>
    %16 = tpu.matmul %8, %11, %cst_15 {dimension_numbers = #tpu.dot_dimension_numbers<[1], [0], [0], [1], [0, 0, 1, 1], [], []>} : vector<32x4xf32>, vector<4x32xf32>, vector<32x32xf32> -> vector<32x32xf32>
    %cst_16 = arith.constant dense<0.000000e+00> : vector<32x32xf32>
    %17 = tpu.matmul %8, %12, %cst_16 {dimension_numbers = #tpu.dot_dimension_numbers<[1], [0], [0], [1], [0, 0, 1, 1], [], []>} : vector<32x4xf32>, vector<4x32xf32>, vector<32x32xf32> -> vector<32x32xf32>
    %18 = vector.extract_strided_slice %15 {offsets = [0, 0], sizes = [16, 32], strides = [1, 1]} : vector<32x32xf32> to vector<16x32xf32>
    %cst_17 = arith.constant dense<0.000000e+00> : vector<16x32xf32>
    %19 = tpu.matmul %13, %18, %cst_17 {dimension_numbers = #tpu.dot_dimension_numbers<[1], [0], [0], [1], [0, 0, 1, 1], [], []>} : vector<16x16xf32>, vector<16x32xf32>, vector<16x32xf32> -> vector<16x32xf32>
    %20 = vector.extract_strided_slice %16 {offsets = [0, 0], sizes = [16, 32], strides = [1, 1]} : vector<32x32xf32> to vector<16x32xf32>
    %21 = arith.addf %19, %20 : vector<16x32xf32>
    %22 = vector.extract_strided_slice %17 {offsets = [0, 0], sizes = [16, 32], strides = [1, 1]} : vector<32x32xf32> to vector<16x32xf32>
    %cst_18 = arith.constant dense<0.000000e+00> : vector<16x32xf32>
    %23 = tpu.matmul %14, %22, %cst_18 {dimension_numbers = #tpu.dot_dimension_numbers<[1], [0], [0], [1], [0, 0, 1, 1], [], []>} : vector<16x16xf32>, vector<16x32xf32>, vector<16x32xf32> -> vector<16x32xf32>
    %24 = arith.addf %21, %23 : vector<16x32xf32>
    %25 = vector.extract_strided_slice %15 {offsets = [16, 0], sizes = [16, 32], strides = [1, 1]} : vector<32x32xf32> to vector<16x32xf32>
    %cst_19 = arith.constant dense<0.000000e+00> : vector<16x32xf32>
    %26 = tpu.matmul %13, %25, %cst_19 {dimension_numbers = #tpu.dot_dimension_numbers<[1], [0], [0], [1], [0, 0, 1, 1], [], []>} : vector<16x16xf32>, vector<16x32xf32>, vector<16x32xf32> -> vector<16x32xf32>
    %27 = vector.extract_strided_slice %16 {offsets = [16, 0], sizes = [16, 32], strides = [1, 1]} : vector<32x32xf32> to vector<16x32xf32>
    %28 = arith.addf %26, %27 : vector<16x32xf32>
    %29 = vector.extract_strided_slice %17 {offsets = [16, 0], sizes = [16, 32], strides = [1, 1]} : vector<32x32xf32> to vector<16x32xf32>
    %cst_20 = arith.constant dense<0.000000e+00> : vector<16x32xf32>
    %30 = tpu.matmul %14, %29, %cst_20 {dimension_numbers = #tpu.dot_dimension_numbers<[1], [0], [0], [1], [0, 0, 1, 1], [], []>} : vector<16x16xf32>, vector<16x32xf32>, vector<16x32xf32> -> vector<16x32xf32>
    %31 = arith.addf %28, %30 : vector<16x32xf32>
    %32 = tpu.concatenate %24, %31 in 0 : vector<16x32xf32>, vector<16x32xf32> -> vector<32x32xf32>
    %c0_21 = arith.constant 0 : index
    %c0_22 = arith.constant 0 : index
    %33 = vector.load %arg2[%c0_21, %c0_22] : memref<32x4xf32, #tpu.memory_space<vmem>>, vector<32x4xf32>
    %c0_23 = arith.constant 0 : index
    %c0_24 = arith.constant 0 : index
    %34 = vector.load %arg6[%c0_23, %c0_24] : memref<4x32xf32, #tpu.memory_space<vmem>>, vector<4x32xf32>
    %cst_25 = arith.constant dense<0.000000e+00> : vector<32x32xf32>
    %35 = tpu.matmul %33, %34, %cst_25 {dimension_numbers = #tpu.dot_dimension_numbers<[1], [0], [0], [1], [0, 0, 1, 1], [], []>} : vector<32x4xf32>, vector<4x32xf32>, vector<32x32xf32> -> vector<32x32xf32>
    %36 = arith.addf %32, %35 : vector<32x32xf32>
    %c0_26 = arith.constant 0 : index
    %c0_27 = arith.constant 0 : index
    %37 = vector.load %arg10[%c0_26, %c0_27] : memref<32x32xf32, #tpu.memory_space<vmem>>, vector<32x32xf32>
    tpu.vector_store %arg10[%c0_26, %c0_27], %36 {strides = array<i32>} : memref<32x32xf32, #tpu.memory_space<vmem>>, vector<32x32xf32>,
    %c0_28 = arith.constant 0 : index
    %c0_29 = arith.constant 0 : index
    %38 = vector.load %arg11[%c0_28, %c0_29] : memref<32x4xf32, #tpu.memory_space<vmem>>, vector<32x4xf32>
    tpu.vector_store %arg11[%c0_28, %c0_29], %9 {strides = array<i32>} : memref<32x4xf32, #tpu.memory_space<vmem>>, vector<32x4xf32>,
    return
  }
  func.func @transform_0(%arg0: i32) -> (i32, i32) {
    %c0_i32 = arith.constant 0 : i32
    %c0_i32_0 = arith.constant 0 : i32
    %c0_i32_1 = arith.constant 0 : i32
    return %c0_i32, %c0_i32_0 : i32, i32
  }
  func.func @transform_1(%arg0: i32) -> (i32, i32) {
    %c0_i32 = arith.constant 0 : i32
    %c0_i32_0 = arith.constant 0 : i32
    %c0_i32_1 = arith.constant 0 : i32
    return %c0_i32, %c0_i32_0 : i32, i32
  }
  func.func @transform_2(%arg0: i32) -> (i32, i32) {
    %c0_i32 = arith.constant 0 : i32
    %c0_i32_0 = arith.constant 0 : i32
    %c0_i32_1 = arith.constant 0 : i32
    return %c0_i32, %c0_i32_0 : i32, i32
  }
  func.func @transform_3(%arg0: i32) -> (i32, i32) {
    %c0_i32 = arith.constant 0 : i32
    %c0_i32_0 = arith.constant 0 : i32
    %c0_i32_1 = arith.constant 0 : i32
    return %c0_i32, %c0_i32_0 : i32, i32
  }
  func.func @transform_4(%arg0: i32) -> (i32, i32) {
    %c0_i32 = arith.constant 0 : i32
    %c0_i32_0 = arith.constant 0 : i32
    %c0_i32_1 = arith.constant 0 : i32
    return %c0_i32, %c0_i32_0 : i32, i32
  }
  func.func @transform_5(%arg0: i32) -> (i32, i32) {
    %c0_i32 = arith.constant 0 : i32
    %c0_i32_0 = arith.constant 0 : i32
    %c0_i32_1 = arith.constant 0 : i32
    return %c0_i32, %c0_i32_0 : i32, i32
  }
  func.func @transform_6(%arg0: i32) -> (i32, i32) {
    %c0_i32 = arith.constant 0 : i32
    %c0_i32_0 = arith.constant 0 : i32
    %c0_i32_1 = arith.constant 0 : i32
    return %c0_i32, %c0_i32_0 : i32, i32
  }
  func.func @transform_7(%arg0: i32) -> (i32, i32) {
    %c0_i32 = arith.constant 0 : i32
    %c0_i32_0 = arith.constant 0 : i32
    %c0_i32_1 = arith.constant 0 : i32
    return %c0_i32, %c0_i32_0 : i32, i32
  }
  func.func @transform_8(%arg0: i32) -> (i32, i32) {
    %c0_i32 = arith.constant 0 : i32
    %c0_i32_0 = arith.constant 0 : i32
    %c0_i32_1 = arith.constant 0 : i32
    return %c0_i32, %c0_i32_0 : i32, i32
  }
  func.func @transform_9(%arg0: i32) -> (i32, i32) {
    %c0_i32 = arith.constant 0 : i32
    %c0_i32_0 = arith.constant 0 : i32
    %c0_i32_1 = arith.constant 0 : i32
    return %c0_i32, %c0_i32_0 : i32, i32
  }
  func.func @transform_10(%arg0: i32) -> (i32, i32) {
    %c0_i32 = arith.constant 0 : i32
    %c0_i32_0 = arith.constant 0 : i32
    %c0_i32_1 = arith.constant 0 : i32
    return %c0_i32, %c0_i32_0 : i32, i32
  }
}

module attributes {stable_mosaic.version = 11 : i64} {
  func.func @_decoder_layer_kernel(%arg0: i32, %arg1: memref<32x32xf32, #tpu.memory_space<vmem>>, %arg2: memref<32x32xf32, #tpu.memory_space<vmem>>, %arg3: memref<32x4xf32, #tpu.memory_space<vmem>>, %arg4: memref<32x32xf32, #tpu.memory_space<vmem>>, %arg5: memref<1x32xf32, #tpu.memory_space<vmem>>, %arg6: memref<32x32xf32, #tpu.memory_space<vmem>>, %arg7: memref<1x32xf32, #tpu.memory_space<vmem>>, %arg8: memref<32x32xf32, #tpu.memory_space<vmem>>, %arg9: memref<1x32xf32, #tpu.memory_space<vmem>>, %arg10: memref<32x32xf32, #tpu.memory_space<vmem>>, %arg11: memref<1x32xf32, #tpu.memory_space<vmem>>, %arg12: memref<32x32xf32, #tpu.memory_space<vmem>>, %arg13: memref<1x32xf32, #tpu.memory_space<vmem>>, %arg14: memref<32x32xf32, #tpu.memory_space<vmem>>, %arg15: memref<1x32xf32, #tpu.memory_space<vmem>>, %arg16: memref<32x32xf32, #tpu.memory_space<vmem>>, %arg17: memref<1x32xf32, #tpu.memory_space<vmem>>, %arg18: memref<32x32xf32, #tpu.memory_space<vmem>>, %arg19: memref<1x32xf32, #tpu.memory_space<vmem>>, %arg20: memref<32x32xf32, #tpu.memory_space<vmem>>, %arg21: memref<32x32xf32, #tpu.memory_space<vmem>>, %arg22: memref<32x4xf32, #tpu.memory_space<vmem>>, %arg23: memref<32x4xf32, #tpu.memory_space<vmem>>, %arg24: memref<32x4xf32, #tpu.memory_space<vmem>>, %arg25: memref<16x16xf32, #tpu.memory_space<vmem>>, %arg26: memref<16x16xf32, #tpu.memory_space<vmem>>, %arg27: memref<16x16xf32, #tpu.memory_space<vmem>>, %arg28: memref<16x16xf32, #tpu.memory_space<vmem>>, %arg29: memref<16x16xf32, #tpu.memory_space<vmem>>, %arg30: memref<32x32xf32, #tpu.memory_space<vmem>>, %arg31: memref<32x4xf32, #tpu.memory_space<vmem>>) attributes {dimension_semantics = [#tpu.dimension_semantics<arbitrary>], iteration_bounds = array<i64: 1>, scalar_prefetch = 0 : i64, scratch_operands = 0 : i64, tpu.core_type = #tpu.core_type<tc>, window_params = [{pipeline_mode = #tpu.pipeline_mode<synchronous>, transform_indices = @transform_0, window_bounds = array<i64: 32, 32>}, {pipeline_mode = #tpu.pipeline_mode<synchronous>, transform_indices = @transform_1, window_bounds = array<i64: 32, 32>}, {pipeline_mode = #tpu.pipeline_mode<synchronous>, transform_indices = @transform_2, window_bounds = array<i64: 32, 4>}, {pipeline_mode = #tpu.pipeline_mode<synchronous>, transform_indices = @transform_3, window_bounds = array<i64: 32, 32>}, {pipeline_mode = #tpu.pipeline_mode<synchronous>, transform_indices = @transform_4, window_bounds = array<i64: 1, 32>}, {pipeline_mode = #tpu.pipeline_mode<synchronous>, transform_indices = @transform_5, window_bounds = array<i64: 32, 32>}, {pipeline_mode = #tpu.pipeline_mode<synchronous>, transform_indices = @transform_6, window_bounds = array<i64: 1, 32>}, {pipeline_mode = #tpu.pipeline_mode<synchronous>, transform_indices = @transform_7, window_bounds = array<i64: 32, 32>}, {pipeline_mode = #tpu.pipeline_mode<synchronous>, transform_indices = @transform_8, window_bounds = array<i64: 1, 32>}, {pipeline_mode = #tpu.pipeline_mode<synchronous>, transform_indices = @transform_9, window_bounds = array<i64: 32, 32>}, {pipeline_mode = #tpu.pipeline_mode<synchronous>, transform_indices = @transform_10, window_bounds = array<i64: 1, 32>}, {pipeline_mode = #tpu.pipeline_mode<synchronous>, transform_indices = @transform_11, window_bounds = array<i64: 32, 32>}, {pipeline_mode = #tpu.pipeline_mode<synchronous>, transform_indices = @transform_12, window_bounds = array<i64: 1, 32>}, {pipeline_mode = #tpu.pipeline_mode<synchronous>, transform_indices = @transform_13, window_bounds = array<i64: 32, 32>}, {pipeline_mode = #tpu.pipeline_mode<synchronous>, transform_indices = @transform_14, window_bounds = array<i64: 1, 32>}, {pipeline_mode = #tpu.pipeline_mode<synchronous>, transform_indices = @transform_15, window_bounds = array<i64: 32, 32>}, {pipeline_mode = #tpu.pipeline_mode<synchronous>, transform_indices = @transform_16, window_bounds = array<i64: 1, 32>}, {pipeline_mode = #tpu.pipeline_mode<synchronous>, transform_indices = @transform_17, window_bounds = array<i64: 32, 32>}, {pipeline_mode = #tpu.pipeline_mode<synchronous>, transform_indices = @transform_18, window_bounds = array<i64: 1, 32>}, {pipeline_mode = #tpu.pipeline_mode<synchronous>, transform_indices = @transform_19, window_bounds = array<i64: 32, 32>}, {pipeline_mode = #tpu.pipeline_mode<synchronous>, transform_indices = @transform_20, window_bounds = array<i64: 32, 32>}, {pipeline_mode = #tpu.pipeline_mode<synchronous>, transform_indices = @transform_21, window_bounds = array<i64: 32, 4>}, {pipeline_mode = #tpu.pipeline_mode<synchronous>, transform_indices = @transform_22, window_bounds = array<i64: 32, 4>}, {pipeline_mode = #tpu.pipeline_mode<synchronous>, transform_indices = @transform_23, window_bounds = array<i64: 32, 4>}, {pipeline_mode = #tpu.pipeline_mode<synchronous>, transform_indices = @transform_24, window_bounds = array<i64: 16, 16>}, {pipeline_mode = #tpu.pipeline_mode<synchronous>, transform_indices = @transform_25, window_bounds = array<i64: 16, 16>}, {pipeline_mode = #tpu.pipeline_mode<synchronous>, transform_indices = @transform_26, window_bounds = array<i64: 16, 16>}, {pipeline_mode = #tpu.pipeline_mode<synchronous>, transform_indices = @transform_27, window_bounds = array<i64: 16, 16>}, {pipeline_mode = #tpu.pipeline_mode<synchronous>, transform_indices = @transform_28, window_bounds = array<i64: 16, 16>}, {pipeline_mode = #tpu.pipeline_mode<synchronous>, transform_indices = @transform_29, window_bounds = array<i64: 32, 32>}, {pipeline_mode = #tpu.pipeline_mode<synchronous>, transform_indices = @transform_30, window_bounds = array<i64: 32, 4>}]} {
    %c0 = arith.constant 0 : index
    %c0_0 = arith.constant 0 : index
    %0 = vector.load %arg1[%c0, %c0_0] : memref<32x32xf32, #tpu.memory_space<vmem>>, vector<32x32xf32>
    %c0_1 = arith.constant 0 : index
    %c0_2 = arith.constant 0 : index
    %1 = vector.load %arg2[%c0_1, %c0_2] : memref<32x32xf32, #tpu.memory_space<vmem>>, vector<32x32xf32>
    %c0_3 = arith.constant 0 : index
    %c0_4 = arith.constant 0 : index
    %2 = vector.load %arg25[%c0_3, %c0_4] : memref<16x16xf32, #tpu.memory_space<vmem>>, vector<16x16xf32>
    %c0_5 = arith.constant 0 : index
    %c0_6 = arith.constant 0 : index
    %3 = vector.load %arg26[%c0_5, %c0_6] : memref<16x16xf32, #tpu.memory_space<vmem>>, vector<16x16xf32>
    %c0_7 = arith.constant 0 : index
    %c0_8 = arith.constant 0 : index
    %4 = vector.load %arg27[%c0_7, %c0_8] : memref<16x16xf32, #tpu.memory_space<vmem>>, vector<16x16xf32>
    %c0_9 = arith.constant 0 : index
    %c0_10 = arith.constant 0 : index
    %5 = vector.load %arg4[%c0_9, %c0_10] : memref<32x32xf32, #tpu.memory_space<vmem>>, vector<32x32xf32>
    %c0_11 = arith.constant 0 : index
    %c0_12 = arith.constant 0 : index
    %6 = vector.load %arg5[%c0_11, %c0_12] : memref<1x32xf32, #tpu.memory_space<vmem>>, vector<1x32xf32>
    %c0_13 = arith.constant 0 : index
    %c0_14 = arith.constant 0 : index
    %7 = vector.load %arg6[%c0_13, %c0_14] : memref<32x32xf32, #tpu.memory_space<vmem>>, vector<32x32xf32>
    %c0_15 = arith.constant 0 : index
    %c0_16 = arith.constant 0 : index
    %8 = vector.load %arg7[%c0_15, %c0_16] : memref<1x32xf32, #tpu.memory_space<vmem>>, vector<1x32xf32>
    %c0_17 = arith.constant 0 : index
    %c0_18 = arith.constant 0 : index
    %9 = vector.load %arg8[%c0_17, %c0_18] : memref<32x32xf32, #tpu.memory_space<vmem>>, vector<32x32xf32>
    %c0_19 = arith.constant 0 : index
    %c0_20 = arith.constant 0 : index
    %10 = vector.load %arg9[%c0_19, %c0_20] : memref<1x32xf32, #tpu.memory_space<vmem>>, vector<1x32xf32>
    %c0_21 = arith.constant 0 : index
    %c0_22 = arith.constant 0 : index
    %11 = vector.load %arg10[%c0_21, %c0_22] : memref<32x32xf32, #tpu.memory_space<vmem>>, vector<32x32xf32>
    %c0_23 = arith.constant 0 : index
    %c0_24 = arith.constant 0 : index
    %12 = vector.load %arg11[%c0_23, %c0_24] : memref<1x32xf32, #tpu.memory_space<vmem>>, vector<1x32xf32>
    %cst = arith.constant dense<0.000000e+00> : vector<32x32xf32>
    %13 = tpu.matmul %0, %5, %cst {dimension_numbers = #tpu.dot_dimension_numbers<[1], [0], [0], [1], [0, 0, 1, 1], [], []>} : vector<32x32xf32>, vector<32x32xf32>, vector<32x32xf32> -> vector<32x32xf32>
    %14 = vector.broadcast %6 : vector<1x32xf32> to vector<32x32xf32>
    %15 = arith.addf %13, %14 : vector<32x32xf32>
    %cst_25 = arith.constant dense<0.000000e+00> : vector<32x32xf32>
    %16 = tpu.matmul %0, %7, %cst_25 {dimension_numbers = #tpu.dot_dimension_numbers<[1], [0], [0], [1], [0, 0, 1, 1], [], []>} : vector<32x32xf32>, vector<32x32xf32>, vector<32x32xf32> -> vector<32x32xf32>
    %17 = vector.broadcast %8 : vector<1x32xf32> to vector<32x32xf32>
    %18 = arith.addf %16, %17 : vector<32x32xf32>
    %cst_26 = arith.constant dense<0.000000e+00> : vector<32x32xf32>
    %19 = tpu.matmul %0, %9, %cst_26 {dimension_numbers = #tpu.dot_dimension_numbers<[1], [0], [0], [1], [0, 0, 1, 1], [], []>} : vector<32x32xf32>, vector<32x32xf32>, vector<32x32xf32> -> vector<32x32xf32>
    %20 = vector.broadcast %10 : vector<1x32xf32> to vector<32x32xf32>
    %21 = arith.addf %19, %20 : vector<32x32xf32>
    %22 = vector.extract_strided_slice %15 {offsets = [0, 0], sizes = [16, 32], strides = [1, 1]} : vector<32x32xf32> to vector<16x32xf32>
    %23 = vector.extract_strided_slice %18 {offsets = [0, 0], sizes = [16, 32], strides = [1, 1]} : vector<32x32xf32> to vector<16x32xf32>
    %24 = vector.extract_strided_slice %21 {offsets = [0, 0], sizes = [16, 32], strides = [1, 1]} : vector<32x32xf32> to vector<16x32xf32>
    %cst_27 = arith.constant dense<0.000000e+00> : vector<16x32xf32>
    %25 = tpu.matmul %2, %22, %cst_27 {dimension_numbers = #tpu.dot_dimension_numbers<[1], [0], [0], [1], [0, 0, 1, 1], [], []>} : vector<16x16xf32>, vector<16x32xf32>, vector<16x32xf32> -> vector<16x32xf32>
    %cst_28 = arith.constant dense<0.000000e+00> : vector<16x32xf32>
    %26 = tpu.matmul %3, %22, %cst_28 {dimension_numbers = #tpu.dot_dimension_numbers<[1], [0], [0], [1], [0, 0, 1, 1], [], []>} : vector<16x16xf32>, vector<16x32xf32>, vector<16x32xf32> -> vector<16x32xf32>
    %cst_29 = arith.constant dense<0.000000e+00> : vector<16x32xf32>
    %27 = tpu.matmul %2, %23, %cst_29 {dimension_numbers = #tpu.dot_dimension_numbers<[1], [0], [0], [1], [0, 0, 1, 1], [], []>} : vector<16x16xf32>, vector<16x32xf32>, vector<16x32xf32> -> vector<16x32xf32>
    %cst_30 = arith.constant dense<0.000000e+00> : vector<16x32xf32>
    %28 = tpu.matmul %3, %23, %cst_30 {dimension_numbers = #tpu.dot_dimension_numbers<[1], [0], [0], [1], [0, 0, 1, 1], [], []>} : vector<16x16xf32>, vector<16x32xf32>, vector<16x32xf32> -> vector<16x32xf32>
    %29 = arith.mulf %25, %27 : vector<16x32xf32>
    %30 = arith.mulf %26, %28 : vector<16x32xf32>
    %31 = arith.addf %29, %30 : vector<16x32xf32>
    %cst_31 = arith.constant dense<0.000000e+00> : vector<16xf32>
    %32 = vector.multi_reduction <add>, %31, %cst_31 [1] : vector<16x32xf32> to vector<16xf32>
    %33 = vector.shape_cast %32 : vector<16xf32> to vector<16x1xf32>
    %34 = arith.mulf %25, %28 : vector<16x32xf32>
    %35 = arith.mulf %26, %27 : vector<16x32xf32>
    %36 = arith.subf %34, %35 : vector<16x32xf32>
    %cst_32 = arith.constant dense<0.000000e+00> : vector<16xf32>
    %37 = vector.multi_reduction <add>, %36, %cst_32 [1] : vector<16x32xf32> to vector<16xf32>
    %38 = vector.shape_cast %37 : vector<16xf32> to vector<16x1xf32>
    %cst_33 = arith.constant dense<0.000000e+00> : vector<16x1xf32>
    %39 = tpu.matmul %2, %33, %cst_33 {dimension_numbers = #tpu.dot_dimension_numbers<[1], [0], [0], [1], [0, 0, 1, 1], [], []>} : vector<16x16xf32>, vector<16x1xf32>, vector<16x1xf32> -> vector<16x1xf32>
    %cst_34 = arith.constant dense<0.000000e+00> : vector<16x1xf32>
    %40 = tpu.matmul %3, %38, %cst_34 {dimension_numbers = #tpu.dot_dimension_numbers<[1], [0], [0], [1], [0, 0, 1, 1], [], []>} : vector<16x16xf32>, vector<16x1xf32>, vector<16x1xf32> -> vector<16x1xf32>
    %41 = arith.subf %39, %40 : vector<16x1xf32>
    %cst_35 = arith.constant 0.001953125 : f32
    %42 = vector.broadcast %cst_35 : f32 to vector<16x1xf32>
    %43 = arith.mulf %41, %42 : vector<16x1xf32>
    %44 = vector.extract_strided_slice %15 {offsets = [16, 0], sizes = [16, 32], strides = [1, 1]} : vector<32x32xf32> to vector<16x32xf32>
    %45 = vector.extract_strided_slice %18 {offsets = [16, 0], sizes = [16, 32], strides = [1, 1]} : vector<32x32xf32> to vector<16x32xf32>
    %46 = vector.extract_strided_slice %21 {offsets = [16, 0], sizes = [16, 32], strides = [1, 1]} : vector<32x32xf32> to vector<16x32xf32>
    %cst_36 = arith.constant dense<0.000000e+00> : vector<16x32xf32>
    %47 = tpu.matmul %2, %44, %cst_36 {dimension_numbers = #tpu.dot_dimension_numbers<[1], [0], [0], [1], [0, 0, 1, 1], [], []>} : vector<16x16xf32>, vector<16x32xf32>, vector<16x32xf32> -> vector<16x32xf32>
    %cst_37 = arith.constant dense<0.000000e+00> : vector<16x32xf32>
    %48 = tpu.matmul %3, %44, %cst_37 {dimension_numbers = #tpu.dot_dimension_numbers<[1], [0], [0], [1], [0, 0, 1, 1], [], []>} : vector<16x16xf32>, vector<16x32xf32>, vector<16x32xf32> -> vector<16x32xf32>
    %cst_38 = arith.constant dense<0.000000e+00> : vector<16x32xf32>
    %49 = tpu.matmul %2, %45, %cst_38 {dimension_numbers = #tpu.dot_dimension_numbers<[1], [0], [0], [1], [0, 0, 1, 1], [], []>} : vector<16x16xf32>, vector<16x32xf32>, vector<16x32xf32> -> vector<16x32xf32>
    %cst_39 = arith.constant dense<0.000000e+00> : vector<16x32xf32>
    %50 = tpu.matmul %3, %45, %cst_39 {dimension_numbers = #tpu.dot_dimension_numbers<[1], [0], [0], [1], [0, 0, 1, 1], [], []>} : vector<16x16xf32>, vector<16x32xf32>, vector<16x32xf32> -> vector<16x32xf32>
    %51 = arith.mulf %47, %49 : vector<16x32xf32>
    %52 = arith.mulf %48, %50 : vector<16x32xf32>
    %53 = arith.addf %51, %52 : vector<16x32xf32>
    %cst_40 = arith.constant dense<0.000000e+00> : vector<16xf32>
    %54 = vector.multi_reduction <add>, %53, %cst_40 [1] : vector<16x32xf32> to vector<16xf32>
    %55 = vector.shape_cast %54 : vector<16xf32> to vector<16x1xf32>
    %56 = arith.mulf %47, %50 : vector<16x32xf32>
    %57 = arith.mulf %48, %49 : vector<16x32xf32>
    %58 = arith.subf %56, %57 : vector<16x32xf32>
    %cst_41 = arith.constant dense<0.000000e+00> : vector<16xf32>
    %59 = vector.multi_reduction <add>, %58, %cst_41 [1] : vector<16x32xf32> to vector<16xf32>
    %60 = vector.shape_cast %59 : vector<16xf32> to vector<16x1xf32>
    %cst_42 = arith.constant dense<0.000000e+00> : vector<16x1xf32>
    %61 = tpu.matmul %2, %55, %cst_42 {dimension_numbers = #tpu.dot_dimension_numbers<[1], [0], [0], [1], [0, 0, 1, 1], [], []>} : vector<16x16xf32>, vector<16x1xf32>, vector<16x1xf32> -> vector<16x1xf32>
    %cst_43 = arith.constant dense<0.000000e+00> : vector<16x1xf32>
    %62 = tpu.matmul %3, %60, %cst_43 {dimension_numbers = #tpu.dot_dimension_numbers<[1], [0], [0], [1], [0, 0, 1, 1], [], []>} : vector<16x16xf32>, vector<16x1xf32>, vector<16x1xf32> -> vector<16x1xf32>
    %63 = arith.subf %61, %62 : vector<16x1xf32>
    %cst_44 = arith.constant 0.001953125 : f32
    %64 = vector.broadcast %cst_44 : f32 to vector<16x1xf32>
    %65 = arith.mulf %63, %64 : vector<16x1xf32>
    %66 = arith.addf %43, %65 : vector<16x1xf32>
    %cst_45 = arith.constant 5.000000e-01 : f32
    %67 = vector.broadcast %cst_45 : f32 to vector<16x1xf32>
    %68 = arith.mulf %66, %67 : vector<16x1xf32>
    %69 = tpu.iota {dimensions = array<i32: 0>} : vector<16x1xi32>
    %70 = arith.sitofp %69 : vector<16x1xi32> to vector<16x1xf32>
    %cst_46 = arith.constant dense<0xFF800000> : vector<1xf32>
    %71 = vector.multi_reduction <maximumf>, %68, %cst_46 [0] : vector<16x1xf32> to vector<1xf32>
    %72 = vector.shape_cast %71 : vector<1xf32> to vector<1x1xf32>
    %73 = vector.broadcast %72 : vector<1x1xf32> to vector<16x1xf32>
    %74 = arith.cmpf oge, %68, %73 : vector<16x1xf32>
    %cst_47 = arith.constant 1.600000e+01 : f32
    %75 = vector.broadcast %cst_47 : f32 to vector<16x1xf32>
    %76 = arith.select %74, %70, %75 : vector<16x1xi1>, vector<16x1xf32>
    %cst_48 = arith.constant dense<0x7F800000> : vector<1xf32>
    %77 = vector.multi_reduction <minimumf>, %76, %cst_48 [0] : vector<16x1xf32> to vector<1xf32>
    %78 = vector.shape_cast %77 : vector<1xf32> to vector<1x1xf32>
    %79 = vector.broadcast %78 : vector<1x1xf32> to vector<16x1xf32>
    %80 = arith.cmpf oeq, %70, %79 : vector<16x1xf32>
    %cst_49 = arith.constant -1.000000e+30 : f32
    %81 = vector.broadcast %cst_49 : f32 to vector<16x1xf32>
    %82 = arith.select %80, %81, %68 : vector<16x1xi1>, vector<16x1xf32>
    %cst_50 = arith.constant dense<0xFF800000> : vector<1xf32>
    %83 = vector.multi_reduction <maximumf>, %82, %cst_50 [0] : vector<16x1xf32> to vector<1xf32>
    %84 = vector.shape_cast %83 : vector<1xf32> to vector<1x1xf32>
    %85 = vector.broadcast %84 : vector<1x1xf32> to vector<16x1xf32>
    %86 = arith.cmpf oge, %82, %85 : vector<16x1xf32>
    %cst_51 = arith.constant 1.600000e+01 : f32
    %87 = vector.broadcast %cst_51 : f32 to vector<16x1xf32>
    %88 = arith.select %86, %70, %87 : vector<16x1xi1>, vector<16x1xf32>
    %cst_52 = arith.constant dense<0x7F800000> : vector<1xf32>
    %89 = vector.multi_reduction <minimumf>, %88, %cst_52 [0] : vector<16x1xf32> to vector<1xf32>
    %90 = vector.shape_cast %89 : vector<1xf32> to vector<1x1xf32>
    %91 = tpu.iota {dimensions = array<i32: 0>} : vector<16x16xi32>
    %92 = arith.sitofp %91 : vector<16x16xi32> to vector<16x16xf32>
    %93 = tpu.iota {dimensions = array<i32: 1>} : vector<16x16xi32>
    %94 = arith.sitofp %93 : vector<16x16xi32> to vector<16x16xf32>
    %95 = arith.subf %94, %92 : vector<16x16xf32>
    %cst_53 = arith.constant 0.000000e+00 : f32
    %96 = vector.broadcast %cst_53 : f32 to vector<16x16xf32>
    %97 = arith.cmpf olt, %95, %96 : vector<16x16xf32>
    %cst_54 = arith.constant 1.600000e+01 : f32
    %98 = vector.broadcast %cst_54 : f32 to vector<16x16xf32>
    %99 = arith.addf %95, %98 : vector<16x16xf32>
    %100 = arith.select %97, %99, %95 : vector<16x16xi1>, vector<16x16xf32>
    %101 = vector.broadcast %78 : vector<1x1xf32> to vector<16x1xf32>
    %102 = arith.cmpf oeq, %70, %101 : vector<16x1xf32>
    %cst_55 = arith.constant 0.000000e+00 : f32
    %103 = vector.broadcast %cst_55 : f32 to vector<16x1xf32>
    %104 = arith.select %102, %43, %103 : vector<16x1xi1>, vector<16x1xf32>
    %cst_56 = arith.constant dense<0.000000e+00> : vector<1xf32>
    %105 = vector.multi_reduction <add>, %104, %cst_56 [0] : vector<16x1xf32> to vector<1xf32>
    %106 = vector.shape_cast %105 : vector<1xf32> to vector<1x1xf32>
    %107 = vector.broadcast %90 : vector<1x1xf32> to vector<16x1xf32>
    %108 = arith.cmpf oeq, %70, %107 : vector<16x1xf32>
    %cst_57 = arith.constant 0.000000e+00 : f32
    %109 = vector.broadcast %cst_57 : f32 to vector<16x1xf32>
    %110 = arith.select %108, %43, %109 : vector<16x1xi1>, vector<16x1xf32>
    %cst_58 = arith.constant dense<0.000000e+00> : vector<1xf32>
    %111 = vector.multi_reduction <add>, %110, %cst_58 [0] : vector<16x1xf32> to vector<1xf32>
    %112 = vector.shape_cast %111 : vector<1xf32> to vector<1x1xf32>
    %113 = arith.maximumf %106, %112 : vector<1x1xf32>
    %114 = arith.subf %106, %113 : vector<1x1xf32>
    %115 = math.exp %114 : vector<1x1xf32>
    %116 = arith.subf %112, %113 : vector<1x1xf32>
    %117 = math.exp %116 : vector<1x1xf32>
    %118 = arith.addf %115, %117 : vector<1x1xf32>
    %cst_59 = arith.constant 0.000000e+00 : f32
    %119 = vector.broadcast %cst_59 : f32 to vector<16x16xf32>
    %120 = vector.broadcast %78 : vector<1x1xf32> to vector<16x16xf32>
    %121 = arith.cmpf oeq, %100, %120 : vector<16x16xf32>
    %122 = arith.divf %115, %118 : vector<1x1xf32>
    %cst_60 = arith.constant 0.000000e+00 : f32
    %123 = vector.shape_cast %122 : vector<1x1xf32> to vector<1x1xf32>
    %124 = vector.broadcast %123 : vector<1x1xf32> to vector<16x16xf32>
    %125 = vector.broadcast %cst_60 : f32 to vector<16x16xf32>
    %126 = arith.select %121, %124, %125 : vector<16x16xi1>, vector<16x16xf32>
    %127 = arith.addf %119, %126 : vector<16x16xf32>
    %128 = vector.broadcast %90 : vector<1x1xf32> to vector<16x16xf32>
    %129 = arith.cmpf oeq, %100, %128 : vector<16x16xf32>
    %130 = arith.divf %117, %118 : vector<1x1xf32>
    %cst_61 = arith.constant 0.000000e+00 : f32
    %131 = vector.shape_cast %130 : vector<1x1xf32> to vector<1x1xf32>
    %132 = vector.broadcast %131 : vector<1x1xf32> to vector<16x16xf32>
    %133 = vector.broadcast %cst_61 : f32 to vector<16x16xf32>
    %134 = arith.select %129, %132, %133 : vector<16x16xi1>, vector<16x16xf32>
    %135 = arith.addf %127, %134 : vector<16x16xf32>
    %cst_62 = arith.constant dense<0.000000e+00> : vector<16x32xf32>
    %136 = tpu.matmul %135, %24, %cst_62 {dimension_numbers = #tpu.dot_dimension_numbers<[1], [0], [0], [1], [0, 0, 1, 1], [], []>} : vector<16x16xf32>, vector<16x32xf32>, vector<16x32xf32> -> vector<16x32xf32>
    %137 = vector.broadcast %78 : vector<1x1xf32> to vector<16x1xf32>
    %138 = arith.cmpf oeq, %70, %137 : vector<16x1xf32>
    %cst_63 = arith.constant 0.000000e+00 : f32
    %139 = vector.broadcast %cst_63 : f32 to vector<16x1xf32>
    %140 = arith.select %138, %65, %139 : vector<16x1xi1>, vector<16x1xf32>
    %cst_64 = arith.constant dense<0.000000e+00> : vector<1xf32>
    %141 = vector.multi_reduction <add>, %140, %cst_64 [0] : vector<16x1xf32> to vector<1xf32>
    %142 = vector.shape_cast %141 : vector<1xf32> to vector<1x1xf32>
    %143 = vector.broadcast %90 : vector<1x1xf32> to vector<16x1xf32>
    %144 = arith.cmpf oeq, %70, %143 : vector<16x1xf32>
    %cst_65 = arith.constant 0.000000e+00 : f32
    %145 = vector.broadcast %cst_65 : f32 to vector<16x1xf32>
    %146 = arith.select %144, %65, %145 : vector<16x1xi1>, vector<16x1xf32>
    %cst_66 = arith.constant dense<0.000000e+00> : vector<1xf32>
    %147 = vector.multi_reduction <add>, %146, %cst_66 [0] : vector<16x1xf32> to vector<1xf32>
    %148 = vector.shape_cast %147 : vector<1xf32> to vector<1x1xf32>
    %149 = arith.maximumf %142, %148 : vector<1x1xf32>
    %150 = arith.subf %142, %149 : vector<1x1xf32>
    %151 = math.exp %150 : vector<1x1xf32>
    %152 = arith.subf %148, %149 : vector<1x1xf32>
    %153 = math.exp %152 : vector<1x1xf32>
    %154 = arith.addf %151, %153 : vector<1x1xf32>
    %cst_67 = arith.constant 0.000000e+00 : f32
    %155 = vector.broadcast %cst_67 : f32 to vector<16x16xf32>
    %156 = vector.broadcast %78 : vector<1x1xf32> to vector<16x16xf32>
    %157 = arith.cmpf oeq, %100, %156 : vector<16x16xf32>
    %158 = arith.divf %151, %154 : vector<1x1xf32>
    %cst_68 = arith.constant 0.000000e+00 : f32
    %159 = vector.shape_cast %158 : vector<1x1xf32> to vector<1x1xf32>
    %160 = vector.broadcast %159 : vector<1x1xf32> to vector<16x16xf32>
    %161 = vector.broadcast %cst_68 : f32 to vector<16x16xf32>
    %162 = arith.select %157, %160, %161 : vector<16x16xi1>, vector<16x16xf32>
    %163 = arith.addf %155, %162 : vector<16x16xf32>
    %164 = vector.broadcast %90 : vector<1x1xf32> to vector<16x16xf32>
    %165 = arith.cmpf oeq, %100, %164 : vector<16x16xf32>
    %166 = arith.divf %153, %154 : vector<1x1xf32>
    %cst_69 = arith.constant 0.000000e+00 : f32
    %167 = vector.shape_cast %166 : vector<1x1xf32> to vector<1x1xf32>
    %168 = vector.broadcast %167 : vector<1x1xf32> to vector<16x16xf32>
    %169 = vector.broadcast %cst_69 : f32 to vector<16x16xf32>
    %170 = arith.select %165, %168, %169 : vector<16x16xi1>, vector<16x16xf32>
    %171 = arith.addf %163, %170 : vector<16x16xf32>
    %cst_70 = arith.constant dense<0.000000e+00> : vector<16x32xf32>
    %172 = tpu.matmul %171, %46, %cst_70 {dimension_numbers = #tpu.dot_dimension_numbers<[1], [0], [0], [1], [0, 0, 1, 1], [], []>} : vector<16x16xf32>, vector<16x32xf32>, vector<16x32xf32> -> vector<16x32xf32>
    %173 = tpu.concatenate %136, %172 in 0 : vector<16x32xf32>, vector<16x32xf32> -> vector<32x32xf32>
    %cst_71 = arith.constant dense<0.000000e+00> : vector<32x32xf32>
    %174 = tpu.matmul %173, %11, %cst_71 {dimension_numbers = #tpu.dot_dimension_numbers<[1], [0], [0], [1], [0, 0, 1, 1], [], []>} : vector<32x32xf32>, vector<32x32xf32>, vector<32x32xf32> -> vector<32x32xf32>
    %175 = arith.addf %0, %174 : vector<32x32xf32>
    %176 = vector.broadcast %12 : vector<1x32xf32> to vector<32x32xf32>
    %177 = arith.addf %175, %176 : vector<32x32xf32>
    %178 = vector.extract_strided_slice %177 {offsets = [0, 0], sizes = [16, 32], strides = [1, 1]} : vector<32x32xf32> to vector<16x32xf32>
    %cst_72 = arith.constant dense<0.000000e+00> : vector<16x32xf32>
    %179 = tpu.matmul %4, %178, %cst_72 {dimension_numbers = #tpu.dot_dimension_numbers<[1], [0], [0], [1], [0, 0, 1, 1], [], []>} : vector<16x16xf32>, vector<16x32xf32>, vector<16x32xf32> -> vector<16x32xf32>
    %180 = arith.subf %178, %179 : vector<16x32xf32>
    %181 = vector.extract_strided_slice %177 {offsets = [16, 0], sizes = [16, 32], strides = [1, 1]} : vector<32x32xf32> to vector<16x32xf32>
    %cst_73 = arith.constant dense<0.000000e+00> : vector<16x32xf32>
    %182 = tpu.matmul %4, %181, %cst_73 {dimension_numbers = #tpu.dot_dimension_numbers<[1], [0], [0], [1], [0, 0, 1, 1], [], []>} : vector<16x16xf32>, vector<16x32xf32>, vector<16x32xf32> -> vector<16x32xf32>
    %183 = arith.subf %181, %182 : vector<16x32xf32>
    %184 = tpu.concatenate %180, %183 in 0 : vector<16x32xf32>, vector<16x32xf32> -> vector<32x32xf32>
    %185 = tpu.concatenate %179, %182 in 0 : vector<16x32xf32>, vector<16x32xf32> -> vector<32x32xf32>
    %c0_74 = arith.constant 0 : index
    %c0_75 = arith.constant 0 : index
    %186 = vector.load %arg12[%c0_74, %c0_75] : memref<32x32xf32, #tpu.memory_space<vmem>>, vector<32x32xf32>
    %c0_76 = arith.constant 0 : index
    %c0_77 = arith.constant 0 : index
    %187 = vector.load %arg13[%c0_76, %c0_77] : memref<1x32xf32, #tpu.memory_space<vmem>>, vector<1x32xf32>
    %c0_78 = arith.constant 0 : index
    %c0_79 = arith.constant 0 : index
    %188 = vector.load %arg14[%c0_78, %c0_79] : memref<32x32xf32, #tpu.memory_space<vmem>>, vector<32x32xf32>
    %c0_80 = arith.constant 0 : index
    %c0_81 = arith.constant 0 : index
    %189 = vector.load %arg15[%c0_80, %c0_81] : memref<1x32xf32, #tpu.memory_space<vmem>>, vector<1x32xf32>
    %c0_82 = arith.constant 0 : index
    %c0_83 = arith.constant 0 : index
    %190 = vector.load %arg16[%c0_82, %c0_83] : memref<32x32xf32, #tpu.memory_space<vmem>>, vector<32x32xf32>
    %c0_84 = arith.constant 0 : index
    %c0_85 = arith.constant 0 : index
    %191 = vector.load %arg17[%c0_84, %c0_85] : memref<1x32xf32, #tpu.memory_space<vmem>>, vector<1x32xf32>
    %c0_86 = arith.constant 0 : index
    %c0_87 = arith.constant 0 : index
    %192 = vector.load %arg18[%c0_86, %c0_87] : memref<32x32xf32, #tpu.memory_space<vmem>>, vector<32x32xf32>
    %c0_88 = arith.constant 0 : index
    %c0_89 = arith.constant 0 : index
    %193 = vector.load %arg19[%c0_88, %c0_89] : memref<1x32xf32, #tpu.memory_space<vmem>>, vector<1x32xf32>
    %cst_90 = arith.constant dense<0.000000e+00> : vector<32x32xf32>
    %194 = tpu.matmul %184, %186, %cst_90 {dimension_numbers = #tpu.dot_dimension_numbers<[1], [0], [0], [1], [0, 0, 1, 1], [], []>} : vector<32x32xf32>, vector<32x32xf32>, vector<32x32xf32> -> vector<32x32xf32>
    %195 = vector.broadcast %187 : vector<1x32xf32> to vector<32x32xf32>
    %196 = arith.addf %194, %195 : vector<32x32xf32>
    %cst_91 = arith.constant dense<0.000000e+00> : vector<32x32xf32>
    %197 = tpu.matmul %1, %188, %cst_91 {dimension_numbers = #tpu.dot_dimension_numbers<[1], [0], [0], [1], [0, 0, 1, 1], [], []>} : vector<32x32xf32>, vector<32x32xf32>, vector<32x32xf32> -> vector<32x32xf32>
    %198 = vector.broadcast %189 : vector<1x32xf32> to vector<32x32xf32>
    %199 = arith.addf %197, %198 : vector<32x32xf32>
    %cst_92 = arith.constant dense<0.000000e+00> : vector<32x32xf32>
    %200 = tpu.matmul %1, %190, %cst_92 {dimension_numbers = #tpu.dot_dimension_numbers<[1], [0], [0], [1], [0, 0, 1, 1], [], []>} : vector<32x32xf32>, vector<32x32xf32>, vector<32x32xf32> -> vector<32x32xf32>
    %201 = vector.broadcast %191 : vector<1x32xf32> to vector<32x32xf32>
    %202 = arith.addf %200, %201 : vector<32x32xf32>
    %203 = vector.extract_strided_slice %196 {offsets = [0, 0], sizes = [16, 32], strides = [1, 1]} : vector<32x32xf32> to vector<16x32xf32>
    %204 = vector.extract_strided_slice %199 {offsets = [0, 0], sizes = [16, 32], strides = [1, 1]} : vector<32x32xf32> to vector<16x32xf32>
    %205 = vector.extract_strided_slice %202 {offsets = [0, 0], sizes = [16, 32], strides = [1, 1]} : vector<32x32xf32> to vector<16x32xf32>
    %cst_93 = arith.constant dense<0.000000e+00> : vector<16x32xf32>
    %206 = tpu.matmul %2, %203, %cst_93 {dimension_numbers = #tpu.dot_dimension_numbers<[1], [0], [0], [1], [0, 0, 1, 1], [], []>} : vector<16x16xf32>, vector<16x32xf32>, vector<16x32xf32> -> vector<16x32xf32>
    %cst_94 = arith.constant dense<0.000000e+00> : vector<16x32xf32>
    %207 = tpu.matmul %3, %203, %cst_94 {dimension_numbers = #tpu.dot_dimension_numbers<[1], [0], [0], [1], [0, 0, 1, 1], [], []>} : vector<16x16xf32>, vector<16x32xf32>, vector<16x32xf32> -> vector<16x32xf32>
    %cst_95 = arith.constant dense<0.000000e+00> : vector<16x32xf32>
    %208 = tpu.matmul %2, %204, %cst_95 {dimension_numbers = #tpu.dot_dimension_numbers<[1], [0], [0], [1], [0, 0, 1, 1], [], []>} : vector<16x16xf32>, vector<16x32xf32>, vector<16x32xf32> -> vector<16x32xf32>
    %cst_96 = arith.constant dense<0.000000e+00> : vector<16x32xf32>
    %209 = tpu.matmul %3, %204, %cst_96 {dimension_numbers = #tpu.dot_dimension_numbers<[1], [0], [0], [1], [0, 0, 1, 1], [], []>} : vector<16x16xf32>, vector<16x32xf32>, vector<16x32xf32> -> vector<16x32xf32>
    %210 = arith.mulf %206, %208 : vector<16x32xf32>
    %211 = arith.mulf %207, %209 : vector<16x32xf32>
    %212 = arith.addf %210, %211 : vector<16x32xf32>
    %cst_97 = arith.constant dense<0.000000e+00> : vector<16xf32>
    %213 = vector.multi_reduction <add>, %212, %cst_97 [1] : vector<16x32xf32> to vector<16xf32>
    %214 = vector.shape_cast %213 : vector<16xf32> to vector<16x1xf32>
    %215 = arith.mulf %206, %209 : vector<16x32xf32>
    %216 = arith.mulf %207, %208 : vector<16x32xf32>
    %217 = arith.subf %215, %216 : vector<16x32xf32>
    %cst_98 = arith.constant dense<0.000000e+00> : vector<16xf32>
    %218 = vector.multi_reduction <add>, %217, %cst_98 [1] : vector<16x32xf32> to vector<16xf32>
    %219 = vector.shape_cast %218 : vector<16xf32> to vector<16x1xf32>
    %cst_99 = arith.constant dense<0.000000e+00> : vector<16x1xf32>
    %220 = tpu.matmul %2, %214, %cst_99 {dimension_numbers = #tpu.dot_dimension_numbers<[1], [0], [0], [1], [0, 0, 1, 1], [], []>} : vector<16x16xf32>, vector<16x1xf32>, vector<16x1xf32> -> vector<16x1xf32>
    %cst_100 = arith.constant dense<0.000000e+00> : vector<16x1xf32>
    %221 = tpu.matmul %3, %219, %cst_100 {dimension_numbers = #tpu.dot_dimension_numbers<[1], [0], [0], [1], [0, 0, 1, 1], [], []>} : vector<16x16xf32>, vector<16x1xf32>, vector<16x1xf32> -> vector<16x1xf32>
    %222 = arith.subf %220, %221 : vector<16x1xf32>
    %cst_101 = arith.constant 0.001953125 : f32
    %223 = vector.broadcast %cst_101 : f32 to vector<16x1xf32>
    %224 = arith.mulf %222, %223 : vector<16x1xf32>
    %225 = vector.extract_strided_slice %196 {offsets = [16, 0], sizes = [16, 32], strides = [1, 1]} : vector<32x32xf32> to vector<16x32xf32>
    %226 = vector.extract_strided_slice %199 {offsets = [16, 0], sizes = [16, 32], strides = [1, 1]} : vector<32x32xf32> to vector<16x32xf32>
    %227 = vector.extract_strided_slice %202 {offsets = [16, 0], sizes = [16, 32], strides = [1, 1]} : vector<32x32xf32> to vector<16x32xf32>
    %cst_102 = arith.constant dense<0.000000e+00> : vector<16x32xf32>
    %228 = tpu.matmul %2, %225, %cst_102 {dimension_numbers = #tpu.dot_dimension_numbers<[1], [0], [0], [1], [0, 0, 1, 1], [], []>} : vector<16x16xf32>, vector<16x32xf32>, vector<16x32xf32> -> vector<16x32xf32>
    %cst_103 = arith.constant dense<0.000000e+00> : vector<16x32xf32>
    %229 = tpu.matmul %3, %225, %cst_103 {dimension_numbers = #tpu.dot_dimension_numbers<[1], [0], [0], [1], [0, 0, 1, 1], [], []>} : vector<16x16xf32>, vector<16x32xf32>, vector<16x32xf32> -> vector<16x32xf32>
    %cst_104 = arith.constant dense<0.000000e+00> : vector<16x32xf32>
    %230 = tpu.matmul %2, %226, %cst_104 {dimension_numbers = #tpu.dot_dimension_numbers<[1], [0], [0], [1], [0, 0, 1, 1], [], []>} : vector<16x16xf32>, vector<16x32xf32>, vector<16x32xf32> -> vector<16x32xf32>
    %cst_105 = arith.constant dense<0.000000e+00> : vector<16x32xf32>
    %231 = tpu.matmul %3, %226, %cst_105 {dimension_numbers = #tpu.dot_dimension_numbers<[1], [0], [0], [1], [0, 0, 1, 1], [], []>} : vector<16x16xf32>, vector<16x32xf32>, vector<16x32xf32> -> vector<16x32xf32>
    %232 = arith.mulf %228, %230 : vector<16x32xf32>
    %233 = arith.mulf %229, %231 : vector<16x32xf32>
    %234 = arith.addf %232, %233 : vector<16x32xf32>
    %cst_106 = arith.constant dense<0.000000e+00> : vector<16xf32>
    %235 = vector.multi_reduction <add>, %234, %cst_106 [1] : vector<16x32xf32> to vector<16xf32>
    %236 = vector.shape_cast %235 : vector<16xf32> to vector<16x1xf32>
    %237 = arith.mulf %228, %231 : vector<16x32xf32>
    %238 = arith.mulf %229, %230 : vector<16x32xf32>
    %239 = arith.subf %237, %238 : vector<16x32xf32>
    %cst_107 = arith.constant dense<0.000000e+00> : vector<16xf32>
    %240 = vector.multi_reduction <add>, %239, %cst_107 [1] : vector<16x32xf32> to vector<16xf32>
    %241 = vector.shape_cast %240 : vector<16xf32> to vector<16x1xf32>
    %cst_108 = arith.constant dense<0.000000e+00> : vector<16x1xf32>
    %242 = tpu.matmul %2, %236, %cst_108 {dimension_numbers = #tpu.dot_dimension_numbers<[1], [0], [0], [1], [0, 0, 1, 1], [], []>} : vector<16x16xf32>, vector<16x1xf32>, vector<16x1xf32> -> vector<16x1xf32>
    %cst_109 = arith.constant dense<0.000000e+00> : vector<16x1xf32>
    %243 = tpu.matmul %3, %241, %cst_109 {dimension_numbers = #tpu.dot_dimension_numbers<[1], [0], [0], [1], [0, 0, 1, 1], [], []>} : vector<16x16xf32>, vector<16x1xf32>, vector<16x1xf32> -> vector<16x1xf32>
    %244 = arith.subf %242, %243 : vector<16x1xf32>
    %cst_110 = arith.constant 0.001953125 : f32
    %245 = vector.broadcast %cst_110 : f32 to vector<16x1xf32>
    %246 = arith.mulf %244, %245 : vector<16x1xf32>
    %247 = arith.addf %224, %246 : vector<16x1xf32>
    %cst_111 = arith.constant 5.000000e-01 : f32
    %248 = vector.broadcast %cst_111 : f32 to vector<16x1xf32>
    %249 = arith.mulf %247, %248 : vector<16x1xf32>
    %250 = tpu.iota {dimensions = array<i32: 0>} : vector<16x1xi32>
    %251 = arith.sitofp %250 : vector<16x1xi32> to vector<16x1xf32>
    %cst_112 = arith.constant dense<0xFF800000> : vector<1xf32>
    %252 = vector.multi_reduction <maximumf>, %249, %cst_112 [0] : vector<16x1xf32> to vector<1xf32>
    %253 = vector.shape_cast %252 : vector<1xf32> to vector<1x1xf32>
    %254 = vector.broadcast %253 : vector<1x1xf32> to vector<16x1xf32>
    %255 = arith.cmpf oge, %249, %254 : vector<16x1xf32>
    %cst_113 = arith.constant 1.600000e+01 : f32
    %256 = vector.broadcast %cst_113 : f32 to vector<16x1xf32>
    %257 = arith.select %255, %251, %256 : vector<16x1xi1>, vector<16x1xf32>
    %cst_114 = arith.constant dense<0x7F800000> : vector<1xf32>
    %258 = vector.multi_reduction <minimumf>, %257, %cst_114 [0] : vector<16x1xf32> to vector<1xf32>
    %259 = vector.shape_cast %258 : vector<1xf32> to vector<1x1xf32>
    %260 = vector.broadcast %259 : vector<1x1xf32> to vector<16x1xf32>
    %261 = arith.cmpf oeq, %251, %260 : vector<16x1xf32>
    %cst_115 = arith.constant -1.000000e+30 : f32
    %262 = vector.broadcast %cst_115 : f32 to vector<16x1xf32>
    %263 = arith.select %261, %262, %249 : vector<16x1xi1>, vector<16x1xf32>
    %cst_116 = arith.constant dense<0xFF800000> : vector<1xf32>
    %264 = vector.multi_reduction <maximumf>, %263, %cst_116 [0] : vector<16x1xf32> to vector<1xf32>
    %265 = vector.shape_cast %264 : vector<1xf32> to vector<1x1xf32>
    %266 = vector.broadcast %265 : vector<1x1xf32> to vector<16x1xf32>
    %267 = arith.cmpf oge, %263, %266 : vector<16x1xf32>
    %cst_117 = arith.constant 1.600000e+01 : f32
    %268 = vector.broadcast %cst_117 : f32 to vector<16x1xf32>
    %269 = arith.select %267, %251, %268 : vector<16x1xi1>, vector<16x1xf32>
    %cst_118 = arith.constant dense<0x7F800000> : vector<1xf32>
    %270 = vector.multi_reduction <minimumf>, %269, %cst_118 [0] : vector<16x1xf32> to vector<1xf32>
    %271 = vector.shape_cast %270 : vector<1xf32> to vector<1x1xf32>
    %272 = tpu.iota {dimensions = array<i32: 0>} : vector<16x16xi32>
    %273 = arith.sitofp %272 : vector<16x16xi32> to vector<16x16xf32>
    %274 = tpu.iota {dimensions = array<i32: 1>} : vector<16x16xi32>
    %275 = arith.sitofp %274 : vector<16x16xi32> to vector<16x16xf32>
    %276 = arith.subf %275, %273 : vector<16x16xf32>
    %cst_119 = arith.constant 0.000000e+00 : f32
    %277 = vector.broadcast %cst_119 : f32 to vector<16x16xf32>
    %278 = arith.cmpf olt, %276, %277 : vector<16x16xf32>
    %cst_120 = arith.constant 1.600000e+01 : f32
    %279 = vector.broadcast %cst_120 : f32 to vector<16x16xf32>
    %280 = arith.addf %276, %279 : vector<16x16xf32>
    %281 = arith.select %278, %280, %276 : vector<16x16xi1>, vector<16x16xf32>
    %282 = vector.broadcast %259 : vector<1x1xf32> to vector<16x1xf32>
    %283 = arith.cmpf oeq, %251, %282 : vector<16x1xf32>
    %cst_121 = arith.constant 0.000000e+00 : f32
    %284 = vector.broadcast %cst_121 : f32 to vector<16x1xf32>
    %285 = arith.select %283, %224, %284 : vector<16x1xi1>, vector<16x1xf32>
    %cst_122 = arith.constant dense<0.000000e+00> : vector<1xf32>
    %286 = vector.multi_reduction <add>, %285, %cst_122 [0] : vector<16x1xf32> to vector<1xf32>
    %287 = vector.shape_cast %286 : vector<1xf32> to vector<1x1xf32>
    %288 = vector.broadcast %271 : vector<1x1xf32> to vector<16x1xf32>
    %289 = arith.cmpf oeq, %251, %288 : vector<16x1xf32>
    %cst_123 = arith.constant 0.000000e+00 : f32
    %290 = vector.broadcast %cst_123 : f32 to vector<16x1xf32>
    %291 = arith.select %289, %224, %290 : vector<16x1xi1>, vector<16x1xf32>
    %cst_124 = arith.constant dense<0.000000e+00> : vector<1xf32>
    %292 = vector.multi_reduction <add>, %291, %cst_124 [0] : vector<16x1xf32> to vector<1xf32>
    %293 = vector.shape_cast %292 : vector<1xf32> to vector<1x1xf32>
    %294 = arith.maximumf %287, %293 : vector<1x1xf32>
    %295 = arith.subf %287, %294 : vector<1x1xf32>
    %296 = math.exp %295 : vector<1x1xf32>
    %297 = arith.subf %293, %294 : vector<1x1xf32>
    %298 = math.exp %297 : vector<1x1xf32>
    %299 = arith.addf %296, %298 : vector<1x1xf32>
    %cst_125 = arith.constant 0.000000e+00 : f32
    %300 = vector.broadcast %cst_125 : f32 to vector<16x16xf32>
    %301 = vector.broadcast %259 : vector<1x1xf32> to vector<16x16xf32>
    %302 = arith.cmpf oeq, %281, %301 : vector<16x16xf32>
    %303 = arith.divf %296, %299 : vector<1x1xf32>
    %cst_126 = arith.constant 0.000000e+00 : f32
    %304 = vector.shape_cast %303 : vector<1x1xf32> to vector<1x1xf32>
    %305 = vector.broadcast %304 : vector<1x1xf32> to vector<16x16xf32>
    %306 = vector.broadcast %cst_126 : f32 to vector<16x16xf32>
    %307 = arith.select %302, %305, %306 : vector<16x16xi1>, vector<16x16xf32>
    %308 = arith.addf %300, %307 : vector<16x16xf32>
    %309 = vector.broadcast %271 : vector<1x1xf32> to vector<16x16xf32>
    %310 = arith.cmpf oeq, %281, %309 : vector<16x16xf32>
    %311 = arith.divf %298, %299 : vector<1x1xf32>
    %cst_127 = arith.constant 0.000000e+00 : f32
    %312 = vector.shape_cast %311 : vector<1x1xf32> to vector<1x1xf32>
    %313 = vector.broadcast %312 : vector<1x1xf32> to vector<16x16xf32>
    %314 = vector.broadcast %cst_127 : f32 to vector<16x16xf32>
    %315 = arith.select %310, %313, %314 : vector<16x16xi1>, vector<16x16xf32>
    %316 = arith.addf %308, %315 : vector<16x16xf32>
    %cst_128 = arith.constant dense<0.000000e+00> : vector<16x32xf32>
    %317 = tpu.matmul %316, %205, %cst_128 {dimension_numbers = #tpu.dot_dimension_numbers<[1], [0], [0], [1], [0, 0, 1, 1], [], []>} : vector<16x16xf32>, vector<16x32xf32>, vector<16x32xf32> -> vector<16x32xf32>
    %318 = vector.broadcast %259 : vector<1x1xf32> to vector<16x1xf32>
    %319 = arith.cmpf oeq, %251, %318 : vector<16x1xf32>
    %cst_129 = arith.constant 0.000000e+00 : f32
    %320 = vector.broadcast %cst_129 : f32 to vector<16x1xf32>
    %321 = arith.select %319, %246, %320 : vector<16x1xi1>, vector<16x1xf32>
    %cst_130 = arith.constant dense<0.000000e+00> : vector<1xf32>
    %322 = vector.multi_reduction <add>, %321, %cst_130 [0] : vector<16x1xf32> to vector<1xf32>
    %323 = vector.shape_cast %322 : vector<1xf32> to vector<1x1xf32>
    %324 = vector.broadcast %271 : vector<1x1xf32> to vector<16x1xf32>
    %325 = arith.cmpf oeq, %251, %324 : vector<16x1xf32>
    %cst_131 = arith.constant 0.000000e+00 : f32
    %326 = vector.broadcast %cst_131 : f32 to vector<16x1xf32>
    %327 = arith.select %325, %246, %326 : vector<16x1xi1>, vector<16x1xf32>
    %cst_132 = arith.constant dense<0.000000e+00> : vector<1xf32>
    %328 = vector.multi_reduction <add>, %327, %cst_132 [0] : vector<16x1xf32> to vector<1xf32>
    %329 = vector.shape_cast %328 : vector<1xf32> to vector<1x1xf32>
    %330 = arith.maximumf %323, %329 : vector<1x1xf32>
    %331 = arith.subf %323, %330 : vector<1x1xf32>
    %332 = math.exp %331 : vector<1x1xf32>
    %333 = arith.subf %329, %330 : vector<1x1xf32>
    %334 = math.exp %333 : vector<1x1xf32>
    %335 = arith.addf %332, %334 : vector<1x1xf32>
    %cst_133 = arith.constant 0.000000e+00 : f32
    %336 = vector.broadcast %cst_133 : f32 to vector<16x16xf32>
    %337 = vector.broadcast %259 : vector<1x1xf32> to vector<16x16xf32>
    %338 = arith.cmpf oeq, %281, %337 : vector<16x16xf32>
    %339 = arith.divf %332, %335 : vector<1x1xf32>
    %cst_134 = arith.constant 0.000000e+00 : f32
    %340 = vector.shape_cast %339 : vector<1x1xf32> to vector<1x1xf32>
    %341 = vector.broadcast %340 : vector<1x1xf32> to vector<16x16xf32>
    %342 = vector.broadcast %cst_134 : f32 to vector<16x16xf32>
    %343 = arith.select %338, %341, %342 : vector<16x16xi1>, vector<16x16xf32>
    %344 = arith.addf %336, %343 : vector<16x16xf32>
    %345 = vector.broadcast %271 : vector<1x1xf32> to vector<16x16xf32>
    %346 = arith.cmpf oeq, %281, %345 : vector<16x16xf32>
    %347 = arith.divf %334, %335 : vector<1x1xf32>
    %cst_135 = arith.constant 0.000000e+00 : f32
    %348 = vector.shape_cast %347 : vector<1x1xf32> to vector<1x1xf32>
    %349 = vector.broadcast %348 : vector<1x1xf32> to vector<16x16xf32>
    %350 = vector.broadcast %cst_135 : f32 to vector<16x16xf32>
    %351 = arith.select %346, %349, %350 : vector<16x16xi1>, vector<16x16xf32>
    %352 = arith.addf %344, %351 : vector<16x16xf32>
    %cst_136 = arith.constant dense<0.000000e+00> : vector<16x32xf32>
    %353 = tpu.matmul %352, %227, %cst_136 {dimension_numbers = #tpu.dot_dimension_numbers<[1], [0], [0], [1], [0, 0, 1, 1], [], []>} : vector<16x16xf32>, vector<16x32xf32>, vector<16x32xf32> -> vector<16x32xf32>
    %354 = tpu.concatenate %317, %353 in 0 : vector<16x32xf32>, vector<16x32xf32> -> vector<32x32xf32>
    %cst_137 = arith.constant dense<0.000000e+00> : vector<32x32xf32>
    %355 = tpu.matmul %354, %192, %cst_137 {dimension_numbers = #tpu.dot_dimension_numbers<[1], [0], [0], [1], [0, 0, 1, 1], [], []>} : vector<32x32xf32>, vector<32x32xf32>, vector<32x32xf32> -> vector<32x32xf32>
    %356 = arith.addf %184, %355 : vector<32x32xf32>
    %357 = vector.broadcast %193 : vector<1x32xf32> to vector<32x32xf32>
    %358 = arith.addf %356, %357 : vector<32x32xf32>
    %359 = vector.extract_strided_slice %358 {offsets = [0, 0], sizes = [16, 32], strides = [1, 1]} : vector<32x32xf32> to vector<16x32xf32>
    %cst_138 = arith.constant dense<0.000000e+00> : vector<16x32xf32>
    %360 = tpu.matmul %4, %359, %cst_138 {dimension_numbers = #tpu.dot_dimension_numbers<[1], [0], [0], [1], [0, 0, 1, 1], [], []>} : vector<16x16xf32>, vector<16x32xf32>, vector<16x32xf32> -> vector<16x32xf32>
    %361 = arith.subf %359, %360 : vector<16x32xf32>
    %362 = vector.extract_strided_slice %358 {offsets = [16, 0], sizes = [16, 32], strides = [1, 1]} : vector<32x32xf32> to vector<16x32xf32>
    %cst_139 = arith.constant dense<0.000000e+00> : vector<16x32xf32>
    %363 = tpu.matmul %4, %362, %cst_139 {dimension_numbers = #tpu.dot_dimension_numbers<[1], [0], [0], [1], [0, 0, 1, 1], [], []>} : vector<16x16xf32>, vector<16x32xf32>, vector<16x32xf32> -> vector<16x32xf32>
    %364 = arith.subf %362, %363 : vector<16x32xf32>
    %365 = tpu.concatenate %361, %364 in 0 : vector<16x32xf32>, vector<16x32xf32> -> vector<32x32xf32>
    %366 = tpu.concatenate %360, %363 in 0 : vector<16x32xf32>, vector<16x32xf32> -> vector<32x32xf32>
    %c0_140 = arith.constant 0 : index
    %c0_141 = arith.constant 0 : index
    %367 = vector.load %arg20[%c0_140, %c0_141] : memref<32x32xf32, #tpu.memory_space<vmem>>, vector<32x32xf32>
    %c0_142 = arith.constant 0 : index
    %c0_143 = arith.constant 0 : index
    %368 = vector.load %arg21[%c0_142, %c0_143] : memref<32x32xf32, #tpu.memory_space<vmem>>, vector<32x32xf32>
    %cst_144 = arith.constant dense<0.000000e+00> : vector<32x32xf32>
    %369 = tpu.matmul %365, %367, %cst_144 {dimension_numbers = #tpu.dot_dimension_numbers<[1], [0], [0], [1], [0, 0, 1, 1], [], []>} : vector<32x32xf32>, vector<32x32xf32>, vector<32x32xf32> -> vector<32x32xf32>
    %cst_145 = arith.constant 0.000000e+00 : f32
    %370 = vector.broadcast %cst_145 : f32 to vector<32x32xf32>
    %371 = arith.maximumf %369, %370 : vector<32x32xf32>
    %cst_146 = arith.constant dense<0.000000e+00> : vector<32x32xf32>
    %372 = tpu.matmul %371, %368, %cst_146 {dimension_numbers = #tpu.dot_dimension_numbers<[1], [0], [0], [1], [0, 0, 1, 1], [], []>} : vector<32x32xf32>, vector<32x32xf32>, vector<32x32xf32> -> vector<32x32xf32>
    %373 = arith.addf %365, %372 : vector<32x32xf32>
    %374 = vector.extract_strided_slice %373 {offsets = [0, 0], sizes = [16, 32], strides = [1, 1]} : vector<32x32xf32> to vector<16x32xf32>
    %cst_147 = arith.constant dense<0.000000e+00> : vector<16x32xf32>
    %375 = tpu.matmul %4, %374, %cst_147 {dimension_numbers = #tpu.dot_dimension_numbers<[1], [0], [0], [1], [0, 0, 1, 1], [], []>} : vector<16x16xf32>, vector<16x32xf32>, vector<16x32xf32> -> vector<16x32xf32>
    %376 = arith.subf %374, %375 : vector<16x32xf32>
    %377 = vector.extract_strided_slice %373 {offsets = [16, 0], sizes = [16, 32], strides = [1, 1]} : vector<32x32xf32> to vector<16x32xf32>
    %cst_148 = arith.constant dense<0.000000e+00> : vector<16x32xf32>
    %378 = tpu.matmul %4, %377, %cst_148 {dimension_numbers = #tpu.dot_dimension_numbers<[1], [0], [0], [1], [0, 0, 1, 1], [], []>} : vector<16x16xf32>, vector<16x32xf32>, vector<16x32xf32> -> vector<16x32xf32>
    %379 = arith.subf %377, %378 : vector<16x32xf32>
    %380 = tpu.concatenate %376, %379 in 0 : vector<16x32xf32>, vector<16x32xf32> -> vector<32x32xf32>
    %381 = tpu.concatenate %375, %378 in 0 : vector<16x32xf32>, vector<16x32xf32> -> vector<32x32xf32>
    %382 = arith.addf %185, %366 : vector<32x32xf32>
    %383 = arith.addf %382, %381 : vector<32x32xf32>
    %c0_149 = arith.constant 0 : index
    %c0_150 = arith.constant 0 : index
    %384 = vector.load %arg22[%c0_149, %c0_150] : memref<32x4xf32, #tpu.memory_space<vmem>>, vector<32x4xf32>
    %c0_151 = arith.constant 0 : index
    %c0_152 = arith.constant 0 : index
    %385 = vector.load %arg23[%c0_151, %c0_152] : memref<32x4xf32, #tpu.memory_space<vmem>>, vector<32x4xf32>
    %c0_153 = arith.constant 0 : index
    %c0_154 = arith.constant 0 : index
    %386 = vector.load %arg24[%c0_153, %c0_154] : memref<32x4xf32, #tpu.memory_space<vmem>>, vector<32x4xf32>
    %c0_155 = arith.constant 0 : index
    %c0_156 = arith.constant 0 : index
    %387 = vector.load %arg28[%c0_155, %c0_156] : memref<16x16xf32, #tpu.memory_space<vmem>>, vector<16x16xf32>
    %c0_157 = arith.constant 0 : index
    %c0_158 = arith.constant 0 : index
    %388 = vector.load %arg29[%c0_157, %c0_158] : memref<16x16xf32, #tpu.memory_space<vmem>>, vector<16x16xf32>
    %cst_159 = arith.constant dense<0.000000e+00> : vector<32x4xf32>
    %389 = tpu.matmul %383, %384, %cst_159 {dimension_numbers = #tpu.dot_dimension_numbers<[1], [0], [0], [1], [0, 0, 1, 1], [], []>} : vector<32x32xf32>, vector<32x4xf32>, vector<32x4xf32> -> vector<32x4xf32>
    %cst_160 = arith.constant dense<0.000000e+00> : vector<32x4xf32>
    %390 = tpu.matmul %383, %385, %cst_160 {dimension_numbers = #tpu.dot_dimension_numbers<[1], [0], [0], [1], [0, 0, 1, 1], [], []>} : vector<32x32xf32>, vector<32x4xf32>, vector<32x4xf32> -> vector<32x4xf32>
    %cst_161 = arith.constant dense<0.000000e+00> : vector<32x4xf32>
    %391 = tpu.matmul %383, %386, %cst_161 {dimension_numbers = #tpu.dot_dimension_numbers<[1], [0], [0], [1], [0, 0, 1, 1], [], []>} : vector<32x32xf32>, vector<32x4xf32>, vector<32x4xf32> -> vector<32x4xf32>
    %392 = vector.extract_strided_slice %389 {offsets = [0, 0], sizes = [16, 4], strides = [1, 1]} : vector<32x4xf32> to vector<16x4xf32>
    %cst_162 = arith.constant dense<0.000000e+00> : vector<16x4xf32>
    %393 = tpu.matmul %387, %392, %cst_162 {dimension_numbers = #tpu.dot_dimension_numbers<[1], [0], [0], [1], [0, 0, 1, 1], [], []>} : vector<16x16xf32>, vector<16x4xf32>, vector<16x4xf32> -> vector<16x4xf32>
    %394 = vector.extract_strided_slice %390 {offsets = [0, 0], sizes = [16, 4], strides = [1, 1]} : vector<32x4xf32> to vector<16x4xf32>
    %395 = arith.addf %393, %394 : vector<16x4xf32>
    %396 = vector.extract_strided_slice %391 {offsets = [0, 0], sizes = [16, 4], strides = [1, 1]} : vector<32x4xf32> to vector<16x4xf32>
    %cst_163 = arith.constant dense<0.000000e+00> : vector<16x4xf32>
    %397 = tpu.matmul %388, %396, %cst_163 {dimension_numbers = #tpu.dot_dimension_numbers<[1], [0], [0], [1], [0, 0, 1, 1], [], []>} : vector<16x16xf32>, vector<16x4xf32>, vector<16x4xf32> -> vector<16x4xf32>
    %398 = arith.addf %395, %397 : vector<16x4xf32>
    %399 = vector.extract_strided_slice %389 {offsets = [16, 0], sizes = [16, 4], strides = [1, 1]} : vector<32x4xf32> to vector<16x4xf32>
    %cst_164 = arith.constant dense<0.000000e+00> : vector<16x4xf32>
    %400 = tpu.matmul %387, %399, %cst_164 {dimension_numbers = #tpu.dot_dimension_numbers<[1], [0], [0], [1], [0, 0, 1, 1], [], []>} : vector<16x16xf32>, vector<16x4xf32>, vector<16x4xf32> -> vector<16x4xf32>
    %401 = vector.extract_strided_slice %390 {offsets = [16, 0], sizes = [16, 4], strides = [1, 1]} : vector<32x4xf32> to vector<16x4xf32>
    %402 = arith.addf %400, %401 : vector<16x4xf32>
    %403 = vector.extract_strided_slice %391 {offsets = [16, 0], sizes = [16, 4], strides = [1, 1]} : vector<32x4xf32> to vector<16x4xf32>
    %cst_165 = arith.constant dense<0.000000e+00> : vector<16x4xf32>
    %404 = tpu.matmul %388, %403, %cst_165 {dimension_numbers = #tpu.dot_dimension_numbers<[1], [0], [0], [1], [0, 0, 1, 1], [], []>} : vector<16x16xf32>, vector<16x4xf32>, vector<16x4xf32> -> vector<16x4xf32>
    %405 = arith.addf %402, %404 : vector<16x4xf32>
    %406 = tpu.concatenate %398, %405 in 0 : vector<16x4xf32>, vector<16x4xf32> -> vector<32x4xf32>
    %c0_166 = arith.constant 0 : index
    %c0_167 = arith.constant 0 : index
    %407 = vector.load %arg30[%c0_166, %c0_167] : memref<32x32xf32, #tpu.memory_space<vmem>>, vector<32x32xf32>
    tpu.vector_store %arg30[%c0_166, %c0_167], %380 {strides = array<i32>} : memref<32x32xf32, #tpu.memory_space<vmem>>, vector<32x32xf32>,
    %c0_168 = arith.constant 0 : index
    %c0_169 = arith.constant 0 : index
    %408 = vector.load %arg3[%c0_168, %c0_169] : memref<32x4xf32, #tpu.memory_space<vmem>>, vector<32x4xf32>
    %409 = arith.addf %408, %406 : vector<32x4xf32>
    %c0_170 = arith.constant 0 : index
    %c0_171 = arith.constant 0 : index
    %410 = vector.load %arg31[%c0_170, %c0_171] : memref<32x4xf32, #tpu.memory_space<vmem>>, vector<32x4xf32>
    tpu.vector_store %arg31[%c0_170, %c0_171], %409 {strides = array<i32>} : memref<32x4xf32, #tpu.memory_space<vmem>>, vector<32x4xf32>,
    return
  }
  func.func @transform_0(%arg0: i32) -> (i32, i32) {
    %c0_i32 = arith.constant 0 : i32
    %c0_i32_0 = arith.constant 0 : i32
    %c0_i32_1 = arith.constant 0 : i32
    return %c0_i32, %c0_i32_0 : i32, i32
  }
  func.func @transform_1(%arg0: i32) -> (i32, i32) {
    %c0_i32 = arith.constant 0 : i32
    %c0_i32_0 = arith.constant 0 : i32
    %c0_i32_1 = arith.constant 0 : i32
    return %c0_i32, %c0_i32_0 : i32, i32
  }
  func.func @transform_2(%arg0: i32) -> (i32, i32) {
    %c0_i32 = arith.constant 0 : i32
    %c0_i32_0 = arith.constant 0 : i32
    %c0_i32_1 = arith.constant 0 : i32
    return %c0_i32, %c0_i32_0 : i32, i32
  }
  func.func @transform_3(%arg0: i32) -> (i32, i32) {
    %c0_i32 = arith.constant 0 : i32
    %c0_i32_0 = arith.constant 0 : i32
    %c0_i32_1 = arith.constant 0 : i32
    return %c0_i32, %c0_i32_0 : i32, i32
  }
  func.func @transform_4(%arg0: i32) -> (i32, i32) {
    %c0_i32 = arith.constant 0 : i32
    %c0_i32_0 = arith.constant 0 : i32
    %c0_i32_1 = arith.constant 0 : i32
    return %c0_i32, %c0_i32_0 : i32, i32
  }
  func.func @transform_5(%arg0: i32) -> (i32, i32) {
    %c0_i32 = arith.constant 0 : i32
    %c0_i32_0 = arith.constant 0 : i32
    %c0_i32_1 = arith.constant 0 : i32
    return %c0_i32, %c0_i32_0 : i32, i32
  }
  func.func @transform_6(%arg0: i32) -> (i32, i32) {
    %c0_i32 = arith.constant 0 : i32
    %c0_i32_0 = arith.constant 0 : i32
    %c0_i32_1 = arith.constant 0 : i32
    return %c0_i32, %c0_i32_0 : i32, i32
  }
  func.func @transform_7(%arg0: i32) -> (i32, i32) {
    %c0_i32 = arith.constant 0 : i32
    %c0_i32_0 = arith.constant 0 : i32
    %c0_i32_1 = arith.constant 0 : i32
    return %c0_i32, %c0_i32_0 : i32, i32
  }
  func.func @transform_8(%arg0: i32) -> (i32, i32) {
    %c0_i32 = arith.constant 0 : i32
    %c0_i32_0 = arith.constant 0 : i32
    %c0_i32_1 = arith.constant 0 : i32
    return %c0_i32, %c0_i32_0 : i32, i32
  }
  func.func @transform_9(%arg0: i32) -> (i32, i32) {
    %c0_i32 = arith.constant 0 : i32
    %c0_i32_0 = arith.constant 0 : i32
    %c0_i32_1 = arith.constant 0 : i32
    return %c0_i32, %c0_i32_0 : i32, i32
  }
  func.func @transform_10(%arg0: i32) -> (i32, i32) {
    %c0_i32 = arith.constant 0 : i32
    %c0_i32_0 = arith.constant 0 : i32
    %c0_i32_1 = arith.constant 0 : i32
    return %c0_i32, %c0_i32_0 : i32, i32
  }
  func.func @transform_11(%arg0: i32) -> (i32, i32) {
    %c0_i32 = arith.constant 0 : i32
    %c0_i32_0 = arith.constant 0 : i32
    %c0_i32_1 = arith.constant 0 : i32
    return %c0_i32, %c0_i32_0 : i32, i32
  }
  func.func @transform_12(%arg0: i32) -> (i32, i32) {
    %c0_i32 = arith.constant 0 : i32
    %c0_i32_0 = arith.constant 0 : i32
    %c0_i32_1 = arith.constant 0 : i32
    return %c0_i32, %c0_i32_0 : i32, i32
  }
  func.func @transform_13(%arg0: i32) -> (i32, i32) {
    %c0_i32 = arith.constant 0 : i32
    %c0_i32_0 = arith.constant 0 : i32
    %c0_i32_1 = arith.constant 0 : i32
    return %c0_i32, %c0_i32_0 : i32, i32
  }
  func.func @transform_14(%arg0: i32) -> (i32, i32) {
    %c0_i32 = arith.constant 0 : i32
    %c0_i32_0 = arith.constant 0 : i32
    %c0_i32_1 = arith.constant 0 : i32
    return %c0_i32, %c0_i32_0 : i32, i32
  }
  func.func @transform_15(%arg0: i32) -> (i32, i32) {
    %c0_i32 = arith.constant 0 : i32
    %c0_i32_0 = arith.constant 0 : i32
    %c0_i32_1 = arith.constant 0 : i32
    return %c0_i32, %c0_i32_0 : i32, i32
  }
  func.func @transform_16(%arg0: i32) -> (i32, i32) {
    %c0_i32 = arith.constant 0 : i32
    %c0_i32_0 = arith.constant 0 : i32
    %c0_i32_1 = arith.constant 0 : i32
    return %c0_i32, %c0_i32_0 : i32, i32
  }
  func.func @transform_17(%arg0: i32) -> (i32, i32) {
    %c0_i32 = arith.constant 0 : i32
    %c0_i32_0 = arith.constant 0 : i32
    %c0_i32_1 = arith.constant 0 : i32
    return %c0_i32, %c0_i32_0 : i32, i32
  }
  func.func @transform_18(%arg0: i32) -> (i32, i32) {
    %c0_i32 = arith.constant 0 : i32
    %c0_i32_0 = arith.constant 0 : i32
    %c0_i32_1 = arith.constant 0 : i32
    return %c0_i32, %c0_i32_0 : i32, i32
  }
  func.func @transform_19(%arg0: i32) -> (i32, i32) {
    %c0_i32 = arith.constant 0 : i32
    %c0_i32_0 = arith.constant 0 : i32
    %c0_i32_1 = arith.constant 0 : i32
    return %c0_i32, %c0_i32_0 : i32, i32
  }
  func.func @transform_20(%arg0: i32) -> (i32, i32) {
    %c0_i32 = arith.constant 0 : i32
    %c0_i32_0 = arith.constant 0 : i32
    %c0_i32_1 = arith.constant 0 : i32
    return %c0_i32, %c0_i32_0 : i32, i32
  }
  func.func @transform_21(%arg0: i32) -> (i32, i32) {
    %c0_i32 = arith.constant 0 : i32
    %c0_i32_0 = arith.constant 0 : i32
    %c0_i32_1 = arith.constant 0 : i32
    return %c0_i32, %c0_i32_0 : i32, i32
  }
  func.func @transform_22(%arg0: i32) -> (i32, i32) {
    %c0_i32 = arith.constant 0 : i32
    %c0_i32_0 = arith.constant 0 : i32
    %c0_i32_1 = arith.constant 0 : i32
    return %c0_i32, %c0_i32_0 : i32, i32
  }
  func.func @transform_23(%arg0: i32) -> (i32, i32) {
    %c0_i32 = arith.constant 0 : i32
    %c0_i32_0 = arith.constant 0 : i32
    %c0_i32_1 = arith.constant 0 : i32
    return %c0_i32, %c0_i32_0 : i32, i32
  }
  func.func @transform_24(%arg0: i32) -> (i32, i32) {
    %c0_i32 = arith.constant 0 : i32
    %c0_i32_0 = arith.constant 0 : i32
    %c0_i32_1 = arith.constant 0 : i32
    return %c0_i32, %c0_i32_0 : i32, i32
  }
  func.func @transform_25(%arg0: i32) -> (i32, i32) {
    %c0_i32 = arith.constant 0 : i32
    %c0_i32_0 = arith.constant 0 : i32
    %c0_i32_1 = arith.constant 0 : i32
    return %c0_i32, %c0_i32_0 : i32, i32
  }
  func.func @transform_26(%arg0: i32) -> (i32, i32) {
    %c0_i32 = arith.constant 0 : i32
    %c0_i32_0 = arith.constant 0 : i32
    %c0_i32_1 = arith.constant 0 : i32
    return %c0_i32, %c0_i32_0 : i32, i32
  }
  func.func @transform_27(%arg0: i32) -> (i32, i32) {
    %c0_i32 = arith.constant 0 : i32
    %c0_i32_0 = arith.constant 0 : i32
    %c0_i32_1 = arith.constant 0 : i32
    return %c0_i32, %c0_i32_0 : i32, i32
  }
  func.func @transform_28(%arg0: i32) -> (i32, i32) {
    %c0_i32 = arith.constant 0 : i32
    %c0_i32_0 = arith.constant 0 : i32
    %c0_i32_1 = arith.constant 0 : i32
    return %c0_i32, %c0_i32_0 : i32, i32
  }
  func.func @transform_29(%arg0: i32) -> (i32, i32) {
    %c0_i32 = arith.constant 0 : i32
    %c0_i32_0 = arith.constant 0 : i32
    %c0_i32_1 = arith.constant 0 : i32
    return %c0_i32, %c0_i32_0 : i32, i32
  }
  func.func @transform_30(%arg0: i32) -> (i32, i32) {
    %c0_i32 = arith.constant 0 : i32
    %c0_i32_0 = arith.constant 0 : i32
    %c0_i32_1 = arith.constant 0 : i32
    return %c0_i32, %c0_i32_0 : i32, i32
  }
}

module attributes {stable_mosaic.version = 11 : i64} {
  func.func @_final_kernel(%arg0: i32, %arg1: memref<32x32xf32, #tpu.memory_space<vmem>>, %arg2: memref<1x32xf32, #tpu.memory_space<vmem>>, %arg3: memref<1x32xf32, #tpu.memory_space<vmem>>, %arg4: memref<32x4xf32, #tpu.memory_space<vmem>>, %arg5: memref<1x4xf32, #tpu.memory_space<vmem>>, %arg6: memref<32x4xf32, #tpu.memory_space<vmem>>, %arg7: memref<32x4xf32, #tpu.memory_space<vmem>>) attributes {dimension_semantics = [#tpu.dimension_semantics<arbitrary>], iteration_bounds = array<i64: 1>, scalar_prefetch = 0 : i64, scratch_operands = 0 : i64, tpu.core_type = #tpu.core_type<tc>, window_params = [{pipeline_mode = #tpu.pipeline_mode<synchronous>, transform_indices = @transform_0, window_bounds = array<i64: 32, 32>}, {pipeline_mode = #tpu.pipeline_mode<synchronous>, transform_indices = @transform_1, window_bounds = array<i64: 1, 32>}, {pipeline_mode = #tpu.pipeline_mode<synchronous>, transform_indices = @transform_2, window_bounds = array<i64: 1, 32>}, {pipeline_mode = #tpu.pipeline_mode<synchronous>, transform_indices = @transform_3, window_bounds = array<i64: 32, 4>}, {pipeline_mode = #tpu.pipeline_mode<synchronous>, transform_indices = @transform_4, window_bounds = array<i64: 1, 4>}, {pipeline_mode = #tpu.pipeline_mode<synchronous>, transform_indices = @transform_5, window_bounds = array<i64: 32, 4>}, {pipeline_mode = #tpu.pipeline_mode<synchronous>, transform_indices = @transform_6, window_bounds = array<i64: 32, 4>}]} {
    %c0 = arith.constant 0 : index
    %c0_0 = arith.constant 0 : index
    %0 = vector.load %arg1[%c0, %c0_0] : memref<32x32xf32, #tpu.memory_space<vmem>>, vector<32x32xf32>
    %c0_1 = arith.constant 0 : index
    %c0_2 = arith.constant 0 : index
    %1 = vector.load %arg2[%c0_1, %c0_2] : memref<1x32xf32, #tpu.memory_space<vmem>>, vector<1x32xf32>
    %c0_3 = arith.constant 0 : index
    %c0_4 = arith.constant 0 : index
    %2 = vector.load %arg3[%c0_3, %c0_4] : memref<1x32xf32, #tpu.memory_space<vmem>>, vector<1x32xf32>
    %cst = arith.constant dense<0.000000e+00> : vector<32xf32>
    %3 = vector.multi_reduction <add>, %0, %cst [1] : vector<32x32xf32> to vector<32xf32>
    %4 = vector.shape_cast %3 : vector<32xf32> to vector<32x1xf32>
    %cst_5 = arith.constant 3.200000e+01 : f32
    %5 = vector.broadcast %cst_5 : f32 to vector<32x1xf32>
    %6 = arith.divf %4, %5 : vector<32x1xf32>
    %7 = vector.broadcast %6 : vector<32x1xf32> to vector<32x32xf32>
    %8 = arith.subf %0, %7 : vector<32x32xf32>
    %9 = arith.mulf %8, %8 : vector<32x32xf32>
    %cst_6 = arith.constant dense<0.000000e+00> : vector<32xf32>
    %10 = vector.multi_reduction <add>, %9, %cst_6 [1] : vector<32x32xf32> to vector<32xf32>
    %11 = vector.shape_cast %10 : vector<32xf32> to vector<32x1xf32>
    %cst_7 = arith.constant 3.200000e+01 : f32
    %12 = vector.broadcast %cst_7 : f32 to vector<32x1xf32>
    %13 = arith.divf %11, %12 : vector<32x1xf32>
    %14 = vector.broadcast %6 : vector<32x1xf32> to vector<32x32xf32>
    %15 = arith.subf %0, %14 : vector<32x32xf32>
    %cst_8 = arith.constant 9.99999974E-6 : f32
    %16 = vector.broadcast %cst_8 : f32 to vector<32x1xf32>
    %17 = arith.addf %13, %16 : vector<32x1xf32>
    %18 = math.rsqrt %17 : vector<32x1xf32>
    %19 = vector.broadcast %18 : vector<32x1xf32> to vector<32x32xf32>
    %20 = arith.mulf %15, %19 : vector<32x32xf32>
    %21 = vector.broadcast %1 : vector<1x32xf32> to vector<32x32xf32>
    %22 = arith.mulf %20, %21 : vector<32x32xf32>
    %23 = vector.broadcast %2 : vector<1x32xf32> to vector<32x32xf32>
    %24 = arith.addf %22, %23 : vector<32x32xf32>
    %25 = vector.extract_strided_slice %24 {offsets = [0, 0], sizes = [16, 32], strides = [1, 1]} : vector<32x32xf32> to vector<16x32xf32>
    %cst_9 = arith.constant dense<0.000000e+00> : vector<32xf32>
    %26 = vector.multi_reduction <add>, %25, %cst_9 [0] : vector<16x32xf32> to vector<32xf32>
    %27 = vector.shape_cast %26 : vector<32xf32> to vector<1x32xf32>
    %cst_10 = arith.constant 1.600000e+01 : f32
    %28 = vector.broadcast %cst_10 : f32 to vector<1x32xf32>
    %29 = arith.divf %27, %28 : vector<1x32xf32>
    %30 = vector.broadcast %29 : vector<1x32xf32> to vector<16x32xf32>
    %31 = arith.subf %25, %30 : vector<16x32xf32>
    %32 = vector.extract_strided_slice %24 {offsets = [16, 0], sizes = [16, 32], strides = [1, 1]} : vector<32x32xf32> to vector<16x32xf32>
    %cst_11 = arith.constant dense<0.000000e+00> : vector<32xf32>
    %33 = vector.multi_reduction <add>, %32, %cst_11 [0] : vector<16x32xf32> to vector<32xf32>
    %34 = vector.shape_cast %33 : vector<32xf32> to vector<1x32xf32>
    %cst_12 = arith.constant 1.600000e+01 : f32
    %35 = vector.broadcast %cst_12 : f32 to vector<1x32xf32>
    %36 = arith.divf %34, %35 : vector<1x32xf32>
    %37 = vector.broadcast %36 : vector<1x32xf32> to vector<16x32xf32>
    %38 = arith.subf %32, %37 : vector<16x32xf32>
    %39 = tpu.concatenate %31, %38 in 0 : vector<16x32xf32>, vector<16x32xf32> -> vector<32x32xf32>
    %c0_13 = arith.constant 0 : index
    %c0_14 = arith.constant 0 : index
    %40 = vector.load %arg4[%c0_13, %c0_14] : memref<32x4xf32, #tpu.memory_space<vmem>>, vector<32x4xf32>
    %cst_15 = arith.constant dense<0.000000e+00> : vector<32x4xf32>
    %41 = tpu.matmul %39, %40, %cst_15 {dimension_numbers = #tpu.dot_dimension_numbers<[1], [0], [0], [1], [0, 0, 1, 1], [], []>} : vector<32x32xf32>, vector<32x4xf32>, vector<32x4xf32> -> vector<32x4xf32>
    %c0_16 = arith.constant 0 : index
    %c0_17 = arith.constant 0 : index
    %42 = vector.load %arg5[%c0_16, %c0_17] : memref<1x4xf32, #tpu.memory_space<vmem>>, vector<1x4xf32>
    %43 = vector.broadcast %42 : vector<1x4xf32> to vector<32x4xf32>
    %44 = arith.addf %41, %43 : vector<32x4xf32>
    %c0_18 = arith.constant 0 : index
    %c0_19 = arith.constant 0 : index
    %45 = vector.load %arg6[%c0_18, %c0_19] : memref<32x4xf32, #tpu.memory_space<vmem>>, vector<32x4xf32>
    %46 = arith.addf %44, %45 : vector<32x4xf32>
    %c0_20 = arith.constant 0 : index
    %c0_21 = arith.constant 0 : index
    %47 = vector.load %arg7[%c0_20, %c0_21] : memref<32x4xf32, #tpu.memory_space<vmem>>, vector<32x4xf32>
    tpu.vector_store %arg7[%c0_20, %c0_21], %46 {strides = array<i32>} : memref<32x4xf32, #tpu.memory_space<vmem>>, vector<32x4xf32>,
    return
  }
  func.func @transform_0(%arg0: i32) -> (i32, i32) {
    %c0_i32 = arith.constant 0 : i32
    %c0_i32_0 = arith.constant 0 : i32
    %c0_i32_1 = arith.constant 0 : i32
    return %c0_i32, %c0_i32_0 : i32, i32
  }
  func.func @transform_1(%arg0: i32) -> (i32, i32) {
    %c0_i32 = arith.constant 0 : i32
    %c0_i32_0 = arith.constant 0 : i32
    %c0_i32_1 = arith.constant 0 : i32
    return %c0_i32, %c0_i32_0 : i32, i32
  }
  func.func @transform_2(%arg0: i32) -> (i32, i32) {
    %c0_i32 = arith.constant 0 : i32
    %c0_i32_0 = arith.constant 0 : i32
    %c0_i32_1 = arith.constant 0 : i32
    return %c0_i32, %c0_i32_0 : i32, i32
  }
  func.func @transform_3(%arg0: i32) -> (i32, i32) {
    %c0_i32 = arith.constant 0 : i32
    %c0_i32_0 = arith.constant 0 : i32
    %c0_i32_1 = arith.constant 0 : i32
    return %c0_i32, %c0_i32_0 : i32, i32
  }
  func.func @transform_4(%arg0: i32) -> (i32, i32) {
    %c0_i32 = arith.constant 0 : i32
    %c0_i32_0 = arith.constant 0 : i32
    %c0_i32_1 = arith.constant 0 : i32
    return %c0_i32, %c0_i32_0 : i32, i32
  }
  func.func @transform_5(%arg0: i32) -> (i32, i32) {
    %c0_i32 = arith.constant 0 : i32
    %c0_i32_0 = arith.constant 0 : i32
    %c0_i32_1 = arith.constant 0 : i32
    return %c0_i32, %c0_i32_0 : i32, i32
  }
  func.func @transform_6(%arg0: i32) -> (i32, i32) {
    %c0_i32 = arith.constant 0 : i32
    %c0_i32_0 = arith.constant 0 : i32
    %c0_i32_1 = arith.constant 0 : i32
    return %c0_i32, %c0_i32_0 : i32, i32
  }
}

</mosaic_0001>

<bundles_post_ra>
// kernel: autoformer_forward.5
= control target key start
LH: loop header
LB: loop body
LE: loop exit
PB: predicated region body
PF: predicated region fallthrough
CT: control target
= control target key end

     0   :  { %vm53_vm0 = vcmask 1043456   ;;  %vm40_vm1 = vcmask 31744   ;;  %vm318_vm2 = vcmask 130048   ;;  %vm744_vm3 = vcmask 261120   ;;  %s1042_s2 = inlined_call_operand.vmem [shape: f32[4,32], index: 2, kind: input, shape index: {}]   ;;  %s1043_s0 = inlined_call_operand.vmem [shape: f32[32,4], index: 0, kind: input, shape index: {}]   ;;  %s1044_s4 = inlined_call_operand.vmem [shape: f32[4,32], index: 4, kind: input, shape index: {}]   ;;  %s1045_s3 = inlined_call_operand.vmem [shape: f32[4,32], index: 3, kind: input, shape index: {}]   ;;  %s1046_s6 = inlined_call_operand.vmem [shape: f32[16,16], index: 6, kind: input, shape index: {}]   ;;  %s1047_s5 = inlined_call_operand.vmem [shape: f32[4,32], index: 5, kind: input, shape index: {}]   ;;  %s1048_s1 = inlined_call_operand.vmem [shape: f32[32,4], index: 1, kind: input, shape index: {}]   ;;  %s1049_s7 = inlined_call_operand.vmem [shape: f32[16,16], index: 7, kind: input, shape index: {}]   ;;  %s1050_s8 = inlined_call_operand.vmem [shape: f32[32,32], index: 8, kind: output, shape index: {}]  }
   0x1   :  { %v33_v0 = vld [vmem:[%s1042_s2] sm:$0xf]  ;;  %v30_v2 = vld [vmem:[%s1043_s0 + $0x8] sm:$0xff]  ;;  %v31_v3 = vld [vmem:[%s1043_s0 + $0x10] sm:$0xff] }
   0x2   :  { %v29_v1 = vld [vmem:[%s1043_s0] sm:$0xff]  ;;  %817 = vmatprep.subr.msk.mxu0 %vm53_vm0, %v33_v0  ;;  %v32_v6 = vld [vmem:[%s1043_s0 + $0x18] sm:$0xff]  ;;  %v636_v10 = vld [vmem:[%s1048_s1 + $0x8] sm:$0xff] }
   0x3   :  { %819 = vmatprep.mubr.msk.f32.mxu0 %vm40_vm1, %v29_v1  ;;  %v35_v4 = vld [vmem:[%s1044_s4] sm:$0xf]  ;;  %818 = vmatpush3.msk.msra.mxu0 %vm53_vm0, %v33_v0  ;;  %v637_v11 = vld [vmem:[%s1048_s1 + $0x10] sm:$0xff]  ;;  %v638_v12 = vld [vmem:[%s1048_s1 + $0x18] sm:$0xff] }
   0x4   :  { %v34_v5 = vld [vmem:[%s1045_s3] sm:$0xf]  ;;  %827 = vmatprep.mubr.msk.f32.mxu1 %vm40_vm1, %v29_v1  ;;  %820 = vmatmul.mubr.msk.f32.vlgmr.msra.gmra.mrb[0].mxu0 %vm40_vm1, %v30_v2  ;;  %v37_v18 = vld [vmem:[%s1046_s6 + $0x8] sm:$0xff] }
   0x5   :  { %833 = vmatprep.subr.msk.mxu0 %vm53_vm0, %v35_v4  ;;  %822 = vmatprep.mubr.msk.f32.mxu0 %vm40_vm1, %v31_v3  ;;  %v36_v7 = vld [vmem:[%s1046_s6] sm:$0xff]  ;;  %v39_v25 = vld [vmem:[%s1049_s7 + $0x8] sm:$0xff] }
   0x6   :  { %834 = vmatpush3.msk.msra.mxu0 %vm53_vm0, %v35_v4  ;;  %825 = vmatprep.subr.msk.mxu1 %vm53_vm0, %v34_v5  ;;  %v639_v8 = vld [vmem:[%s1047_s5] sm:$0xf] }
   0x7   :  { %826 = vmatpush3.msk.msra.mxu1 %vm53_vm0, %v34_v5  ;;  %869 = vmatprep.subr.msk.mxu0 %vm53_vm0, %v639_v8  ;;  %v635_v9 = vld [vmem:[%s1048_s1] sm:$0xff] }
   0x8   :  { %823 = vmatmul.mubr.msk.f32.gmra.mrb[2].mxu0 %vm40_vm1, %v32_v6  ;;  %828 = vmatmul.mubr.msk.f32.vlgmr.msra.gmra.mrb[0].mxu1 %vm40_vm1, %v30_v2  ;;  %v38_v20 = vld [vmem:[%s1049_s7] sm:$0xff] }
   0x9   :  { %835 = vmatprep.mubr.msk.f32.mxu0 %vm40_vm1, %v29_v1  ;;  %830 = vmatprep.mubr.msk.f32.mxu1 %vm40_vm1, %v31_v3 }
   0xc   :  { %836 = vmatmul.mubr.msk.f32.vlgmr.msra.gmra.mrb[4].mxu0 %vm40_vm1, %v30_v2  ;;  %831 = vmatmul.mubr.msk.f32.gmra.mrb[2].mxu1 %vm40_vm1, %v32_v6 }
   0xd   :  { %838 = vmatprep.mubr.msk.f32.mxu0 %vm40_vm1, %v31_v3  ;;  %845 = vmatprep.mubr.msk.f32.mxu1 %vm318_vm2, %v36_v7 }
   0xe   :  { %870 = vmatpush3.msk.msra.mxu0 %vm53_vm0, %v639_v8 }
  0x10   :  { %839 = vmatmul.mubr.msk.f32.gmra.mrb[6].mxu0 %vm40_vm1, %v32_v6 }
  0x11   :  { %871 = vmatprep.mubr.msk.f32.mxu0 %vm40_vm1, %v635_v9 }
  0x14   :  { %872 = vmatmul.mubr.msk.f32.vlgmr.msra.gmra.mrb[8].mxu0 %vm40_vm1, %v636_v10 }
  0x15   :  { %874 = vmatprep.mubr.msk.f32.mxu0 %vm40_vm1, %v637_v11 }
  0x18   :  { %875 = vmatmul.mubr.msk.f32.gmra.mrb[10].mxu0 %vm40_vm1, %v638_v12 }
  0xd7   :  { %v821_v13 = vpop.f32.mrb[0].mxu0 }
  0xd8   :  { %v123_v14 = vpop.f32.mrb[1].mxu0 }
  0xd9   :  { %v877_v15 = vpack.c.bf16 %v821_v13, %v123_v14 }
  0xdb   :  { %v824_v16 = vpop.f32.mrb[2].mxu0  ;;  %878 = vmatprep.subr.bf16.mxu1 %v877_v15 }
  0xdc   :  { %v133_v17 = vpop.f32.mrb[3].mxu0  ;;  %880 = vmatpush3.bf16.msra.mxu1 %v877_v15 }
  0xdd   :  { %v885_v19 = vpack.c.bf16 %v824_v16, %v133_v17 }
  0xdf   :  { %v837_v21 = vpop.f32.mrb[4].mxu0  ;;  %846 = vmatmul.mubr.msk.f32.vlgmr.msra.gmra.mrb[0].mxu1 %vm318_vm2, %v37_v18 }
  0xe0   :  { %v299_v22 = vpop.f32.mrb[5].mxu0  ;;  %852 = vmatprep.mubr.msk.f32.mxu1 %vm318_vm2, %v38_v20 }
  0xe1   :  { %v881_v23 = vpack.c.bf16 %v837_v21, %v299_v22 }
  0xe3   :  { %882 = vmatprep.subr.bf16.mxu1 %v881_v23  ;;  %v840_v24 = vpop.f32.mrb[6].mxu0 }
  0xe4   :  { %884 = vmatpush3.bf16.msra.mxu1 %v881_v23  ;;  %v309_v26 = vpop.f32.mrb[7].mxu0 }
  0xe5   :  { %886 = vmatprep.subr.bf16.mxu1 %v885_v19  ;;  %v889_v27 = vpack.c.bf16 %v840_v24, %v309_v26 }
  0xe7   :  { %853 = vmatmul.mubr.msk.f32.vlgmr.msra.gmra.mrb[0].mxu1 %vm318_vm2, %v39_v25  ;;  %v873_v28 = vpop.f32.mrb[8].mxu0 }
  0xe8   :  { %888 = vmatpush3.bf16.msra.mxu1 %v885_v19  ;;  %859 = vmatprep.mubr.msk.f32.mxu1 %vm318_vm2, %v36_v7  ;;  %v721_v29 = vpop.f32.mrb[9].mxu0 }
  0xe9   :  { %890 = vmatprep.subr.bf16.mxu1 %v889_v27 }
  0xeb   :  { %860 = vmatmul.mubr.msk.f32.vlgmr.msra.gmra.mrb[2].mxu1 %vm318_vm2, %v37_v18  ;;  %v876_v30 = vpop.f32.mrb[10].mxu0 }
  0xec   :  { %892 = vmatpush3.bf16.msra.mxu1 %v889_v27  ;;  %866 = vmatprep.mubr.msk.f32.mxu1 %vm318_vm2, %v38_v20  ;;  %v731_v31 = vpop.f32.mrb[11].mxu0 }
  0xf3   :  { %867 = vmatmul.mubr.msk.f32.vlgmr.msra.gmra.mrb[2].mxu1 %vm318_vm2, %v39_v25 }
 0x1ba   :  { %v854_v32 = vpop.f32.mrb[0].mxu1 }
 0x1bb   :  { %v893_v33 = vadd.f32 %v873_v28, %v854_v32  ;;  %v472_v34 = vpop.f32.mrb[1].mxu1 }
 0x1bc   :  { %v894_v35 = vadd.f32 %v721_v29, %v472_v34 }
 0x1bd   :  { %746 = vst.msk [vmem:[%s1050_s8 + $0x8] sm:$0xff] %vm744_vm3, %v893_v33 }
 0x1be   :  { %745 = vst.msk [vmem:[%s1050_s8] sm:$0xff] %vm744_vm3, %v894_v35 }
 0x1c6   :  { %v868_v36 = vpop.f32.mrb[2].mxu1 }
 0x1c7   :  { %v895_v37 = vadd.f32 %v876_v30, %v868_v36  ;;  %v624_v38 = vpop.f32.mrb[3].mxu1 }
 0x1c8   :  { %v896_v39 = vadd.f32 %v731_v31, %v624_v38 }
 0x1c9   :  { %748 = vst.msk [vmem:[%s1050_s8 + $0x18] sm:$0xff] %vm744_vm3, %v895_v37 }
 0x1ca   :  { %747 = vst.msk [vmem:[%s1050_s8 + $0x10] sm:$0xff] %vm744_vm3, %v896_v39 }

// kernel: autoformer_forward.7
= control target key start
LH: loop header
LB: loop body
LE: loop exit
PB: predicated region body
PF: predicated region fallthrough
CT: control target
= control target key end

     0   :  { %vm40_vm0 = vcmask 130048   ;;  %vm221_vm1 = vcmask 1043456   ;;  %vm208_vm2 = vcmask 31744   ;;  %vm911_vm3 = vcmask 261120   ;;  %s1287_s0 = inlined_call_operand.vmem [shape: f32[32,4], index: 0, kind: input, shape index: {}]   ;;  %s1288_s8 = inlined_call_operand.vmem [shape: f32[16,16], index: 8, kind: input, shape index: {}]   ;;  %s1289_s2 = inlined_call_operand.vmem [shape: f32[4,32], index: 2, kind: input, shape index: {}]   ;;  %s1290_s3 = inlined_call_operand.vmem [shape: f32[4,32], index: 3, kind: input, shape index: {}]   ;;  %s1291_s10 = inlined_call_operand.vmem [shape: f32[32,4], index: 10, kind: output, shape index: {1}]   ;;  %s1292_s4 = inlined_call_operand.vmem [shape: f32[4,32], index: 4, kind: input, shape index: {}]   ;;  %s1293_s6 = inlined_call_operand.vmem [shape: f32[16,16], index: 6, kind: input, shape index: {}]   ;;  %s1294_s7 = inlined_call_operand.vmem [shape: f32[16,16], index: 7, kind: input, shape index: {}]   ;;  %s1295_s5 = inlined_call_operand.vmem [shape: f32[4,32], index: 5, kind: input, shape index: {}]   ;;  %s1296_s1 = inlined_call_operand.vmem [shape: f32[32,4], index: 1, kind: input, shape index: {}]   ;;  %s1297_s9 = inlined_call_operand.vmem [shape: f32[32,32], index: 9, kind: output, shape index: {0}]  }
   0x1   :  { %v34_v0 = vld [vmem:[%s1287_s0] sm:$0xff]  ;;  %v35_v1 = vld [vmem:[%s1287_s0 + $0x8] sm:$0xff]  ;;  %v36_v4 = vld [vmem:[%s1287_s0 + $0x10] sm:$0xff] }
   0x2   :  { %v38_v2 = vld [vmem:[%s1288_s8] sm:$0xff]  ;;  %v1078_v3 = vpack.c.bf16 %v35_v1, %v34_v0  ;;  %v37_v5 = vld [vmem:[%s1287_s0 + $0x18] sm:$0xff]  ;;  %v39_v7 = vld [vmem:[%s1288_s8 + $0x8] sm:$0xff] }
   0x3   :  { %1008 = vmatprep.mubr.msk.f32.mxu0 %vm40_vm0, %v38_v2  ;;  %1015 = vmatprep.mubr.msk.f32.mxu1 %vm40_vm0, %v38_v2  ;;  %v1082_v6 = vpack.c.bf16 %v37_v5, %v36_v4  ;;  %v201_v8 = vld [vmem:[%s1289_s2] sm:$0xf]  ;;  %v205_v25 = vld [vmem:[%s1293_s6 + $0x8] sm:$0xff]  ;;  %v804_v42 = vld [vmem:[%s1296_s1 + $0x10] sm:$0xff] }
   0x4   :  { %1079 = vmatprep.subr.bf16.mxu0 %v1078_v3  ;;  %v202_v9 = vld [vmem:[%s1290_s3] sm:$0xf]  ;;  %v207_v37 = vld [vmem:[%s1294_s7 + $0x8] sm:$0xff]  ;;  %v805_v43 = vld [vmem:[%s1296_s1 + $0x18] sm:$0xff] }
   0x5   :  { %1081 = vmatpush3.bf16.msra.mxu0 %v1078_v3  ;;  %1083 = vmatprep.subr.bf16.mxu1 %v1082_v6  ;;  %v203_v17 = vld [vmem:[%s1292_s4] sm:$0xf]  ;;  %v803_v41 = vld [vmem:[%s1296_s1 + $0x8] sm:$0xff] }
   0x6   :  { %1085 = vmatpush3.bf16.msra.mxu1 %v1082_v6  ;;  %1018 = vmatprep.subr.msk.mxu0 %vm221_vm1, %v201_v8  ;;  %v204_v19 = vld [vmem:[%s1293_s6] sm:$0xff] }
   0x7   :  { %v206_v27 = vld [vmem:[%s1294_s7] sm:$0xff] }
   0x8   :  { %1009 = vmatmul.mubr.msk.f32.vlgmr.msra.gmra.mrb[0].mxu0 %vm40_vm0, %v39_v7  ;;  %v806_v39 = vld [vmem:[%s1295_s5] sm:$0xf] }
   0x9   :  { %1016 = vmatmul.mubr.msk.f32.vlgmr.msra.gmra.mrb[0].mxu1 %vm40_vm0, %v39_v7  ;;  %1019 = vmatpush3.msk.msra.mxu0 %vm221_vm1, %v201_v8  ;;  %v802_v40 = vld [vmem:[%s1296_s1] sm:$0xff] }
   0xa   :  { %1026 = vmatprep.subr.msk.mxu0 %vm221_vm1, %v202_v9  ;;  %1046 = vmatprep.mubr.msk.f32.mxu1 %vm40_vm0, %v204_v19 }
  0xdb   :  { %v1010_v10 = vpop.f32.mrb[0].mxu0 }
  0xdc   :  { %917 = vst.msk [vmem:[%s1291_s10 + $0x8] sm:$0xff] %vm208_vm2, %v1010_v10  ;;  %v113_v11 = vpop.f32.mrb[1].mxu0  ;;  %v1017_v12 = vpop.f32.mrb[0].mxu1  ;;  %v123_v15 = vsub.f32 %v35_v1, %v1010_v10 }
  0xdd   :  { %v122_v13 = vsub.f32 %v34_v0, %v113_v11  ;;  %916 = vst.msk [vmem:[%s1291_s10] sm:$0xff] %vm208_vm2, %v113_v11  ;;  %919 = vst.msk [vmem:[%s1291_s10 + $0x18] sm:$0xff] %vm208_vm2, %v1017_v12  ;;  %v190_v14 = vpop.f32.mrb[1].mxu1  ;;  %v200_v18 = vsub.f32 %v37_v5, %v1017_v12 }
  0xde   :  { %v199_v16 = vsub.f32 %v36_v4, %v190_v14  ;;  %918 = vst.msk [vmem:[%s1291_s10 + $0x10] sm:$0xff] %vm208_vm2, %v190_v14 }
  0xdf   :  { %1020 = vmatprep.mubr.msk.f32.mxu0 %vm208_vm2, %v122_v13 }
  0xe0   :  { %1021 = vmatmul.mubr.msk.f32.vlgmr.msra.gmra.mrb[2].mxu0 %vm208_vm2, %v123_v15 }
  0xe1   :  { %1023 = vmatprep.mubr.msk.f32.mxu0 %vm208_vm2, %v199_v16  ;;  %1027 = vmatpush3.msk.msra.mxu0 %vm221_vm1, %v202_v9 }
  0xe2   :  { %1034 = vmatprep.subr.msk.mxu0 %vm221_vm1, %v203_v17 }
  0xe4   :  { %1024 = vmatmul.mubr.msk.f32.gmra.mrb[4].mxu0 %vm208_vm2, %v200_v18 }
  0xe5   :  { %1028 = vmatprep.mubr.msk.f32.mxu0 %vm208_vm2, %v122_v13 }
  0xe8   :  { %1029 = vmatmul.mubr.msk.f32.vlgmr.msra.gmra.mrb[6].mxu0 %vm208_vm2, %v123_v15 }
  0xe9   :  { %1031 = vmatprep.mubr.msk.f32.mxu0 %vm208_vm2, %v199_v16  ;;  %1035 = vmatpush3.msk.msra.mxu0 %vm221_vm1, %v203_v17 }
  0xec   :  { %1032 = vmatmul.mubr.msk.f32.gmra.mrb[8].mxu0 %vm208_vm2, %v200_v18 }
  0xed   :  { %1036 = vmatprep.mubr.msk.f32.mxu0 %vm208_vm2, %v122_v13 }
  0xf0   :  { %1037 = vmatmul.mubr.msk.f32.vlgmr.msra.gmra.mrb[10].mxu0 %vm208_vm2, %v123_v15 }
  0xf1   :  { %1039 = vmatprep.mubr.msk.f32.mxu0 %vm208_vm2, %v199_v16 }
  0xf4   :  { %1040 = vmatmul.mubr.msk.f32.gmra.mrb[12].mxu0 %vm208_vm2, %v200_v18 }
 0x1b3   :  { %v1022_v20 = vpop.f32.mrb[2].mxu0 }
 0x1b4   :  { %v291_v21 = vpop.f32.mrb[3].mxu0 }
 0x1b5   :  { %v1086_v22 = vpack.c.bf16 %v1022_v20, %v291_v21 }
 0x1b7   :  { %v1025_v23 = vpop.f32.mrb[4].mxu0  ;;  %1087 = vmatprep.subr.bf16.mxu1 %v1086_v22 }
 0x1b8   :  { %v301_v24 = vpop.f32.mrb[5].mxu0  ;;  %1089 = vmatpush3.bf16.msra.mxu1 %v1086_v22 }
 0x1b9   :  { %v1094_v26 = vpack.c.bf16 %v1025_v23, %v301_v24 }
 0x1bb   :  { %v1030_v28 = vpop.f32.mrb[6].mxu0  ;;  %1047 = vmatmul.mubr.msk.f32.vlgmr.msra.gmra.mrb[2].mxu1 %vm40_vm0, %v205_v25 }
 0x1bc   :  { %v379_v29 = vpop.f32.mrb[7].mxu0  ;;  %1053 = vmatprep.mubr.msk.f32.mxu1 %vm40_vm0, %v206_v27 }
 0x1bf   :  { %v1033_v30 = vpop.f32.mrb[8].mxu0 }
 0x1c0   :  { %v389_v31 = vpop.f32.mrb[9].mxu0 }
 0x1c3   :  { %v1038_v32 = vpop.f32.mrb[10].mxu0 }
 0x1c4   :  { %v467_v33 = vpop.f32.mrb[11].mxu0 }
 0x1c5   :  { %v1090_v34 = vpack.c.bf16 %v1038_v32, %v467_v33 }
 0x1c7   :  { %v1041_v35 = vpop.f32.mrb[12].mxu0  ;;  %1091 = vmatprep.subr.bf16.mxu1 %v1090_v34 }
 0x1c8   :  { %v477_v36 = vpop.f32.mrb[13].mxu0  ;;  %1093 = vmatpush3.bf16.msra.mxu1 %v1090_v34 }
 0x1c9   :  { %v1098_v38 = vpack.c.bf16 %v1041_v35, %v477_v36  ;;  %1095 = vmatprep.subr.bf16.mxu1 %v1094_v26 }
 0x1cb   :  { %1054 = vmatmul.mubr.msk.f32.vlgmr.msra.gmra.mrb[2].mxu1 %vm40_vm0, %v207_v37 }
 0x1cc   :  { %1097 = vmatpush3.bf16.msra.mxu1 %v1094_v26  ;;  %1060 = vmatprep.mubr.msk.f32.mxu1 %vm40_vm0, %v204_v19 }
 0x1cd   :  { %1099 = vmatprep.subr.bf16.mxu1 %v1098_v38 }
 0x1cf   :  { %1061 = vmatmul.mubr.msk.f32.vlgmr.msra.gmra.mrb[4].mxu1 %vm40_vm0, %v205_v25 }
 0x1d0   :  { %1101 = vmatpush3.bf16.msra.mxu1 %v1098_v38  ;;  %1067 = vmatprep.mubr.msk.f32.mxu1 %vm40_vm0, %v206_v27 }
 0x1d1   :  { %1070 = vmatprep.subr.msk.mxu1 %vm221_vm1, %v806_v39 }
 0x1d7   :  { %1068 = vmatmul.mubr.msk.f32.vlgmr.msra.gmra.mrb[4].mxu1 %vm40_vm0, %v207_v37 }
 0x1d8   :  { %1071 = vmatpush3.msk.msra.mxu1 %vm221_vm1, %v806_v39  ;;  %1072 = vmatprep.mubr.msk.f32.mxu1 %vm208_vm2, %v802_v40 }
 0x1db   :  { %1073 = vmatmul.mubr.msk.f32.vlgmr.msra.gmra.mrb[2].mxu1 %vm208_vm2, %v803_v41 }
 0x1dc   :  { %1075 = vmatprep.mubr.msk.f32.mxu1 %vm208_vm2, %v804_v42 }
 0x1df   :  { %1076 = vmatmul.mubr.msk.f32.gmra.mrb[4].mxu1 %vm208_vm2, %v805_v43 }
 0x2ae   :  { %v1074_v44 = vpop.f32.mrb[2].mxu1 }
 0x2af   :  { %v1102_v45 = vadd.f32 %v1074_v44, %v1030_v28  ;;  %v888_v46 = vpop.f32.mrb[3].mxu1 }
 0x2b0   :  { %v1103_v47 = vadd.f32 %v888_v46, %v379_v29 }
 0x2b1   :  { %913 = vst.msk [vmem:[%s1297_s9 + $0x8] sm:$0xff] %vm911_vm3, %v1102_v45 }
 0x2b2   :  { %912 = vst.msk [vmem:[%s1297_s9] sm:$0xff] %vm911_vm3, %v1103_v47  ;;  %v1077_v48 = vpop.f32.mrb[4].mxu1 }
 0x2b3   :  { %v1104_v49 = vadd.f32 %v1077_v48, %v1033_v30  ;;  %v898_v50 = vpop.f32.mrb[5].mxu1 }
 0x2b4   :  { %v1105_v51 = vadd.f32 %v898_v50, %v389_v31 }
 0x2b5   :  { %915 = vst.msk [vmem:[%s1297_s9 + $0x18] sm:$0xff] %vm911_vm3, %v1104_v49 }
 0x2b6   :  { %914 = vst.msk [vmem:[%s1297_s9 + $0x10] sm:$0xff] %vm911_vm3, %v1105_v51 }

// kernel: autoformer_forward.6
= control target key start
LH: loop header
LB: loop body
LE: loop exit
PB: predicated region body
PF: predicated region fallthrough
CT: control target
= control target key end

     0   :  { %vm89_vm0 = vcmask 261120   ;;  %vm369_vm1 = vcmask 130048   ;;  %vm1347_vm2 = vcmask 7168   ;;  %s3431_s1 = inlined_call_operand.vmem [shape: f32[32,32], index: 1, kind: input, shape index: {}]   ;;  %s3432_s3 = inlined_call_operand.vmem [shape: f32[32,32], index: 3, kind: input, shape index: {}]   ;;  %s3433_s0 = inlined_call_operand.vmem [shape: f32[32,32], index: 0, kind: input, shape index: {}]   ;;  %s3434_s5 = inlined_call_operand.vmem [shape: f32[32,32], index: 5, kind: input, shape index: {}]   ;;  %s3435_s11 = inlined_call_operand.vmem [shape: f32[16,16], index: 11, kind: input, shape index: {}]   ;;  %s3436_s2 = inlined_call_operand.vmem [shape: f32[1,32], index: 2, kind: input, shape index: {}]   ;;  %s3437_s4 = inlined_call_operand.vmem [shape: f32[1,32], index: 4, kind: input, shape index: {}]   ;;  %s3438_s6 = inlined_call_operand.vmem [shape: f32[1,32], index: 6, kind: input, shape index: {}]   ;;  %s3439_s12 = inlined_call_operand.vmem [shape: f32[16,16], index: 12, kind: input, shape index: {}]   ;;  %s3440_s7 = inlined_call_operand.vmem [shape: f32[32,32], index: 7, kind: input, shape index: {}]   ;;  %s3441_s13 = inlined_call_operand.vmem [shape: f32[16,16], index: 13, kind: input, shape index: {}]   ;;  %s3442_s9 = inlined_call_operand.vmem [shape: f32[32,32], index: 9, kind: input, shape index: {}]   ;;  %s3443_s8 = inlined_call_operand.vmem [shape: f32[1,32], index: 8, kind: input, shape index: {}]   ;;  %s3444_s10 = inlined_call_operand.vmem [shape: f32[32,32], index: 10, kind: input, shape index: {}]   ;;  %s3445_s14 = inlined_call_operand.vmem [shape: f32[1,32], index: 14, kind: input, shape index: {}]   ;;  %s3446_s15 = inlined_call_operand.vmem [shape: f32[1,32], index: 15, kind: input, shape index: {}]   ;;  %s3447_s16 = inlined_call_operand.vmem [shape: f32[32,32], index: 16, kind: output, shape index: {}]  }
   0x1   :  { %3449 = sst [smem:[#allocation2_spill]] %s3431_s1  ;;  %v64_v2 = vld [vmem:[%s3432_s3] sm:$0xff]  ;;  %v65_v4 = vld [vmem:[%s3432_s3 + $0x8] sm:$0xff]  ;;  %v66_v9 = vld [vmem:[%s3432_s3 + $0x10] sm:$0xff] }
   0x2   :  { %s3450_s23 = sld [smem:[#allocation2_spill]]  ;;  %v2834_v7 = vpack.c.bf16 %v65_v4, %v64_v2  ;;  %v67_v10 = vld [vmem:[%s3432_s3 + $0x18] sm:$0xff]  ;;  %v3082_v11 = vld [vmem:[%s3433_s0] sm:$0xff]  ;;  %v70_v14 = vld [vmem:[%s3434_s5 + $0x8] sm:$0xff] }
   0x3   :  { %v2838_v12 = vpack.c.bf16 %v67_v10, %v66_v9  ;;  %2624 = vmatprep.mubr.msk.f32.mxu0 %vm89_vm0, %v3082_v11  ;;  %v69_v13 = vld [vmem:[%s3434_s5] sm:$0xff]  ;;  %2638 = vmatprep.mubr.msk.f32.mxu1 %vm89_vm0, %v3082_v11  ;;  %v71_v16 = vld [vmem:[%s3434_s5 + $0x10] sm:$0xff]  ;;  %v72_v17 = vld [vmem:[%s3434_s5 + $0x18] sm:$0xff] }
   0x4   :  { %2835 = vmatprep.subr.bf16.mxu1 %v2834_v7  ;;  %v2842_v15 = vpack.c.bf16 %v70_v14, %v69_v13  ;;  %v3103_v18 = vld [vmem:[%s3433_s0 + $0x8] sm:$0xff]  ;;  %v2846_v19 = vpack.c.bf16 %v72_v17, %v71_v16  ;;  %v3108_v20 = vld [vmem:[%s3433_s0 + $0x10] sm:$0xff]  ;;  %v3117_v21 = vld [vmem:[%s3433_s0 + $0x18] sm:$0xff] }
   0x5   :  { %2837 = vmatpush3.bf16.msra.mxu1 %v2834_v7  ;;  %v3138_v22 = vld [vmem:[%s3435_s11] sm:$0xff]  ;;  %v3156_v41 = vld [vmem:[%s3435_s11 + $0x8] sm:$0xff] }
   0x6   :  { %2839 = vmatprep.subr.bf16.mxu1 %v2838_v12  ;;  %v2430_v23 = vld [vmem:[%s3436_s2] ss:$0 sm:$0xff]  ;;  %v3174_v52 = vld [vmem:[%s3439_s12 + $0x8] sm:$0xff] }
   0x7   :  { %v2435_v24 = vld [vmem:[%s3437_s4] ss:$0 sm:$0xff] }
   0x8   :  { %v59_v0 = vld [vmem:[%s3450_s23] sm:$0xff]  ;;  %v60_v1 = vld [vmem:[%s3450_s23 + $0x8] sm:$0xff]  ;;  %v61_v5 = vld [vmem:[%s3450_s23 + $0x10] sm:$0xff] }
   0x9   :  { %v2826_v3 = vpack.c.bf16 %v60_v1, %v59_v0  ;;  %v62_v6 = vld [vmem:[%s3450_s23 + $0x18] sm:$0xff]  ;;  %2841 = vmatpush3.bf16.msra.mxu1 %v2838_v12  ;;  %v2440_v40 = vld [vmem:[%s3438_s6] ss:$0 sm:$0xff] }
   0xa   :  { %v2830_v8 = vpack.c.bf16 %v62_v6, %v61_v5  ;;  %v3163_v47 = vld [vmem:[%s3439_s12] sm:$0xff] }
   0xb   :  { %2827 = vmatprep.subr.bf16.mxu0 %v2826_v3 }
   0xc   :  { %2829 = vmatpush3.bf16.msra.mxu0 %v2826_v3  ;;  %2639 = vmatmul.mubr.msk.f32.vlgmr.msra.gmra.mrb[0].mxu1 %vm89_vm0, %v3103_v18 }
   0xd   :  { %2831 = vmatprep.subr.bf16.mxu0 %v2830_v8  ;;  %2641 = vmatprep.mubr.msk.f32.mxu1 %vm89_vm0, %v3108_v20 }
  0x10   :  { %2833 = vmatpush3.bf16.msra.mxu0 %v2830_v8  ;;  %2642 = vmatmul.mubr.msk.f32.gmra.mrb[2].mxu1 %vm89_vm0, %v3117_v21 }
  0x11   :  { %2843 = vmatprep.subr.bf16.mxu0 %v2842_v15  ;;  %2662 = vmatprep.mubr.msk.f32.mxu1 %vm369_vm1, %v3138_v22 }
  0x13   :  { %2625 = vmatmul.mubr.msk.f32.vlgmr.msra.gmra.mrb[0].mxu0 %vm89_vm0, %v3103_v18 }
  0x14   :  { %2845 = vmatpush3.bf16.msra.mxu0 %v2842_v15  ;;  %2627 = vmatprep.mubr.msk.f32.mxu0 %vm89_vm0, %v3108_v20 }
  0x15   :  { %2847 = vmatprep.subr.bf16.mxu0 %v2846_v19 }
  0x17   :  { %2628 = vmatmul.mubr.msk.f32.gmra.mrb[2].mxu0 %vm89_vm0, %v3117_v21 }
  0x18   :  { %2849 = vmatpush3.bf16.msra.mxu0 %v2846_v19  ;;  %2652 = vmatprep.mubr.msk.f32.mxu0 %vm89_vm0, %v3082_v11 }
  0x1b   :  { %2653 = vmatmul.mubr.msk.f32.vlgmr.msra.gmra.mrb[4].mxu0 %vm89_vm0, %v3103_v18 }
  0x1c   :  { %2655 = vmatprep.mubr.msk.f32.mxu0 %vm89_vm0, %v3108_v20 }
  0x1f   :  { %2656 = vmatmul.mubr.msk.f32.gmra.mrb[6].mxu0 %vm89_vm0, %v3117_v21 }
  0x20   :  { %2676 = vmatprep.mubr.msk.f32.mxu0 %vm369_vm1, %v3138_v22 }
  0xdf   :  { %v2640_v27 = vpop.f32.mrb[0].mxu1 }
  0xe0   :  { %v265_v29 = vadd.f32 %v2640_v27, %v2435_v24  ;;  %v259_v31 = vpop.f32.mrb[1].mxu1 }
  0xe1   :  { %v260_v32 = vadd.f32 %v2435_v24, %v259_v31 }
  0xe3   :  { %v2858_v35 = vpack.c.bf16 %v265_v29, %v260_v32  ;;  %v2643_v39 = vpop.f32.mrb[2].mxu1 }
  0xe4   :  { %v275_v42 = vadd.f32 %v2643_v39, %v2435_v24  ;;  %v269_v43 = vpop.f32.mrb[3].mxu1 }
  0xe5   :  { %2859 = vmatprep.subr.bf16.mxu0 %v2858_v35  ;;  %v270_v45 = vadd.f32 %v2435_v24, %v269_v43 }
  0xe6   :  { %v2626_v25 = vpop.f32.mrb[0].mxu0  ;;  %2861 = vmatpush3.bf16.msra.mxu0 %v2858_v35 }
  0xe7   :  { %v174_v26 = vadd.f32 %v2626_v25, %v2430_v23  ;;  %v168_v28 = vpop.f32.mrb[1].mxu0  ;;  %v3167_v50 = vpack.c.bf16 %v275_v42, %v270_v45 }
  0xe8   :  { %v169_v30 = vadd.f32 %v2430_v23, %v168_v28 }
  0xe9   :  { %2677 = vmatmul.mubr.msk.f32.vlgmr.msra.gmra.mrb[8].mxu0 %vm369_vm1, %v3156_v41 }
  0xea   :  { %v2850_v33 = vpack.c.bf16 %v174_v26, %v169_v30  ;;  %v2629_v34 = vpop.f32.mrb[2].mxu0  ;;  %2690 = vmatprep.mubr.msk.f32.mxu0 %vm369_vm1, %v3138_v22 }
  0xeb   :  { %v184_v36 = vadd.f32 %v2629_v34, %v2430_v23  ;;  %v178_v37 = vpop.f32.mrb[3].mxu0 }
  0xec   :  { %2851 = vmatprep.subr.bf16.mxu1 %v2850_v33  ;;  %v179_v38 = vadd.f32 %v2430_v23, %v178_v37 }
  0xed   :  { %2853 = vmatpush3.bf16.msra.mxu1 %v2850_v33 }
  0xee   :  { %2855 = vmatprep.subr.bf16.mxu1 %v2850_v33  ;;  %v3158_v44 = vpack.c.bf16 %v184_v36, %v179_v38  ;;  %v2654_v46 = vpop.f32.mrb[4].mxu0 }
  0xef   :  { %v356_v48 = vadd.f32 %v2654_v46, %v2440_v40  ;;  %v350_v49 = vpop.f32.mrb[5].mxu0 }
  0xf0   :  { %2663 = vmatmul.mubr.msk.f32.vlgmr.msra.gmra.mrb[4].mxu1 %vm369_vm1, %v3156_v41  ;;  %v351_v51 = vadd.f32 %v2440_v40, %v350_v49 }
  0xf1   :  { %2857 = vmatpush3.bf16.msra.mxu1 %v2850_v33  ;;  %2669 = vmatprep.mubr.msk.f32.mxu1 %vm369_vm1, %v3163_v47 }
  0xf2   :  { %2863 = vmatprep.subr.bf16.mxu1 %v2858_v35  ;;  %v3178_v53 = vpack.c.bf16 %v356_v48, %v351_v51  ;;  %v2657_v54 = vpop.f32.mrb[6].mxu0 }
  0xf3   :  { %v366_v55 = vadd.f32 %v2657_v54, %v2440_v40  ;;  %v360_v56 = vpop.f32.mrb[7].mxu0 }
  0xf4   :  { %2670 = vmatmul.mubr.msk.f32.vlgmr.msra.gmra.mrb[6].mxu1 %vm369_vm1, %v3174_v52  ;;  %v361_v57 = vadd.f32 %v2440_v40, %v360_v56 }
  0xf5   :  { %2865 = vmatpush3.bf16.msra.mxu1 %v2858_v35  ;;  %2683 = vmatprep.mubr.msk.f32.mxu1 %vm369_vm1, %v3163_v47 }
  0xf6   :  { %v3186_v58 = vpack.c.bf16 %v366_v55, %v361_v57 }
  0xf8   :  { %2684 = vmatmul.mubr.msk.f32.vlgmr.msra.gmra.mrb[8].mxu1 %vm369_vm1, %v3174_v52 }
  0xf9   :  { %2697 = vmatprep.mubr.msk.f32.mxu1 %vm369_vm1, %v3163_v47 }
 0x1bc   :  { %v2678_v60 = vpop.f32.mrb[8].mxu0 }
 0x1bd   :  { %v598_v63 = vpop.f32.mrb[9].mxu0 }
 0x1c3   :  { %v2664_v59 = vpop.f32.mrb[4].mxu1 }
 0x1c4   :  { %v442_v61 = vpop.f32.mrb[5].mxu1  ;;  %v683_v62 = vmul.f32 %v2678_v60, %v2664_v59 }
 0x1c5   :  { %v682_v0 = vmul.f32 %v598_v63, %v442_v61 }
 0x1c7   :  { %v2671_v1 = vpop.f32.mrb[6].mxu1 }
 0x1c8   :  { %v697_v2 = vmul.f32 %v2678_v60, %v2671_v1  ;;  %v523_v3 = vpop.f32.mrb[7].mxu1 }
 0x1c9   :  { %v696_v4 = vmul.f32 %v598_v63, %v523_v3 }
 0x1cb   :  { %v2685_v5 = vpop.f32.mrb[8].mxu1 }
 0x1cc   :  { %v685_v6 = vmul.f32 %v2685_v5, %v2671_v1  ;;  %v695_v7 = vmul.f32 %v2685_v5, %v2664_v59  ;;  %v673_v8 = vpop.f32.mrb[9].mxu1  ;;  %v2969_v5 = vmov 0  }
 0x1cd   :  { %v684_v9 = vmul.f32 %v673_v8, %v523_v3  ;;  %v694_v10 = vmul.f32 %v673_v8, %v442_v61  ;;  %2947 = vset.pattern.permute.xlu0 %v2969_v5  ;;  %2948 = vset.pattern.permute.xlu1 %v2969_v5 }
 0x1ce   :  { %v699_v12 = vsub.f32 %v695_v7, %v697_v2  ;;  %v687_v13 = vadd.f32 %v685_v6, %v683_v62 }
 0x1cf   :  { %v698_v14 = vsub.f32 %v694_v10, %v696_v4  ;;  %v686_v15 = vadd.f32 %v684_v9, %v682_v0 }
 0x1d0   :  { %v703_v19 = vsel %vm89_vm0, %v699_v12, 0.0  ;;  %v691_v23 = vsel %vm89_vm0, %v687_v13, 0.0 }
 0x1d1   :  { %v700_v16 = vsel %vm89_vm0, %v698_v14, 0.0  ;;  %v688_v17 = vsel %vm89_vm0, %v686_v15, 0.0 }
 0x1d2   :  { %701 = vadd.xlane.f32.xlu1 %v700_v16  ;;  %689 = vadd.xlane.f32.xlu0 %v688_v17 }
 0x1d6   :  { %704 = vadd.xlane.f32.xlu1 %v703_v19  ;;  %692 = vadd.xlane.f32.xlu0 %v691_v23  ;;  %v1342_v19 = vlaneseq }
 0x25f   :  { %v702_v24 = vpop.xlane.xlu1 %701  ;;  %v690_v25 = vpop.xlane.xlu0 %689 }
 0x263   :  { %v705_v26 = vpop.xlane.xlu1 %704  ;;  %v693_v27 = vpop.xlane.xlu0 %692 }
 0x264   :  { %v2870_v28 = vpack.c.bf16 %v705_v26, %v702_v24  ;;  %v2866_v29 = vpack.c.bf16 %v693_v27, %v690_v25  ;;  %v1343_v26 = vshrl.u32 %v1342_v19, 7 }
 0x266   :  { %2867 = vmatprep.subr.bf16.mxu0 %v2866_v29  ;;  %2871 = vmatprep.subr.bf16.mxu1 %v2870_v28 }
 0x267   :  { %2869 = vmatpush3.bf16.msra.mxu0 %v2866_v29  ;;  %2873 = vmatpush3.bf16.msra.mxu1 %v2870_v28  ;;  %v1344_v29 = vadd.s32 8, %v1343_v26 }
 0x268   :  { %2875 = vmatprep.subr.bf16.mxu0 %v3158_v44  ;;  %2879 = vmatprep.subr.bf16.mxu1 %v3158_v44 }
 0x26a   :  { %2691 = vmatmul.mubr.msk.f32.vlgmr.msra.gmra.mrb[10].mxu0 %vm369_vm1, %v3156_v41  ;;  %2698 = vmatmul.mubr.msk.f32.vlgmr.msra.gmra.mrb[10].mxu1 %vm369_vm1, %v3174_v52 }
 0x26b   :  { %2877 = vmatpush3.bf16.msra.mxu0 %v3158_v44  ;;  %2881 = vmatpush3.bf16.msra.mxu1 %v3158_v44 }
 0x26c   :  { %2883 = vmatprep.subr.bf16.mxu0 %v3167_v50  ;;  %2887 = vmatprep.subr.bf16.mxu1 %v3167_v50 }
 0x26d   :  { %2704 = vmatprep.mubr.msk.f32.mxu0 %vm369_vm1, %v3138_v22  ;;  %2711 = vmatprep.mubr.msk.f32.mxu1 %vm369_vm1, %v3163_v47 }
 0x26e   :  { %2705 = vmatmul.mubr.msk.f32.vlgmr.msra.gmra.mrb[12].mxu0 %vm369_vm1, %v3156_v41  ;;  %2712 = vmatmul.mubr.msk.f32.vlgmr.msra.gmra.mrb[12].mxu1 %vm369_vm1, %v3174_v52 }
 0x26f   :  { %2885 = vmatpush3.bf16.msra.mxu0 %v3167_v50  ;;  %2889 = vmatpush3.bf16.msra.mxu1 %v3167_v50 }
 0x270   :  { %2718 = vmatprep.mubr.msk.f32.mxu0 %vm369_vm1, %v3138_v22  ;;  %2725 = vmatprep.mubr.msk.f32.mxu1 %vm369_vm1, %v3163_v47 }
 0x272   :  { %2719 = vmatmul.mubr.msk.f32.vlgmr.msra.gmra.mrb[14].mxu0 %vm369_vm1, %v3156_v41  ;;  %2726 = vmatmul.mubr.msk.f32.vlgmr.msra.gmra.mrb[14].mxu1 %vm369_vm1, %v3174_v52 }
 0x273   :  { %2732 = vmatprep.mubr.msk.f32.mxu0 %vm369_vm1, %v3138_v22  ;;  %2739 = vmatprep.mubr.msk.f32.mxu1 %vm369_vm1, %v3163_v47 }
 0x33d   :  { %v2692_v30 = vpop.f32.mrb[10].mxu0  ;;  %v2699_v31 = vpop.f32.mrb[10].mxu1 }
 0x33e   :  { %v857_v32 = vsub.f32 %v2692_v30, %v2699_v31  ;;  %v772_v33 = vpop.f32.mrb[11].mxu0  ;;  %v847_v34 = vpop.f32.mrb[11].mxu1 }
 0x33f   :  { %v856_v35 = vsub.f32 %v772_v33, %v847_v34  ;;  %v3257_v33 = vcvt.s32.f32 %v1344_v29 }
 0x341   :  { %v2706_v36 = vpop.f32.mrb[12].mxu0  ;;  %v2713_v37 = vpop.f32.mrb[12].mxu1 }
 0x342   :  { %v926_v38 = vpop.f32.mrb[13].mxu0  ;;  %v1001_v39 = vpop.f32.mrb[13].mxu1 }
 0x345   :  { %v2720_v40 = vpop.f32.mrb[14].mxu0  ;;  %v2727_v42 = vpop.f32.mrb[14].mxu1 }
 0x346   :  { %v1161_v43 = vmul.f32 %v2720_v40, %v2706_v36  ;;  %v1175_v44 = vmul.f32 %v2720_v40, %v2713_v37  ;;  %v1163_v45 = vmul.f32 %v2727_v42, %v2713_v37  ;;  %v1173_v46 = vmul.f32 %v2727_v42, %v2706_v36  ;;  %v1076_v22 = vpop.f32.mrb[15].mxu0  ;;  %v1151_v48 = vpop.f32.mrb[15].mxu1 }
 0x347   :  { %v1160_v49 = vmul.f32 %v1076_v22, %v926_v38  ;;  %v1174_v47 = vmul.f32 %v1076_v22, %v1001_v39  ;;  %v1162_v50 = vmul.f32 %v1151_v48, %v1001_v39  ;;  %v1172_v51 = vmul.f32 %v1151_v48, %v926_v38 }
 0x348   :  { %v1165_v54 = vadd.f32 %v1163_v45, %v1161_v43  ;;  %v1177_v55 = vsub.f32 %v1173_v46, %v1175_v44 }
 0x349   :  { %v1164_v56 = vadd.f32 %v1162_v50, %v1160_v49  ;;  %v1176_v57 = vsub.f32 %v1172_v51, %v1174_v47 }
 0x34a   :  { %v1169_v59 = vsel %vm89_vm0, %v1165_v54, 0.0  ;;  %v1181_v61 = vsel %vm89_vm0, %v1177_v55, 0.0 }
 0x34b   :  { %1170 = vadd.xlane.f32.xlu1 %v1169_v59  ;;  %v1166_v60 = vsel %vm89_vm0, %v1164_v56, 0.0  ;;  %v1178_v62 = vsel %vm89_vm0, %v1176_v57, 0.0 }
 0x34c   :  { %1167 = vadd.xlane.f32.xlu0 %v1166_v60 }
 0x34f   :  { %1182 = vadd.xlane.f32.xlu1 %v1181_v61 }
 0x350   :  { %1179 = vadd.xlane.f32.xlu0 %v1178_v62 }
 0x3d8   :  { %v1171_v63 = vpop.xlane.xlu1 %1170 }
 0x3d9   :  { %v1168_v0 = vpop.xlane.xlu0 %1167 }
 0x3da   :  { %v2890_v1 = vpack.c.bf16 %v1171_v63, %v1168_v0 }
 0x3dc   :  { %v1183_v2 = vpop.xlane.xlu1 %1182  ;;  %2891 = vmatprep.subr.bf16.mxu0 %v2890_v1 }
 0x3dd   :  { %2893 = vmatpush3.bf16.msra.mxu0 %v2890_v1  ;;  %v1180_v3 = vpop.xlane.xlu0 %1179 }
 0x3de   :  { %v2894_v4 = vpack.c.bf16 %v1183_v2, %v1180_v3  ;;  %2899 = vmatprep.subr.bf16.mxu0 %v3178_v53 }
 0x3e0   :  { %2895 = vmatprep.subr.bf16.mxu1 %v2894_v4  ;;  %2733 = vmatmul.mubr.msk.f32.vlgmr.msra.gmra.mrb[16].mxu0 %vm369_vm1, %v3156_v41  ;;  %v3240_v41 = vmul.f32 0.001953125, %v857_v32  ;;  %v3255_v32 = vcvt.s32.f32 %v1343_v26 }
 0x3e1   :  { %2897 = vmatpush3.bf16.msra.mxu1 %v2894_v4  ;;  %2901 = vmatpush3.bf16.msra.mxu0 %v3178_v53  ;;  %v3244_v53 = vmul.f32 0.001953125, %v856_v35 }
 0x3e2   :  { %2903 = vmatprep.subr.bf16.mxu1 %v3186_v58 }
 0x3e4   :  { %2740 = vmatmul.mubr.msk.f32.vlgmr.msra.gmra.mrb[16].mxu1 %vm369_vm1, %v3174_v52 }
 0x3e5   :  { %2905 = vmatpush3.bf16.msra.mxu1 %v3186_v58 }
 0x4b3   :  { %v2734_v6 = vpop.f32.mrb[16].mxu0 }
 0x4b4   :  { %v1250_v7 = vpop.f32.mrb[17].mxu0 }
 0x4b7   :  { %v2741_v8 = vpop.f32.mrb[16].mxu1 }
 0x4b8   :  { %v1335_v9 = vsub.f32 %v2734_v6, %v2741_v8  ;;  %v1325_v10 = vpop.f32.mrb[17].mxu1 }
 0x4b9   :  { %v1334_v12 = vsub.f32 %v1250_v7, %v1325_v10 }
 0x4ba   :  { %v3242_v13 = vmul.f32 0.001953125, %v1335_v9 }
 0x4bb   :  { %v3246_v14 = vmul.f32 0.001953125, %v1334_v12 }
 0x4bc   :  { %v1339_v52 = vadd.f32 %v3242_v13, %v3240_v41 }
 0x4bd   :  { %v1338_v58 = vadd.f32 %v3246_v14, %v3244_v53 }
 0x4be   :  { %v1341_v15 = vmul.f32 0.5, %v1339_v52 }
 0x4bf   :  { %v1340_v16 = vmul.f32 0.5, %v1338_v58 }
 0x4c0   :  { %v1349_v17 = vsel %vm1347_vm2, %v1341_v15, -inf }
 0x4c1   :  { %v1348_v23 = vsel %vm1347_vm2, %v1340_v16, -inf }
 0x4c2   :  { %v1350_v24 = vmax.f32 %v1348_v23, %v1349_v17 }
 0x4c4   :  { %v1351_v25 = vrot.slane %v1350_v24, 4 }
 0x4c6   :  { %v1352_v27 = vmax.f32 %v1350_v24, %v1351_v25 }
 0x4c8   :  { %v1353_v28 = vrot.slane %v1352_v27, 2 }
 0x4ca   :  { %v1354_v30 = vmax.f32 %v1352_v27, %v1353_v28 }
 0x4cc   :  { %v1355_v31 = vrot.slane %v1354_v30, 1 }
 0x4ce   :  { %v1356_v34 = vmax.f32 %v1354_v30, %v1355_v31 }
 0x4d0   :  { %vm1357_vm3 = vcmp.ge.f32.partialorder %v1340_v16, %v1356_v34  ;;  %vm1358_vm4 = vcmp.ge.f32.partialorder %v1341_v15, %v1356_v34 }
 0x4d1   :  { %v1359_v35 = vsel %vm1357_vm3, %v3255_v32, 16.0  ;;  %v1360_v36 = vsel %vm1358_vm4, %v3257_v33, 16.0 }
 0x4d2   :  { %v1361_v37 = vsel %vm1347_vm2, %v1359_v35, inf  ;;  %v1362_v38 = vsel %vm1347_vm2, %v1360_v36, inf }
 0x4d3   :  { %v1363_v39 = vmin.f32 %v1361_v37, %v1362_v38 }
 0x4d5   :  { %v1364_v40 = vrot.slane %v1363_v39, 4 }
 0x4d7   :  { %v1365_v42 = vmin.f32 %v1363_v39, %v1364_v40 }
 0x4d9   :  { %v1366_v43 = vrot.slane %v1365_v42, 2 }
 0x4db   :  { %v1367_v44 = vmin.f32 %v1365_v42, %v1366_v43 }
 0x4dd   :  { %v1368_v45 = vrot.slane %v1367_v44, 1 }
 0x4df   :  { %v1369_v46 = vmin.f32 %v1367_v44, %v1368_v45 }
 0x4e1   :  { %1441 = vperm.xlu0 %2947, %v1369_v46   ;;  %vm1370_vm5 = vcmp.eq.f32.partialorder %v3255_v32, %v1369_v46  ;;  %vm1371_vm6 = vcmp.eq.f32.partialorder %v3257_v33, %v1369_v46 }
 0x4e2   :  { %v1372_v22 = vsel %vm1370_vm5, -1e+30, %v1340_v16  ;;  %v1373_v48 = vsel %vm1371_vm6, -1e+30, %v1341_v15  ;;  %v1407_v60 = vsel %vm1370_vm5, %v3244_v53, 0.0  ;;  %v1408_v61 = vsel %vm1371_vm6, %v3240_v41, 0.0 }
 0x4e3   :  { %v1374_v49 = vsel %vm1347_vm2, %v1372_v22, -inf  ;;  %v1375_v47 = vsel %vm1347_vm2, %v1373_v48, -inf  ;;  %v1555_v0 = vsel %vm1370_vm5, %v3246_v14, 0.0  ;;  %v1556_v1 = vsel %vm1371_vm6, %v3242_v13, 0.0 }
 0x4e4   :  { %v1376_v50 = vmax.f32 %v1374_v49, %v1375_v47  ;;  %v1409_v5 = vsel %vm1347_vm2, %v1407_v60, 0.0  ;;  %v1410_v6 = vsel %vm1347_vm2, %v1408_v61, 0.0  ;;  %v1557_v7 = vsel %vm1347_vm2, %v1555_v0, 0.0 }
 0x4e5   :  { %v1558_v8 = vsel %vm1347_vm2, %v1556_v1, 0.0  ;;  %v1411_v12 = vadd.f32 %v1410_v6, %v1409_v5 }
 0x4e6   :  { %v1377_v51 = vrot.slane %v1376_v50, 4  ;;  %v1559_v52 = vadd.f32 %v1558_v8, %v1557_v7 }
 0x4e7   :  { %v1412_v16 = vrot.slane %v1411_v12, 4 }
 0x4e8   :  { %v1378_v54 = vmax.f32 %v1376_v50, %v1377_v51  ;;  %v1560_v17 = vrot.slane %v1559_v52, 4 }
 0x4e9   :  { %v1413_v25 = vadd.f32 %v1412_v16, %v1411_v12 }
 0x4ea   :  { %v1379_v55 = vrot.slane %v1378_v54, 2  ;;  %v1561_v26 = vadd.f32 %v1560_v17, %v1559_v52  ;;  %v74_v17 = vld [vmem:[%s3440_s7] sm:$0xff] }
 0x4eb   :  { %v1414_v37 = vrot.slane %v1413_v25, 2 }
 0x4ec   :  { %v1380_v56 = vmax.f32 %v1378_v54, %v1379_v55  ;;  %v1562_v38 = vrot.slane %v1561_v26, 2 }
 0x4ed   :  { %v1415_v43 = vadd.f32 %v1414_v37, %v1413_v25  ;;  %v1397_v25 = vand.u32 127, %v1342_v19  ;;  %v76_v19 = vld [vmem:[%s3440_s7 + $0x10] sm:$0xff] }
 0x4ee   :  { %v1381_v57 = vrot.slane %v1380_v56, 1 }
 0x4ef   :  { %v1416_v46 = vrot.slane %v1415_v43, 1 }
 0x4f0   :  { %v1382_v59 = vmax.f32 %v1380_v56, %v1381_v57 }
 0x4f1   :  { %v1417_v55 = vadd.f32 %v1416_v46, %v1415_v43 }
 0x4f2   :  { %vm1383_vm7 = vcmp.ge.f32.partialorder %v1372_v22, %v1382_v59  ;;  %vm1384_vm8 = vcmp.ge.f32.partialorder %v1373_v48, %v1382_v59 }
 0x4f3   :  { %v1385_v62 = vsel %vm1383_vm7, %v3255_v32, 16.0  ;;  %v1386_v63 = vsel %vm1384_vm8, %v3257_v33, 16.0 }
 0x4f4   :  { %v1387_v2 = vsel %vm1347_vm2, %v1385_v62, inf  ;;  %v1388_v3 = vsel %vm1347_vm2, %v1386_v63, inf }
 0x4f5   :  { %v1389_v4 = vmin.f32 %v1387_v2, %v1388_v3 }
 0x4f7   :  { %v1390_v9 = vrot.slane %v1389_v4, 4 }
 0x4f9   :  { %v1391_v10 = vmin.f32 %v1389_v4, %v1390_v9 }
 0x4fb   :  { %v1392_v58 = vrot.slane %v1391_v10, 2 }
 0x4fd   :  { %v1393_v15 = vmin.f32 %v1391_v10, %v1392_v58 }
 0x4ff   :  { %v1394_v23 = vrot.slane %v1393_v15, 1 }
 0x501   :  { %v1395_v24 = vmin.f32 %v1393_v15, %v1394_v23  ;;  %v75_v23 = vld [vmem:[%s3440_s7 + $0x8] sm:$0xff] }
 0x503   :  { %1459 = vperm.xlu1 %2948, %v1395_v24   ;;  %vm1418_vm9 = vcmp.eq.f32.partialorder %v3255_v32, %v1395_v24  ;;  %vm1419_vm10 = vcmp.eq.f32.partialorder %v3257_v33, %v1395_v24  ;;  %v2906_v24 = vpack.c.bf16 %v75_v23, %v74_v17 }
 0x504   :  { %v1420_v27 = vsel %vm1418_vm9, %v3244_v53, 0.0  ;;  %v1421_v28 = vsel %vm1419_vm10, %v3240_v41, 0.0  ;;  %v1566_v29 = vsel %vm1418_vm9, %v3246_v14, 0.0  ;;  %v1567_v30 = vsel %vm1419_vm10, %v3242_v13, 0.0 }
 0x505   :  { %v1422_v31 = vsel %vm1347_vm2, %v1420_v27, 0.0  ;;  %v1423_v34 = vsel %vm1347_vm2, %v1421_v28, 0.0  ;;  %v1568_v35 = vsel %vm1347_vm2, %v1566_v29, 0.0  ;;  %v1569_v36 = vsel %vm1347_vm2, %v1567_v30, 0.0  ;;  %2907 = vmatprep.subr.bf16.mxu0 %v2906_v24 }
 0x506   :  { %v1424_v39 = vadd.f32 %v1423_v34, %v1422_v31  ;;  %v1570_v40 = vadd.f32 %v1569_v36, %v1568_v35  ;;  %v1563_v41 = vadd.f32 %v1562_v38, %v1561_v26  ;;  %v1398_v26 = vcvt.s32.f32 %v1397_v25 }
 0x508   :  { %v1425_v42 = vrot.slane %v1424_v39, 4  ;;  %v1571_v53 = vrot.slane %v1570_v40, 4  ;;  %v1564_v22 = vrot.slane %v1563_v41, 1  ;;  %v1399_v27 = vsub.f32 %v1398_v26, %v3255_v32  ;;  %v77_v32 = vld [vmem:[%s3440_s7 + $0x18] sm:$0xff] }
 0x509   :  { %v1400_v28 = vsub.f32 %v1398_v26, %v3257_v33 }
 0x50a   :  { %v1426_v44 = vadd.f32 %v1425_v42, %v1424_v39  ;;  %v1572_v14 = vadd.f32 %v1571_v53, %v1570_v40  ;;  %v1565_v56 = vadd.f32 %v1564_v22, %v1563_v41  ;;  %v1403_v30 = vadd.f32 16.0, %v1399_v27 }
 0x50b   :  { %v1404_v31 = vadd.f32 16.0, %v1400_v28  ;;  %vm1401_vm11 = vcmp.lt.f32.partialorder %v1399_v27, 0.0  ;;  %vm1402_vm12 = vcmp.lt.f32.partialorder %v1400_v28, 0.0  ;;  %v2910_v41 = vpack.c.bf16 %v77_v32, %v76_v19 }
 0x50c   :  { %v1427_v45 = vrot.slane %v1426_v44, 2  ;;  %v1573_v13 = vrot.slane %v1572_v14, 2  ;;  %v1405_v35 = vsel %vm1401_vm11, %v1403_v30, %v1399_v27 }
 0x50d   :  { %v1406_v36 = vsel %vm1402_vm12, %v1404_v31, %v1400_v28  ;;  %v1964_v28 = vld [vmem:[%s3444_s10 + $0x10] sm:$0xff] }
 0x50e   :  { %v1428_v48 = vadd.f32 %v1427_v45, %v1426_v44  ;;  %v1574_v49 = vadd.f32 %v1573_v13, %v1572_v14 }
 0x510   :  { %v1429_v47 = vrot.slane %v1428_v48, 1  ;;  %v1575_v50 = vrot.slane %v1574_v49, 1 }
 0x512   :  { %v1430_v51 = vadd.f32 %v1429_v47, %v1428_v48  ;;  %v1576_v54 = vadd.f32 %v1575_v50, %v1574_v49 }
 0x514   :  { %v1431_v57 = vmax.f32 %v1417_v55, %v1430_v51  ;;  %v1577_v59 = vmax.f32 %v1565_v56, %v1576_v54 }
 0x516   :  { %v1432_v60 = vsub.f32 %v1417_v55, %v1431_v57  ;;  %v1435_v61 = vsub.f32 %v1430_v51, %v1431_v57  ;;  %v1578_v62 = vsub.f32 %v1565_v56, %v1577_v59  ;;  %v1581_v63 = vsub.f32 %v1576_v54, %v1577_v59  ;;  %v3335_v55 = vld [vmem:[%s3441_s13] sm:$0xff]  ;;  %v1959_v57 = vld [vmem:[%s3442_s9 + $0x8] sm:$0xff] }
 0x517   :  { %v1958_v56 = vld [vmem:[%s3442_s9] sm:$0xff] }
 0x518   :  { %v1433_v0 = vmul.f32 1.442695, %v1432_v60  ;;  %v1436_v1 = vmul.f32 1.442695, %v1435_v61  ;;  %v1579_v2 = vmul.f32 1.442695, %v1578_v62  ;;  %v2922_v59 = vpack.c.bf16 %v1959_v57, %v1958_v56 }
 0x519   :  { %v1582_v3 = vmul.f32 1.442695, %v1581_v63  ;;  %v2477_v60 = vld [vmem:[%s3443_s8] ss:$0 sm:$0xff] }
 0x51a   :  { %2949 = vpow2.f32 %v1433_v0 }
 0x51b   :  { %2951 = vpow2.f32 %v1436_v1 }
 0x51c   :  { %2953 = vpow2.f32 %v1579_v2 }
 0x51d   :  { %2955 = vpow2.f32 %v1582_v3 }
 0x524   :  { %v2950_v4 = vpop.eup %2949 }
 0x525   :  { %v2952_v5 = vpop.eup %2951 }
 0x526   :  { %v2954_v6 = vpop.eup %2953  ;;  %v1438_v7 = vadd.f32 %v2952_v5, %v2950_v4 }
 0x527   :  { %v2956_v8 = vpop.eup %2955 }
 0x528   :  { %2957 = vrcp.f32 %v1438_v7  ;;  %v1584_v9 = vadd.f32 %v2956_v8, %v2954_v6  ;;  %v3354_v7 = vld [vmem:[%s3441_s13 + $0x8] sm:$0xff] }
 0x52a   :  { %2959 = vrcp.f32 %v1584_v9 }
 0x532   :  { %v2958_v10 = vpop.eup %2957 }
 0x533   :  { %v1447_v12 = vmul.f32 %v2958_v10, %v2950_v4  ;;  %v1464_v52 = vmul.f32 %v2958_v10, %v2952_v5 }
 0x534   :  { %v2960_v58 = vpop.eup %2959 }
 0x535   :  { %1450 = vperm.xlu1 %2948, %v1447_v12   ;;  %v1586_v15 = vmul.f32 %v2960_v58, %v2954_v6  ;;  %v1596_v16 = vmul.f32 %v2960_v58, %v2956_v8  ;;  %v1962_v12 = vld [vmem:[%s3444_s10] sm:$0xff] }
 0x539   :  { %1467 = vperm.xlu1 %2948, %v1464_v52   ;;  %v1963_v52 = vld [vmem:[%s3444_s10 + $0x8] sm:$0xff] }
 0x53a   :  { %v2930_v58 = vpack.c.bf16 %v1963_v52, %v1962_v12 }
 0x53d   :  { %1589 = vperm.xlu1 %2948, %v1586_v15  }
 0x541   :  { %1599 = vperm.xlu1 %2948, %v1596_v16  }
 0x560   :  { %v1442_v37 = vpop.permute.xlu0 %1441 }
 0x561   :  { %vm1444_vm13 = vcmp.eq.f32.partialorder %v1405_v35, %v1442_v37  ;;  %vm1445_vm14 = vcmp.eq.f32.partialorder %v1406_v36, %v1442_v37 }
 0x582   :  { %v1460_v29 = vpop.permute.xlu1 %1459 }
 0x583   :  { %vm1462_vm15 = vcmp.eq.f32.partialorder %v1405_v35, %v1460_v29  ;;  %vm1463_vm2 = vcmp.eq.f32.partialorder %v1406_v36, %v1460_v29  ;;  %v1965_v29 = vld [vmem:[%s3444_s10 + $0x18] sm:$0xff] }
 0x584   :  { %v2934_v30 = vpack.c.bf16 %v1965_v29, %v1964_v28  ;;  %v2494_v29 = vld [vmem:[%s3445_s14] ss:$0 sm:$0xff] }
 0x5b4   :  { %v1451_v34 = vpop.permute.xlu1 %1450 }
 0x5b5   :  { %v1453_v33 = vsel %vm1444_vm13, %v1451_v34, 0.0  ;;  %v1454_v39 = vsel %vm1445_vm14, %v1451_v34, 0.0 }
 0x5b8   :  { %v1468_v38 = vpop.permute.xlu1 %1467 }
 0x5b9   :  { %v1470_v40 = vsel %vm1462_vm15, %v1468_v38, 0.0  ;;  %v1471_v42 = vsel %vm1463_vm2, %v1468_v38, 0.0 }
 0x5ba   :  { %v1472_v53 = vadd.f32 %v1470_v40, %v1453_v33  ;;  %v1473_v43 = vadd.f32 %v1471_v42, %v1454_v39 }
 0x5bc   :  { %2746 = vmatprep.mubr.msk.f32.mxu0 %vm369_vm1, %v1472_v53  ;;  %v1590_v44 = vpop.permute.xlu1 %1589 }
 0x5bd   :  { %2747 = vmatmul.mubr.msk.f32.vlgmr.msra.gmra.mrb[18].mxu0 %vm369_vm1, %v1473_v43  ;;  %v1592_v45 = vsel %vm1444_vm13, %v1590_v44, 0.0  ;;  %v1593_v13 = vsel %vm1445_vm14, %v1590_v44, 0.0 }
 0x5be   :  { %2909 = vmatpush3.bf16.msra.mxu0 %v2906_v24 }
 0x5bf   :  { %2911 = vmatprep.subr.bf16.mxu0 %v2910_v41 }
 0x5c0   :  { %v1600_v14 = vpop.permute.xlu1 %1599 }
 0x5c1   :  { %v1602_v46 = vsel %vm1462_vm15, %v1600_v14, 0.0  ;;  %v1603_v22 = vsel %vm1463_vm2, %v1600_v14, 0.0 }
 0x5c2   :  { %v1604_v48 = vadd.f32 %v1602_v46, %v1592_v45  ;;  %v1605_v49 = vadd.f32 %v1603_v22, %v1593_v13  ;;  %2913 = vmatpush3.bf16.msra.mxu0 %v2910_v41 }
 0x5c3   :  { %2923 = vmatprep.subr.bf16.mxu0 %v2922_v59 }
 0x5c4   :  { %2753 = vmatprep.mubr.msk.f32.mxu1 %vm369_vm1, %v1604_v48 }
 0x5c5   :  { %2754 = vmatmul.mubr.msk.f32.vlgmr.msra.gmra.mrb[18].mxu1 %vm369_vm1, %v1605_v49 }
 0x5c6   :  { %2774 = vmatprep.mubr.msk.f32.mxu1 %vm369_vm1, %v3335_v55 }
 0x690   :  { %v2748_v47 = vpop.f32.mrb[18].mxu0 }
 0x691   :  { %v1546_v50 = vpop.f32.mrb[19].mxu0 }
 0x692   :  { %2764 = vmatprep.mubr.msk.f32.mxu0 %vm89_vm0, %v1546_v50 }
 0x693   :  { %2765 = vmatmul.mubr.msk.f32.vlgmr.msra.gmra.mrb[20].mxu0 %vm89_vm0, %v2748_v47 }
 0x694   :  { %2925 = vmatpush3.bf16.msra.mxu0 %v2922_v59 }
 0x698   :  { %v2755_v51 = vpop.f32.mrb[18].mxu1 }
 0x699   :  { %v1678_v54 = vpop.f32.mrb[19].mxu1 }
 0x69a   :  { %2767 = vmatprep.mubr.msk.f32.mxu0 %vm89_vm0, %v1678_v54 }
 0x69b   :  { %2768 = vmatmul.mubr.msk.f32.gmra.mrb[22].mxu0 %vm89_vm0, %v2755_v51 }
 0x766   :  { %v2766_v61 = vpop.f32.mrb[20].mxu0 }
 0x767   :  { %v1785_v62 = vadd.f32 %v2766_v61, %v3103_v18  ;;  %v1765_v63 = vpop.f32.mrb[21].mxu0 }
 0x768   :  { %v1784_v0 = vadd.f32 %v1765_v63, %v3082_v11 }
 0x769   :  { %v1795_v1 = vadd.f32 %v2477_v60, %v1785_v62 }
 0x76a   :  { %v1794_v2 = vadd.f32 %v2477_v60, %v1784_v0 }
 0x76c   :  { %v2914_v3 = vpack.c.bf16 %v1795_v1, %v1794_v2 }
 0x76e   :  { %v2769_v4 = vpop.f32.mrb[22].mxu0  ;;  %2915 = vmatprep.subr.bf16.mxu1 %v2914_v3 }
 0x76f   :  { %v1787_v5 = vadd.f32 %v2769_v4, %v3117_v21  ;;  %v1775_v6 = vpop.f32.mrb[23].mxu0  ;;  %2917 = vmatpush3.bf16.msra.mxu1 %v2914_v3  ;;  %v1960_v21 = vld [vmem:[%s3442_s9 + $0x10] sm:$0xff] }
 0x770   :  { %v1786_v8 = vadd.f32 %v1775_v6, %v3108_v20  ;;  %v1961_v20 = vld [vmem:[%s3442_s9 + $0x18] sm:$0xff] }
 0x771   :  { %v1797_v18 = vadd.f32 %v2477_v60, %v1787_v5  ;;  %v2926_v10 = vpack.c.bf16 %v1961_v20, %v1960_v21 }
 0x772   :  { %v1796_v9 = vadd.f32 %v2477_v60, %v1786_v8  ;;  %2775 = vmatmul.mubr.msk.f32.vlgmr.msra.gmra.mrb[20].mxu1 %vm369_vm1, %v3354_v7 }
 0x773   :  { %2781 = vmatprep.mubr.msk.f32.mxu1 %vm369_vm1, %v3335_v55  ;;  %2927 = vmatprep.subr.bf16.mxu0 %v2926_v10 }
 0x774   :  { %v2918_v11 = vpack.c.bf16 %v1797_v18, %v1796_v9  ;;  %2929 = vmatpush3.bf16.msra.mxu0 %v2926_v10 }
 0x776   :  { %2919 = vmatprep.subr.bf16.mxu1 %v2918_v11 }
 0x777   :  { %2921 = vmatpush3.bf16.msra.mxu1 %v2918_v11 }
 0x778   :  { %2931 = vmatprep.subr.bf16.mxu1 %v2930_v58 }
 0x77a   :  { %2782 = vmatmul.mubr.msk.f32.vlgmr.msra.gmra.mrb[22].mxu1 %vm369_vm1, %v3354_v7 }
 0x77b   :  { %2933 = vmatpush3.bf16.msra.mxu1 %v2930_v58 }
 0x77c   :  { %2935 = vmatprep.subr.bf16.mxu1 %v2934_v30 }
 0x77f   :  { %2937 = vmatpush3.bf16.msra.mxu1 %v2934_v30 }
 0x845   :  { %v2776_v15 = vpop.f32.mrb[20].mxu1 }
 0x846   :  { %v1870_v16 = vpop.f32.mrb[21].mxu1  ;;  %v1880_v23 = vsub.f32 %v1795_v1, %v2776_v15 }
 0x847   :  { %v1879_v17 = vsub.f32 %v1794_v2, %v1870_v16 }
 0x849   :  { %2792 = vmatprep.mubr.msk.f32.mxu0 %vm89_vm0, %v1879_v17 }
 0x84a   :  { %2793 = vmatmul.mubr.msk.f32.vlgmr.msra.gmra.mrb[24].mxu0 %vm89_vm0, %v1880_v23 }
 0x84d   :  { %v2783_v24 = vpop.f32.mrb[22].mxu1 }
 0x84e   :  { %v1947_v25 = vpop.f32.mrb[23].mxu1  ;;  %v1957_v27 = vsub.f32 %v1797_v18, %v2783_v24 }
 0x84f   :  { %v1956_v26 = vsub.f32 %v1796_v9, %v1947_v25 }
 0x851   :  { %2795 = vmatprep.mubr.msk.f32.mxu0 %vm89_vm0, %v1956_v26 }
 0x852   :  { %2796 = vmatmul.mubr.msk.f32.gmra.mrb[26].mxu0 %vm89_vm0, %v1957_v27 }
 0x853   :  { %2816 = vmatprep.mubr.msk.f32.mxu0 %vm369_vm1, %v3335_v55 }
 0x91d   :  { %v2794_v31 = vpop.f32.mrb[24].mxu0 }
 0x91e   :  { %v2044_v34 = vpop.f32.mrb[25].mxu0  ;;  %v2064_v36 = vmax.f32 %v2794_v31, 0.0 }
 0x91f   :  { %v2063_v35 = vmax.f32 %v2044_v34, 0.0 }
 0x921   :  { %2806 = vmatprep.mubr.msk.f32.mxu1 %vm89_vm0, %v2063_v35  ;;  %v2495_v35 = vld [vmem:[%s3446_s15] ss:$0 sm:$0xff] }
 0x922   :  { %2807 = vmatmul.mubr.msk.f32.vlgmr.msra.gmra.mrb[24].mxu1 %vm89_vm0, %v2064_v36 }
 0x925   :  { %v2797_v37 = vpop.f32.mrb[26].mxu0 }
 0x926   :  { %v2054_v38 = vpop.f32.mrb[27].mxu0  ;;  %v2066_v32 = vmax.f32 %v2797_v37, 0.0 }
 0x927   :  { %v2065_v19 = vmax.f32 %v2054_v38, 0.0 }
 0x929   :  { %2809 = vmatprep.mubr.msk.f32.mxu1 %vm89_vm0, %v2065_v19 }
 0x92a   :  { %2810 = vmatmul.mubr.msk.f32.gmra.mrb[26].mxu1 %vm89_vm0, %v2066_v32 }
 0x92b   :  { %2823 = vmatprep.mubr.msk.f32.mxu1 %vm369_vm1, %v3335_v55 }
 0x9f5   :  { %v2808_v33 = vpop.f32.mrb[24].mxu1 }
 0x9f6   :  { %v2165_v39 = vadd.f32 %v2808_v33, %v1880_v23  ;;  %v2145_v40 = vpop.f32.mrb[25].mxu1 }
 0x9f7   :  { %v2164_v42 = vadd.f32 %v2145_v40, %v1879_v17 }
 0x9f9   :  { %v2938_v53 = vpack.c.bf16 %v2165_v39, %v2164_v42 }
 0x9fb   :  { %2939 = vmatprep.subr.bf16.mxu0 %v2938_v53 }
 0x9fc   :  { %2941 = vmatpush3.bf16.msra.mxu0 %v2938_v53 }
 0x9fd   :  { %v2811_v43 = vpop.f32.mrb[26].mxu1 }
 0x9fe   :  { %v2167_v41 = vadd.f32 %v2811_v43, %v1957_v27  ;;  %v2155_v44 = vpop.f32.mrb[27].mxu1 }
 0x9ff   :  { %v2166_v14 = vadd.f32 %v2155_v44, %v1956_v26  ;;  %2817 = vmatmul.mubr.msk.f32.vlgmr.msra.gmra.mrb[28].mxu0 %vm369_vm1, %v3354_v7 }
 0xa01   :  { %v2942_v45 = vpack.c.bf16 %v2167_v41, %v2166_v14 }
 0xa03   :  { %2943 = vmatprep.subr.bf16.mxu1 %v2942_v45 }
 0xa04   :  { %2945 = vmatpush3.bf16.msra.mxu1 %v2942_v45 }
 0xa07   :  { %2824 = vmatmul.mubr.msk.f32.vlgmr.msra.gmra.mrb[28].mxu1 %vm369_vm1, %v3354_v7 }
 0xad2   :  { %v2818_v13 = vpop.f32.mrb[28].mxu0 }
 0xad3   :  { %v2244_v46 = vsub.f32 %v2165_v39, %v2818_v13  ;;  %v2234_v22 = vpop.f32.mrb[29].mxu0 }
 0xad4   :  { %v2243_v48 = vsub.f32 %v2164_v42, %v2234_v22 }
 0xad5   :  { %v2327_v49 = vsel %vm89_vm0, %v2244_v46, 0.0 }
 0xad6   :  { %2328 = vadd.xlane.f32.xlu0 %v2327_v49  ;;  %v2324_v47 = vsel %vm89_vm0, %v2243_v48, 0.0 }
 0xad7   :  { %2325 = vadd.xlane.f32.xlu1 %v2324_v47 }
 0xada   :  { %v2825_v50 = vpop.f32.mrb[28].mxu1 }
 0xadb   :  { %v2311_v51 = vpop.f32.mrb[29].mxu1  ;;  %v2321_v55 = vsub.f32 %v2167_v41, %v2825_v50 }
 0xadc   :  { %v2320_v54 = vsub.f32 %v2166_v14, %v2311_v51 }
 0xadd   :  { %v2333_v57 = vsel %vm89_vm0, %v2321_v55, 0.0 }
 0xade   :  { %v2330_v56 = vsel %vm89_vm0, %v2320_v54, 0.0 }
 0xadf   :  { %2331 = vadd.xlane.f32.xlu1 %v2330_v56 }
 0xae3   :  { %2334 = vadd.xlane.f32.xlu1 %v2333_v57 }
 0xb63   :  { %v2329_v59 = vpop.xlane.xlu0 %2328 }
 0xb64   :  { %v2338_v60 = vmul.f32 0.03125, %v2329_v59  ;;  %v2326_v61 = vpop.xlane.xlu1 %2325 }
 0xb65   :  { %v2337_v62 = vmul.f32 0.03125, %v2326_v61 }
 0xb66   :  { %v2342_v63 = vsub.f32 %v2244_v46, %v2338_v60 }
 0xb67   :  { %v2341_v0 = vsub.f32 %v2243_v48, %v2337_v62 }
 0xb68   :  { %v2346_v1 = vmul.f32 %v2342_v63, %v2342_v63 }
 0xb69   :  { %v2345_v2 = vmul.f32 %v2341_v0, %v2341_v0 }
 0xb6a   :  { %v2352_v3 = vsel %vm89_vm0, %v2346_v1, 0.0 }
 0xb6b   :  { %2353 = vadd.xlane.f32.xlu1 %v2352_v3  ;;  %v2349_v4 = vsel %vm89_vm0, %v2345_v2, 0.0 }
 0xb6c   :  { %2350 = vadd.xlane.f32.xlu0 %v2349_v4  ;;  %v2332_v5 = vpop.xlane.xlu1 %2331 }
 0xb6d   :  { %v2339_v6 = vmul.f32 0.03125, %v2332_v5 }
 0xb6f   :  { %v2343_v7 = vsub.f32 %v2320_v54, %v2339_v6 }
 0xb70   :  { %v2335_v8 = vpop.xlane.xlu1 %2334 }
 0xb71   :  { %v2340_v18 = vmul.f32 0.03125, %v2335_v8  ;;  %v2347_v9 = vmul.f32 %v2343_v7, %v2343_v7 }
 0xb73   :  { %v2344_v11 = vsub.f32 %v2321_v55, %v2340_v18  ;;  %v2355_v21 = vsel %vm89_vm0, %v2347_v9, 0.0 }
 0xb74   :  { %2356 = vadd.xlane.f32.xlu0 %v2355_v21 }
 0xb75   :  { %v2348_v20 = vmul.f32 %v2344_v11, %v2344_v11 }
 0xb77   :  { %v2358_v10 = vsel %vm89_vm0, %v2348_v20, 0.0 }
 0xb78   :  { %2359 = vadd.xlane.f32.xlu1 %v2358_v10 }
 0xbf8   :  { %v2354_v12 = vpop.xlane.xlu1 %2353 }
 0xbf9   :  { %v2362_v52 = vmul.f32 0.03125, %v2354_v12  ;;  %v2351_v58 = vpop.xlane.xlu0 %2350 }
 0xbfa   :  { %v2361_v15 = vmul.f32 0.03125, %v2351_v58 }
 0xbfb   :  { %v2366_v16 = vadd.f32 1e-05, %v2362_v52 }
 0xbfc   :  { %v2365_v17 = vadd.f32 1e-05, %v2361_v15 }
 0xbfd   :  { %2961 = vrsqrt.f32 %v2366_v16 }
 0xbfe   :  { %2963 = vrsqrt.f32 %v2365_v17 }
 0xc01   :  { %v2357_v23 = vpop.xlane.xlu0 %2356 }
 0xc02   :  { %v2363_v24 = vmul.f32 0.03125, %v2357_v23 }
 0xc04   :  { %v2367_v25 = vadd.f32 1e-05, %v2363_v24 }
 0xc05   :  { %v2360_v26 = vpop.xlane.xlu1 %2359 }
 0xc06   :  { %2965 = vrsqrt.f32 %v2367_v25  ;;  %v2364_v27 = vmul.f32 0.03125, %v2360_v26 }
 0xc07   :  { %v2962_v28 = vpop.eup %2961 }
 0xc08   :  { %v2964_v30 = vpop.eup %2963  ;;  %v2374_v31 = vmul.f32 %v2962_v28, %v2342_v63  ;;  %v2368_v34 = vadd.f32 1e-05, %v2364_v27 }
 0xc09   :  { %v2373_v36 = vmul.f32 %v2964_v30, %v2341_v0 }
 0xc0a   :  { %v2384_v37 = vmul.f32 %v2494_v29, %v2374_v31  ;;  %2967 = vrsqrt.f32 %v2368_v34 }
 0xc0b   :  { %v2383_v38 = vmul.f32 %v2494_v29, %v2373_v36 }
 0xc0c   :  { %v2394_v19 = vadd.f32 %v2495_v35, %v2384_v37 }
 0xc0d   :  { %v2393_v32 = vadd.f32 %v2495_v35, %v2383_v38 }
 0xc0e   :  { %v2398_v33 = vsel %vm89_vm0, %v2394_v19, 0.0 }
 0xc0f   :  { %v2397_v39 = vsel %vm89_vm0, %v2393_v32, 0.0 }
 0xc10   :  { %v2966_v40 = vpop.eup %2965  ;;  %v2399_v42 = vadd.f32 %v2398_v33, %v2397_v39 }
 0xc11   :  { %v2375_v53 = vmul.f32 %v2966_v40, %v2343_v7 }
 0xc12   :  { %v2400_v43 = vrot.slane %v2399_v42, 4 }
 0xc13   :  { %v2385_v41 = vmul.f32 %v2494_v29, %v2375_v53 }
 0xc14   :  { %v2968_v44 = vpop.eup %2967  ;;  %v2401_v14 = vadd.f32 %v2400_v43, %v2399_v42 }
 0xc15   :  { %v2376_v45 = vmul.f32 %v2968_v44, %v2344_v11  ;;  %v2395_v46 = vadd.f32 %v2495_v35, %v2385_v41 }
 0xc16   :  { %v2402_v13 = vrot.slane %v2401_v14, 2 }
 0xc17   :  { %v2386_v22 = vmul.f32 %v2494_v29, %v2376_v45  ;;  %v2410_v50 = vsel %vm89_vm0, %v2395_v46, 0.0 }
 0xc18   :  { %v2403_v48 = vadd.f32 %v2402_v13, %v2401_v14 }
 0xc19   :  { %v2396_v49 = vadd.f32 %v2495_v35, %v2386_v22 }
 0xc1a   :  { %v2404_v47 = vrot.slane %v2403_v48, 1 }
 0xc1b   :  { %v2411_v51 = vsel %vm89_vm0, %v2396_v49, 0.0 }
 0xc1c   :  { %v2405_v54 = vadd.f32 %v2404_v47, %v2403_v48  ;;  %v2412_v55 = vadd.f32 %v2411_v51, %v2410_v50 }
 0xc1e   :  { %v2407_v56 = vmul.f32 0.0625, %v2405_v54  ;;  %v2413_v57 = vrot.slane %v2412_v55, 4 }
 0xc20   :  { %v2408_v59 = vsub.f32 %v2393_v32, %v2407_v56  ;;  %v2409_v60 = vsub.f32 %v2394_v19, %v2407_v56  ;;  %v2414_v61 = vadd.f32 %v2413_v57, %v2412_v55 }
 0xc22   :  { %2422 = vst.msk [vmem:[%s3447_s16] sm:$0xff] %vm89_vm0, %v2408_v59  ;;  %2423 = vst.msk [vmem:[%s3447_s16 + $0x8] sm:$0xff] %vm89_vm0, %v2409_v60  ;;  %v2415_v62 = vrot.slane %v2414_v61, 2 }
 0xc24   :  { %v2416_v63 = vadd.f32 %v2415_v62, %v2414_v61 }
 0xc26   :  { %v2417_v0 = vrot.slane %v2416_v63, 1 }
 0xc28   :  { %v2418_v1 = vadd.f32 %v2417_v0, %v2416_v63 }
 0xc2a   :  { %v2419_v2 = vmul.f32 0.0625, %v2418_v1 }
 0xc2c   :  { %v2420_v3 = vsub.f32 %v2395_v46, %v2419_v2  ;;  %v2421_v4 = vsub.f32 %v2396_v49, %v2419_v2 }
 0xc2e   :  { %2424 = vst.msk [vmem:[%s3447_s16 + $0x10] sm:$0xff] %vm89_vm0, %v2420_v3  ;;  %2425 = vst.msk [vmem:[%s3447_s16 + $0x18] sm:$0xff] %vm89_vm0, %v2421_v4 }

// kernel: autoformer_forward.9
= control target key start
LH: loop header
LB: loop body
LE: loop exit
PB: predicated region body
PF: predicated region fallthrough
CT: control target
= control target key end

     0   :  { %vm29_vm0 = vcmask 261120   ;;  %vm244_vm1 = vcmask 31744   ;;  %s410_s0 = inlined_call_operand.vmem [shape: f32[32,32], index: 0, kind: input, shape index: {}]   ;;  %s411_s3 = inlined_call_operand.vmem [shape: f32[32,4], index: 3, kind: input, shape index: {}]   ;;  %s412_s1 = inlined_call_operand.vmem [shape: f32[1,32], index: 1, kind: input, shape index: {}]   ;;  %s413_s2 = inlined_call_operand.vmem [shape: f32[1,32], index: 2, kind: input, shape index: {}]   ;;  %s414_s4 = inlined_call_operand.vmem [shape: f32[1,4], index: 4, kind: input, shape index: {}]   ;;  %s415_s5 = inlined_call_operand.vmem [shape: f32[32,4], index: 5, kind: input, shape index: {}]   ;;  %s416_s6 = inlined_call_operand.vmem [shape: f32[32,4], index: 6, kind: output, shape index: {}]  }
   0x1   :  { %v23_v0 = vld [vmem:[%s410_s0] sm:$0xff]  ;;  %v25_v1 = vld [vmem:[%s410_s0 + $0x10] sm:$0xff]  ;;  %v24_v2 = vld [vmem:[%s410_s0 + $0x8] sm:$0xff] }
   0x2   :  { %v30_v3 = vsel %vm29_vm0, %v23_v0, 0.0  ;;  %v36_v4 = vsel %vm29_vm0, %v25_v1, 0.0  ;;  %v26_v5 = vld [vmem:[%s410_s0 + $0x18] sm:$0xff]  ;;  %v33_v6 = vsel %vm29_vm0, %v24_v2, 0.0  ;;  %v128_v28 = vld [vmem:[%s411_s3] sm:$0xff]  ;;  %v129_v29 = vld [vmem:[%s411_s3 + $0x8] sm:$0xff] }
   0x3   :  { %31 = vadd.xlane.f32.xlu0 %v30_v3  ;;  %37 = vadd.xlane.f32.xlu1 %v36_v4  ;;  %v39_v7 = vsel %vm29_vm0, %v26_v5, 0.0  ;;  %v130_v30 = vld [vmem:[%s411_s3 + $0x10] sm:$0xff]  ;;  %v282_v31 = vpack.c.bf16 %v129_v29, %v128_v28  ;;  %v131_v32 = vld [vmem:[%s411_s3 + $0x18] sm:$0xff]  ;;  %v253_v47 = vld [vmem:[%s412_s1] ss:$0 sm:$0xff] }
   0x4   :  { %v286_v33 = vpack.c.bf16 %v131_v32, %v130_v30  ;;  %v254_v51 = vld [vmem:[%s413_s2] ss:$0 sm:$0xff] }
   0x5   :  { %283 = vmatprep.subr.bf16.mxu0 %v282_v31  ;;  %290 = vmatprep.subr.bf16.mxu1 %v282_v31  ;;  %v236_v29 = vld [vmem:[%s415_s5] sm:$0xff] }
   0x6   :  { %285 = vmatpush3.bf16.msra.mxu0 %v282_v31  ;;  %292 = vmatpush3.bf16.msra.mxu1 %v282_v31 }
   0x7   :  { %34 = vadd.xlane.f32.xlu0 %v33_v6  ;;  %40 = vadd.xlane.f32.xlu1 %v39_v7 }
   0x8   :  { %287 = vmatprep.subr.bf16.mxu0 %v286_v33  ;;  %291 = vmatprep.subr.bf16.mxu1 %v286_v33 }
   0xa   :  { %289 = vmatpush3.bf16.msra.mxu0 %v286_v33  ;;  %293 = vmatpush3.bf16.msra.mxu1 %v286_v33 }
  0x90   :  { %v32_v8 = vpop.xlane.xlu0 %31  ;;  %v38_v9 = vpop.xlane.xlu1 %37 }
  0x91   :  { %v43_v10 = vmul.f32 0.03125, %v32_v8  ;;  %v45_v11 = vmul.f32 0.03125, %v38_v9 }
  0x93   :  { %v47_v12 = vsub.f32 %v23_v0, %v43_v10  ;;  %v49_v13 = vsub.f32 %v25_v1, %v45_v11 }
  0x94   :  { %v35_v14 = vpop.xlane.xlu0 %34  ;;  %v41_v15 = vpop.xlane.xlu1 %40 }
  0x95   :  { %v44_v16 = vmul.f32 0.03125, %v35_v14  ;;  %v46_v17 = vmul.f32 0.03125, %v41_v15  ;;  %v51_v18 = vmul.f32 %v47_v12, %v47_v12  ;;  %v53_v19 = vmul.f32 %v49_v13, %v49_v13 }
  0x97   :  { %v48_v20 = vsub.f32 %v24_v2, %v44_v16  ;;  %v50_v21 = vsub.f32 %v26_v5, %v46_v17  ;;  %v55_v22 = vsel %vm29_vm0, %v51_v18, 0.0  ;;  %v61_v23 = vsel %vm29_vm0, %v53_v19, 0.0 }
  0x98   :  { %56 = vadd.xlane.f32.xlu0 %v55_v22 }
  0x99   :  { %v52_v24 = vmul.f32 %v48_v20, %v48_v20  ;;  %v54_v25 = vmul.f32 %v50_v21, %v50_v21 }
  0x9b   :  { %v58_v26 = vsel %vm29_vm0, %v52_v24, 0.0  ;;  %v64_v27 = vsel %vm29_vm0, %v54_v25, 0.0  ;;  %v255_v24 = vld [vmem:[%s414_s4] ss:$0 sm:$0xff] }
  0x9c   :  { %62 = vadd.xlane.f32.xlu0 %v61_v23  ;;  %59 = vadd.xlane.f32.xlu1 %v58_v26  ;;  %v237_v26 = vld [vmem:[%s415_s5 + $0x8] sm:$0xff] }
  0xa0   :  { %65 = vadd.xlane.f32.xlu1 %v64_v27 }
 0x125   :  { %v57_v34 = vpop.xlane.xlu0 %56 }
 0x126   :  { %v67_v35 = vmul.f32 0.03125, %v57_v34  ;;  %v239_v34 = vld [vmem:[%s415_s5 + $0x18] sm:$0xff] }
 0x128   :  { %v71_v36 = vadd.f32 1e-05, %v67_v35 }
 0x129   :  { %v60_v37 = vpop.xlane.xlu1 %59  ;;  %v63_v38 = vpop.xlane.xlu0 %62 }
 0x12a   :  { %294 = vrsqrt.f32 %v71_v36  ;;  %v68_v39 = vmul.f32 0.03125, %v60_v37  ;;  %v69_v40 = vmul.f32 0.03125, %v63_v38  ;;  %v238_v37 = vld [vmem:[%s415_s5 + $0x10] sm:$0xff] }
 0x12c   :  { %v72_v41 = vadd.f32 1e-05, %v68_v39  ;;  %v73_v42 = vadd.f32 1e-05, %v69_v40 }
 0x12d   :  { %v66_v43 = vpop.xlane.xlu1 %65 }
 0x12e   :  { %296 = vrsqrt.f32 %v72_v41  ;;  %v70_v44 = vmul.f32 0.03125, %v66_v43 }
 0x12f   :  { %298 = vrsqrt.f32 %v73_v42 }
 0x130   :  { %v74_v45 = vadd.f32 1e-05, %v70_v44 }
 0x132   :  { %300 = vrsqrt.f32 %v74_v45 }
 0x134   :  { %v295_v46 = vpop.eup %294 }
 0x135   :  { %v79_v48 = vmul.f32 %v295_v46, %v47_v12 }
 0x137   :  { %v89_v49 = vmul.f32 %v253_v47, %v79_v48 }
 0x138   :  { %v297_v50 = vpop.eup %296 }
 0x139   :  { %v299_v52 = vpop.eup %298  ;;  %v80_v53 = vmul.f32 %v297_v50, %v48_v20  ;;  %v99_v56 = vadd.f32 %v254_v51, %v89_v49 }
 0x13a   :  { %v81_v54 = vmul.f32 %v299_v52, %v49_v13 }
 0x13b   :  { %v90_v55 = vmul.f32 %v253_v47, %v80_v53  ;;  %v103_v61 = vsel %vm29_vm0, %v99_v56, 0.0 }
 0x13c   :  { %v301_v57 = vpop.eup %300  ;;  %v91_v58 = vmul.f32 %v253_v47, %v81_v54 }
 0x13d   :  { %v100_v59 = vadd.f32 %v254_v51, %v90_v55  ;;  %v82_v60 = vmul.f32 %v301_v57, %v50_v21 }
 0x13e   :  { %v101_v0 = vadd.f32 %v254_v51, %v91_v58 }
 0x13f   :  { %v104_v62 = vsel %vm29_vm0, %v100_v59, 0.0  ;;  %v92_v63 = vmul.f32 %v253_v47, %v82_v60 }
 0x140   :  { %v105_v1 = vadd.f32 %v104_v62, %v103_v61  ;;  %v116_v4 = vsel %vm29_vm0, %v101_v0, 0.0 }
 0x141   :  { %v102_v2 = vadd.f32 %v254_v51, %v92_v63 }
 0x142   :  { %v106_v3 = vrot.slane %v105_v1, 4 }
 0x143   :  { %v117_v5 = vsel %vm29_vm0, %v102_v2, 0.0 }
 0x144   :  { %v107_v6 = vadd.f32 %v106_v3, %v105_v1  ;;  %v118_v7 = vadd.f32 %v117_v5, %v116_v4 }
 0x146   :  { %v108_v8 = vrot.slane %v107_v6, 2  ;;  %v119_v9 = vrot.slane %v118_v7, 4 }
 0x148   :  { %v109_v10 = vadd.f32 %v108_v8, %v107_v6  ;;  %v120_v11 = vadd.f32 %v119_v9, %v118_v7 }
 0x14a   :  { %v110_v12 = vrot.slane %v109_v10, 1  ;;  %v121_v13 = vrot.slane %v120_v11, 2 }
 0x14c   :  { %v111_v14 = vadd.f32 %v110_v12, %v109_v10  ;;  %v122_v15 = vadd.f32 %v121_v13, %v120_v11 }
 0x14e   :  { %v113_v16 = vmul.f32 0.0625, %v111_v14  ;;  %v123_v17 = vrot.slane %v122_v15, 1 }
 0x150   :  { %v114_v18 = vsub.f32 %v99_v56, %v113_v16  ;;  %v115_v19 = vsub.f32 %v100_v59, %v113_v16  ;;  %v124_v20 = vadd.f32 %v123_v17, %v122_v15 }
 0x152   :  { %276 = vmatprep.mubr.msk.f32.mxu0 %vm29_vm0, %v114_v18  ;;  %v125_v21 = vmul.f32 0.0625, %v124_v20 }
 0x153   :  { %277 = vmatmul.mubr.msk.f32.vlgmr.msra.gmra.mrb[0].mxu0 %vm29_vm0, %v115_v19 }
 0x154   :  { %v126_v22 = vsub.f32 %v101_v0, %v125_v21  ;;  %v127_v23 = vsub.f32 %v102_v2, %v125_v21 }
 0x156   :  { %279 = vmatprep.mubr.msk.f32.mxu1 %vm29_vm0, %v126_v22 }
 0x157   :  { %280 = vmatmul.mubr.msk.f32.vlgmr.msra.gmra.mrb[0].mxu1 %vm29_vm0, %v127_v23 }
 0x226   :  { %v278_v25 = vpop.f32.mrb[0].mxu0 }
 0x227   :  { %v223_v27 = vadd.f32 %v278_v25, %v255_v24  ;;  %v217_v28 = vpop.f32.mrb[1].mxu0 }
 0x228   :  { %v218_v30 = vadd.f32 %v255_v24, %v217_v28 }
 0x229   :  { %v241_v31 = vadd.f32 %v237_v26, %v223_v27 }
 0x22a   :  { %v240_v32 = vadd.f32 %v236_v29, %v218_v30  ;;  %v281_v33 = vpop.f32.mrb[0].mxu1 }
 0x22b   :  { %246 = vst.msk [vmem:[%s416_s6 + $0x8] sm:$0xff] %vm244_vm1, %v241_v31  ;;  %v233_v35 = vadd.f32 %v281_v33, %v255_v24  ;;  %v227_v36 = vpop.f32.mrb[1].mxu1 }
 0x22c   :  { %245 = vst.msk [vmem:[%s416_s6] sm:$0xff] %vm244_vm1, %v240_v32  ;;  %v228_v38 = vadd.f32 %v255_v24, %v227_v36 }
 0x22d   :  { %v243_v39 = vadd.f32 %v239_v34, %v233_v35 }
 0x22e   :  { %v242_v40 = vadd.f32 %v238_v37, %v228_v38 }
 0x22f   :  { %248 = vst.msk [vmem:[%s416_s6 + $0x18] sm:$0xff] %vm244_vm1, %v243_v39 }
 0x230   :  { %247 = vst.msk [vmem:[%s416_s6 + $0x10] sm:$0xff] %vm244_vm1, %v242_v40 }

// kernel: autoformer_forward.8
= control target key start
LH: loop header
LB: loop body
LE: loop exit
PB: predicated region body
PF: predicated region fallthrough
CT: control target
= control target key end

     0   :  { %s6097_s3 = smov 3   ;;  %s6098_s7 = smov 5   ;;  %vm165_vm0 = vcmask 261120   ;;  %vm445_vm1 = vcmask 130048   ;;  %vm1423_vm2 = vcmask 7168   ;;  %s6752_s0 = inlined_call_operand.smem [shape: u32[31], index: -1, kind: input, shape index: {}] }
   0x1   :  { %s4902_s6 = sld [smem:[%s6752_s0 + %s6097_s3]]   ;;  %s6099_s14 = smov 7  }
   0x2   :  { %s4904_s10 = sld [smem:[%s6752_s0 + %s6098_s7]]   ;;  %s6100_s18 = smov 24  }
   0x3   :  { %s6142_s13 = sld [smem:[%s6752_s0]]   ;;  %s6101_s22 = smov 25  }
   0x4   :  { %s4906_s17 = sld [smem:[%s6752_s0 + %s6099_s14]]   ;;  %s6102_s26 = smov 4  }
   0x5   :  { %s6186_s21 = sld [smem:[%s6752_s0 + %s6100_s18]]   ;;  %s6103_s30 = smov 6  }
   0x6   :  { %s6191_s25 = sld [smem:[%s6752_s0 + %s6101_s22]]   ;;  %s6104_s4 = smov 8  }
   0x7   :  { %v139_v0 = vld [vmem:[%s4902_s6] sm:$0xff]  ;;  %v140_v1 = vld [vmem:[%s4902_s6 + $0x8] sm:$0xff]  ;;  %v141_v5 = vld [vmem:[%s4902_s6 + $0x10] sm:$0xff]  ;;  %s4903_s29 = sld [smem:[%s6752_s0 + %s6102_s26]]   ;;  %s6106_s8 = smov 9  }
   0x8   :  { %v144_v2 = vld [vmem:[%s4904_s10] sm:$0xff]  ;;  %v5770_v3 = vpack.c.bf16 %v140_v1, %v139_v0  ;;  %v145_v4 = vld [vmem:[%s4904_s10 + $0x8] sm:$0xff]  ;;  %v142_v6 = vld [vmem:[%s4902_s6 + $0x18] sm:$0xff]  ;;  %s4905_s3 = sld [smem:[%s6752_s0 + %s6103_s30]]   ;;  %s6107_s12 = smov 26  }
   0x9   :  { %v5778_v7 = vpack.c.bf16 %v145_v4, %v144_v2  ;;  %v5774_v8 = vpack.c.bf16 %v142_v6, %v141_v5  ;;  %v6148_v9 = vld [vmem:[%s6142_s13] sm:$0xff]  ;;  %v146_v10 = vld [vmem:[%s4904_s10 + $0x10] sm:$0xff]  ;;  %v147_v11 = vld [vmem:[%s4904_s10 + $0x18] sm:$0xff]  ;;  %s4907_s7 = sld [smem:[%s6752_s0 + %s6104_s4]]   ;;  %s6108_s16 = smov 11  }
   0xa   :  { %5771 = vmatprep.subr.bf16.mxu0 %v5770_v3  ;;  %5330 = vmatprep.mubr.msk.f32.mxu0 %vm165_vm0, %v6148_v9  ;;  %v5782_v12 = vpack.c.bf16 %v147_v11, %v146_v10  ;;  %v149_v13 = vld [vmem:[%s4906_s17] sm:$0xff]  ;;  %v150_v14 = vld [vmem:[%s4906_s17 + $0x8] sm:$0xff]  ;;  %v151_v16 = vld [vmem:[%s4906_s17 + $0x10] sm:$0xff]  ;;  %s4908_s11 = sld [smem:[%s6752_s0 + %s6106_s8]]   ;;  %s6109_s20 = smov 10  }
   0xb   :  { %5773 = vmatpush3.bf16.msra.mxu0 %v5770_v3  ;;  %5779 = vmatprep.subr.bf16.mxu1 %v5778_v7  ;;  %v5786_v15 = vpack.c.bf16 %v150_v14, %v149_v13  ;;  %v152_v17 = vld [vmem:[%s4906_s17 + $0x18] sm:$0xff]  ;;  %v6155_v18 = vld [vmem:[%s6142_s13 + $0x8] sm:$0xff]  ;;  %v6158_v20 = vld [vmem:[%s6142_s13 + $0x10] sm:$0xff]  ;;  %s6392_s15 = sld [smem:[%s6752_s0 + %s6107_s12]]   ;;  %s6110_s26 = smov 13  }
   0xc   :  { %5775 = vmatprep.subr.bf16.mxu0 %v5774_v8  ;;  %5781 = vmatpush3.bf16.msra.mxu1 %v5778_v7  ;;  %v5790_v19 = vpack.c.bf16 %v152_v17, %v151_v16  ;;  %v6165_v21 = vld [vmem:[%s6142_s13 + $0x18] sm:$0xff]  ;;  %v6194_v22 = vld [vmem:[%s6186_s21] sm:$0xff]  ;;  %v6213_v42 = vld [vmem:[%s6186_s21 + $0x8] sm:$0xff]  ;;  %s6402_s19 = sld [smem:[%s6752_s0 + %s6108_s16]]   ;;  %s6111_s30 = smov 1  }
   0xd   :  { %5783 = vmatprep.subr.bf16.mxu1 %v5782_v12  ;;  %5344 = vmatprep.mubr.msk.f32.mxu1 %vm165_vm0, %v6148_v9  ;;  %v6197_v23 = vld [vmem:[%s6191_s25] sm:$0xff]  ;;  %v6216_v43 = vld [vmem:[%s6191_s25 + $0x8] sm:$0xff]  ;;  %s4909_s24 = sld [smem:[%s6752_s0 + %s6109_s20]]   ;;  %s6112_s4 = smov 15  }
   0xe   :  { %v4930_v24 = vld [vmem:[%s4903_s29] ss:$0 sm:$0xff]  ;;  %s4912_s29 = sld [smem:[%s6752_s0 + %s6110_s26]]   ;;  %s6113_s8 = smov 14  }
   0xf   :  { %5777 = vmatpush3.bf16.msra.mxu0 %v5774_v8  ;;  %v4935_v25 = vld [vmem:[%s4905_s3] ss:$0 sm:$0xff]  ;;  %s6428_s3 = sld [smem:[%s6752_s0 + %s6111_s30]]   ;;  %s6114_s12 = smov 12  }
  0x10   :  { %5785 = vmatpush3.bf16.msra.mxu1 %v5782_v12  ;;  %5787 = vmatprep.subr.bf16.mxu0 %v5786_v15  ;;  %v4940_v40 = vld [vmem:[%s4907_s7] ss:$0 sm:$0xff]  ;;  %s4914_s7 = sld [smem:[%s6752_s0 + %s6112_s4]]   ;;  %s6115_s17 = smov 16  }
  0x11   :  { %s4911_s16 = sld [smem:[%s6752_s0 + %s6114_s12]]   ;;  %s6124_s22 = smov 27  }
  0x12   :  { %5331 = vmatmul.mubr.msk.f32.vlgmr.msra.gmra.mrb[0].mxu0 %vm165_vm0, %v6155_v18  ;;  %s4915_s20 = sld [smem:[%s6752_s0 + %s6115_s17]]   ;;  %s6125_s27 = smov 28  }
  0x13   :  { %5345 = vmatmul.mubr.msk.f32.vlgmr.msra.gmra.mrb[0].mxu1 %vm165_vm0, %v6155_v18  ;;  %5789 = vmatpush3.bf16.msra.mxu0 %v5786_v15  ;;  %s4926_s26 = sld [smem:[%s6752_s0 + %s6124_s22]]   ;;  %s6126_s1 = smov 2  }
  0x14   :  { %5333 = vmatprep.mubr.msk.f32.mxu0 %vm165_vm0, %v6158_v20  ;;  %5791 = vmatprep.subr.bf16.mxu0 %v5790_v19  ;;  %s4927_s30 = sld [smem:[%s6752_s0 + %s6125_s27]]   ;;  %s6127_s5 = smov 30  }
  0x15   :  { %5347 = vmatprep.mubr.msk.f32.mxu1 %vm165_vm0, %v6158_v20  ;;  %s4901_s4 = sld [smem:[%s6752_s0 + %s6126_s1]]  }
  0x16   :  { %5334 = vmatmul.mubr.msk.f32.gmra.mrb[2].mxu0 %vm165_vm0, %v6165_v21 }
  0x17   :  { %5793 = vmatpush3.bf16.msra.mxu0 %v5790_v19  ;;  %5358 = vmatprep.mubr.msk.f32.mxu0 %vm165_vm0, %v6148_v9 }
  0x18   :  { %5348 = vmatmul.mubr.msk.f32.gmra.mrb[2].mxu1 %vm165_vm0, %v6165_v21 }
  0x19   :  { %5375 = vmatprep.mubr.msk.f32.mxu1 %vm445_vm1, %v6197_v23 }
  0x1a   :  { %5359 = vmatmul.mubr.msk.f32.vlgmr.msra.gmra.mrb[4].mxu0 %vm165_vm0, %v6155_v18 }
  0x1b   :  { %5361 = vmatprep.mubr.msk.f32.mxu0 %vm165_vm0, %v6158_v20 }
  0x1e   :  { %5362 = vmatmul.mubr.msk.f32.gmra.mrb[6].mxu0 %vm165_vm0, %v6165_v21 }
  0x1f   :  { %5368 = vmatprep.mubr.msk.f32.mxu0 %vm445_vm1, %v6194_v22 }
  0xe5   :  { %v5332_v26 = vpop.f32.mrb[0].mxu0 }
  0xe6   :  { %v250_v27 = vadd.f32 %v5332_v26, %v4930_v24  ;;  %v244_v28 = vpop.f32.mrb[1].mxu0  ;;  %v5346_v29 = vpop.f32.mrb[0].mxu1 }
  0xe7   :  { %v245_v30 = vadd.f32 %v4930_v24, %v244_v28  ;;  %v341_v31 = vadd.f32 %v5346_v29, %v4935_v25  ;;  %v335_v32 = vpop.f32.mrb[1].mxu1 }
  0xe8   :  { %v336_v33 = vadd.f32 %v4935_v25, %v335_v32 }
  0xe9   :  { %v5794_v34 = vpack.c.bf16 %v250_v27, %v245_v30  ;;  %v5335_v35 = vpop.f32.mrb[2].mxu0 }
  0xea   :  { %v5802_v36 = vpack.c.bf16 %v341_v31, %v336_v33  ;;  %v260_v37 = vadd.f32 %v5335_v35, %v4930_v24  ;;  %v254_v38 = vpop.f32.mrb[3].mxu0 }
  0xeb   :  { %5795 = vmatprep.subr.bf16.mxu0 %v5794_v34  ;;  %5799 = vmatprep.subr.bf16.mxu1 %v5794_v34  ;;  %v255_v39 = vadd.f32 %v4930_v24, %v254_v38  ;;  %v5349_v41 = vpop.f32.mrb[2].mxu1 }
  0xec   :  { %5797 = vmatpush3.bf16.msra.mxu0 %v5794_v34  ;;  %5801 = vmatpush3.bf16.msra.mxu1 %v5794_v34  ;;  %v351_v44 = vadd.f32 %v5349_v41, %v4935_v25  ;;  %v345_v45 = vpop.f32.mrb[3].mxu1 }
  0xed   :  { %5803 = vmatprep.subr.bf16.mxu0 %v5802_v36  ;;  %5807 = vmatprep.subr.bf16.mxu1 %v5802_v36  ;;  %v6218_v46 = vpack.c.bf16 %v260_v37, %v255_v39  ;;  %v5360_v47 = vpop.f32.mrb[4].mxu0  ;;  %v346_v48 = vadd.f32 %v4935_v25, %v345_v45 }
  0xee   :  { %v432_v49 = vadd.f32 %v5360_v47, %v4940_v40  ;;  %v426_v50 = vpop.f32.mrb[5].mxu0 }
  0xef   :  { %5369 = vmatmul.mubr.msk.f32.vlgmr.msra.gmra.mrb[8].mxu0 %vm445_vm1, %v6213_v42  ;;  %5376 = vmatmul.mubr.msk.f32.vlgmr.msra.gmra.mrb[4].mxu1 %vm445_vm1, %v6216_v43  ;;  %v427_v51 = vadd.f32 %v4940_v40, %v426_v50  ;;  %v6224_v52 = vpack.c.bf16 %v351_v44, %v346_v48 }
  0xf0   :  { %5805 = vmatpush3.bf16.msra.mxu0 %v5802_v36  ;;  %5809 = vmatpush3.bf16.msra.mxu1 %v5802_v36 }
  0xf1   :  { %5382 = vmatprep.mubr.msk.f32.mxu0 %vm445_vm1, %v6194_v22  ;;  %5389 = vmatprep.mubr.msk.f32.mxu1 %vm445_vm1, %v6197_v23  ;;  %v6230_v53 = vpack.c.bf16 %v432_v49, %v427_v51  ;;  %v5363_v54 = vpop.f32.mrb[6].mxu0 }
  0xf2   :  { %v442_v55 = vadd.f32 %v5363_v54, %v4940_v40  ;;  %v436_v56 = vpop.f32.mrb[7].mxu0 }
  0xf3   :  { %5383 = vmatmul.mubr.msk.f32.vlgmr.msra.gmra.mrb[10].mxu0 %vm445_vm1, %v6213_v42  ;;  %5390 = vmatmul.mubr.msk.f32.vlgmr.msra.gmra.mrb[6].mxu1 %vm445_vm1, %v6216_v43  ;;  %v437_v57 = vadd.f32 %v4940_v40, %v436_v56 }
  0xf4   :  { %5396 = vmatprep.mubr.msk.f32.mxu0 %vm445_vm1, %v6194_v22  ;;  %5403 = vmatprep.mubr.msk.f32.mxu1 %vm445_vm1, %v6197_v23 }
  0xf5   :  { %v6240_v58 = vpack.c.bf16 %v442_v55, %v437_v57 }
 0x1c2   :  { %v5370_v59 = vpop.f32.mrb[8].mxu0  ;;  %v5377_v60 = vpop.f32.mrb[4].mxu1 }
 0x1c3   :  { %v518_v61 = vpop.f32.mrb[9].mxu0  ;;  %v599_v62 = vpop.f32.mrb[5].mxu1 }
 0x1c6   :  { %v5384_v63 = vpop.f32.mrb[10].mxu0  ;;  %v5391_v0 = vpop.f32.mrb[6].mxu1 }
 0x1c7   :  { %v759_v1 = vmul.f32 %v5384_v63, %v5370_v59  ;;  %v773_v2 = vmul.f32 %v5384_v63, %v5377_v60  ;;  %v761_v3 = vmul.f32 %v5391_v0, %v5377_v60  ;;  %v771_v4 = vmul.f32 %v5391_v0, %v5370_v59  ;;  %v674_v5 = vpop.f32.mrb[11].mxu0  ;;  %v749_v6 = vpop.f32.mrb[7].mxu1 }
 0x1c8   :  { %v758_v7 = vmul.f32 %v674_v5, %v518_v61  ;;  %v772_v8 = vmul.f32 %v674_v5, %v599_v62  ;;  %v760_v10 = vmul.f32 %v749_v6, %v599_v62  ;;  %v770_v11 = vmul.f32 %v749_v6, %v518_v61 }
 0x1c9   :  { %v775_v12 = vsub.f32 %v771_v4, %v773_v2  ;;  %v763_v13 = vadd.f32 %v761_v3, %v759_v1 }
 0x1ca   :  { %v774_v14 = vsub.f32 %v770_v11, %v772_v8  ;;  %v762_v15 = vadd.f32 %v760_v10, %v758_v7  ;;  %v6105_v7 = vmov 0  }
 0x1cb   :  { %v779_v19 = vsel %vm165_vm0, %v775_v12, 0.0  ;;  %v767_v24 = vsel %vm165_vm0, %v763_v13, 0.0  ;;  %6065 = vset.pattern.permute.xlu0 %v6105_v7  ;;  %6066 = vset.pattern.permute.xlu1 %v6105_v7 }
 0x1cc   :  { %v776_v16 = vsel %vm165_vm0, %v774_v14, 0.0  ;;  %v764_v17 = vsel %vm165_vm0, %v762_v15, 0.0 }
 0x1cd   :  { %777 = vadd.xlane.f32.xlu1 %v776_v16  ;;  %765 = vadd.xlane.f32.xlu0 %v764_v17 }
 0x1d1   :  { %780 = vadd.xlane.f32.xlu1 %v779_v19  ;;  %768 = vadd.xlane.f32.xlu0 %v767_v24 }
 0x25a   :  { %v778_v25 = vpop.xlane.xlu1 %777  ;;  %v766_v26 = vpop.xlane.xlu0 %765 }
 0x25e   :  { %v781_v27 = vpop.xlane.xlu1 %780  ;;  %v769_v28 = vpop.xlane.xlu0 %768 }
 0x25f   :  { %v5814_v29 = vpack.c.bf16 %v781_v27, %v778_v25  ;;  %v5810_v30 = vpack.c.bf16 %v769_v28, %v766_v26  ;;  %v1418_v27 = vlaneseq }
 0x261   :  { %5811 = vmatprep.subr.bf16.mxu0 %v5810_v30  ;;  %5815 = vmatprep.subr.bf16.mxu1 %v5814_v29 }
 0x262   :  { %5813 = vmatpush3.bf16.msra.mxu0 %v5810_v30  ;;  %5817 = vmatpush3.bf16.msra.mxu1 %v5814_v29 }
 0x263   :  { %5819 = vmatprep.subr.bf16.mxu0 %v6218_v46  ;;  %5823 = vmatprep.subr.bf16.mxu1 %v6218_v46 }
 0x265   :  { %5397 = vmatmul.mubr.msk.f32.vlgmr.msra.gmra.mrb[12].mxu0 %vm445_vm1, %v6213_v42  ;;  %5404 = vmatmul.mubr.msk.f32.vlgmr.msra.gmra.mrb[8].mxu1 %vm445_vm1, %v6216_v43 }
 0x266   :  { %5821 = vmatpush3.bf16.msra.mxu0 %v6218_v46  ;;  %5825 = vmatpush3.bf16.msra.mxu1 %v6218_v46 }
 0x267   :  { %5827 = vmatprep.subr.bf16.mxu0 %v6224_v52  ;;  %5831 = vmatprep.subr.bf16.mxu1 %v6224_v52 }
 0x268   :  { %5410 = vmatprep.mubr.msk.f32.mxu0 %vm445_vm1, %v6194_v22  ;;  %5417 = vmatprep.mubr.msk.f32.mxu1 %vm445_vm1, %v6197_v23 }
 0x269   :  { %5411 = vmatmul.mubr.msk.f32.vlgmr.msra.gmra.mrb[14].mxu0 %vm445_vm1, %v6213_v42  ;;  %5418 = vmatmul.mubr.msk.f32.vlgmr.msra.gmra.mrb[10].mxu1 %vm445_vm1, %v6216_v43 }
 0x26a   :  { %5829 = vmatpush3.bf16.msra.mxu0 %v6224_v52  ;;  %5833 = vmatpush3.bf16.msra.mxu1 %v6224_v52 }
 0x26b   :  { %5424 = vmatprep.mubr.msk.f32.mxu0 %vm445_vm1, %v6194_v22  ;;  %5431 = vmatprep.mubr.msk.f32.mxu1 %vm445_vm1, %v6197_v23 }
 0x26d   :  { %5425 = vmatmul.mubr.msk.f32.vlgmr.msra.gmra.mrb[16].mxu0 %vm445_vm1, %v6213_v42  ;;  %5432 = vmatmul.mubr.msk.f32.vlgmr.msra.gmra.mrb[12].mxu1 %vm445_vm1, %v6216_v43 }
 0x26e   :  { %5438 = vmatprep.mubr.msk.f32.mxu0 %vm445_vm1, %v6194_v22  ;;  %5445 = vmatprep.mubr.msk.f32.mxu1 %vm445_vm1, %v6197_v23 }
 0x338   :  { %v5398_v31 = vpop.f32.mrb[12].mxu0  ;;  %v5405_v32 = vpop.f32.mrb[8].mxu1 }
 0x339   :  { %v933_v33 = vsub.f32 %v5398_v31, %v5405_v32  ;;  %v848_v34 = vpop.f32.mrb[13].mxu0  ;;  %v923_v35 = vpop.f32.mrb[9].mxu1  ;;  %v1419_v31 = vshrl.u32 %v1418_v27, 7 }
 0x33a   :  { %v932_v36 = vsub.f32 %v848_v34, %v923_v35 }
 0x33b   :  { %v6290_v15 = vmul.f32 0.001953125, %v933_v33  ;;  %v1420_v34 = vadd.s32 8, %v1419_v31 }
 0x33c   :  { %v5412_v37 = vpop.f32.mrb[14].mxu0  ;;  %v5419_v38 = vpop.f32.mrb[10].mxu1 }
 0x33d   :  { %v1002_v39 = vpop.f32.mrb[15].mxu0  ;;  %v1077_v40 = vpop.f32.mrb[11].mxu1 }
 0x340   :  { %v5426_v41 = vpop.f32.mrb[16].mxu0  ;;  %v5433_v44 = vpop.f32.mrb[12].mxu1 }
 0x341   :  { %v1237_v45 = vmul.f32 %v5426_v41, %v5412_v37  ;;  %v1251_v46 = vmul.f32 %v5426_v41, %v5419_v38  ;;  %v1239_v47 = vmul.f32 %v5433_v44, %v5419_v38  ;;  %v1249_v48 = vmul.f32 %v5433_v44, %v5412_v37  ;;  %v1152_v49 = vpop.f32.mrb[17].mxu0  ;;  %v1227_v50 = vpop.f32.mrb[13].mxu1 }
 0x342   :  { %v1236_v51 = vmul.f32 %v1152_v49, %v1002_v39  ;;  %v1250_v52 = vmul.f32 %v1152_v49, %v1077_v40  ;;  %v1238_v54 = vmul.f32 %v1227_v50, %v1077_v40  ;;  %v1248_v55 = vmul.f32 %v1227_v50, %v1002_v39 }
 0x343   :  { %v1241_v56 = vadd.f32 %v1239_v47, %v1237_v45  ;;  %v1253_v57 = vsub.f32 %v1249_v48, %v1251_v46  ;;  %v6305_v37 = vcvt.s32.f32 %v1419_v31  ;;  %v6307_v38 = vcvt.s32.f32 %v1420_v34 }
 0x344   :  { %v1240_v59 = vadd.f32 %v1238_v54, %v1236_v51  ;;  %v1252_v60 = vsub.f32 %v1248_v55, %v1250_v52 }
 0x345   :  { %v1245_v61 = vsel %vm165_vm0, %v1241_v56, 0.0  ;;  %v1257_v63 = vsel %vm165_vm0, %v1253_v57, 0.0 }
 0x346   :  { %1246 = vadd.xlane.f32.xlu1 %v1245_v61  ;;  %v1242_v62 = vsel %vm165_vm0, %v1240_v59, 0.0  ;;  %v1254_v0 = vsel %vm165_vm0, %v1252_v60, 0.0 }
 0x347   :  { %1243 = vadd.xlane.f32.xlu0 %v1242_v62 }
 0x34a   :  { %1258 = vadd.xlane.f32.xlu1 %v1257_v63 }
 0x34b   :  { %1255 = vadd.xlane.f32.xlu0 %v1254_v0 }
 0x3d3   :  { %v1247_v1 = vpop.xlane.xlu1 %1246 }
 0x3d4   :  { %v1244_v2 = vpop.xlane.xlu0 %1243 }
 0x3d5   :  { %v5834_v3 = vpack.c.bf16 %v1247_v1, %v1244_v2 }
 0x3d7   :  { %v1259_v4 = vpop.xlane.xlu1 %1258  ;;  %5835 = vmatprep.subr.bf16.mxu0 %v5834_v3 }
 0x3d8   :  { %5837 = vmatpush3.bf16.msra.mxu0 %v5834_v3  ;;  %v1256_v5 = vpop.xlane.xlu0 %1255 }
 0x3d9   :  { %v5838_v6 = vpack.c.bf16 %v1259_v4, %v1256_v5  ;;  %5843 = vmatprep.subr.bf16.mxu0 %v6230_v53 }
 0x3db   :  { %5839 = vmatprep.subr.bf16.mxu1 %v5838_v6  ;;  %5439 = vmatmul.mubr.msk.f32.vlgmr.msra.gmra.mrb[18].mxu0 %vm445_vm1, %v6213_v42 }
 0x3dc   :  { %5841 = vmatpush3.bf16.msra.mxu1 %v5838_v6  ;;  %5845 = vmatpush3.bf16.msra.mxu0 %v6230_v53  ;;  %v6294_v53 = vmul.f32 0.001953125, %v932_v36 }
 0x3dd   :  { %5847 = vmatprep.subr.bf16.mxu1 %v6240_v58 }
 0x3df   :  { %5446 = vmatmul.mubr.msk.f32.vlgmr.msra.gmra.mrb[14].mxu1 %vm445_vm1, %v6216_v43 }
 0x3e0   :  { %5849 = vmatpush3.bf16.msra.mxu1 %v6240_v58 }
 0x4ae   :  { %v5440_v8 = vpop.f32.mrb[18].mxu0 }
 0x4af   :  { %v1326_v10 = vpop.f32.mrb[19].mxu0 }
 0x4b2   :  { %v5447_v11 = vpop.f32.mrb[14].mxu1 }
 0x4b3   :  { %v1411_v12 = vsub.f32 %v5440_v8, %v5447_v11  ;;  %v1401_v13 = vpop.f32.mrb[15].mxu1 }
 0x4b4   :  { %v1410_v14 = vsub.f32 %v1326_v10, %v1401_v13 }
 0x4b5   :  { %v6292_v16 = vmul.f32 0.001953125, %v1411_v12 }
 0x4b6   :  { %v6296_v17 = vmul.f32 0.001953125, %v1410_v14 }
 0x4b7   :  { %v1415_v58 = vadd.f32 %v6292_v16, %v6290_v15 }
 0x4b8   :  { %v1414_v19 = vadd.f32 %v6296_v17, %v6294_v53 }
 0x4b9   :  { %v1417_v24 = vmul.f32 0.5, %v1415_v58 }
 0x4ba   :  { %v1416_v25 = vmul.f32 0.5, %v1414_v19 }
 0x4bb   :  { %v1425_v26 = vsel %vm1423_vm2, %v1417_v24, -inf }
 0x4bc   :  { %v1424_v28 = vsel %vm1423_vm2, %v1416_v25, -inf }
 0x4bd   :  { %v1426_v29 = vmax.f32 %v1424_v28, %v1425_v26 }
 0x4bf   :  { %v1427_v30 = vrot.slane %v1426_v29, 4 }
 0x4c1   :  { %v1428_v32 = vmax.f32 %v1426_v29, %v1427_v30 }
 0x4c3   :  { %v1429_v33 = vrot.slane %v1428_v32, 2 }
 0x4c5   :  { %v1430_v35 = vmax.f32 %v1428_v32, %v1429_v33 }
 0x4c7   :  { %v1431_v36 = vrot.slane %v1430_v35, 1 }
 0x4c9   :  { %v1432_v39 = vmax.f32 %v1430_v35, %v1431_v36 }
 0x4cb   :  { %vm1433_vm3 = vcmp.ge.f32.partialorder %v1416_v25, %v1432_v39  ;;  %vm1434_vm4 = vcmp.ge.f32.partialorder %v1417_v24, %v1432_v39 }
 0x4cc   :  { %v1435_v40 = vsel %vm1433_vm3, %v6305_v37, 16.0  ;;  %v1436_v41 = vsel %vm1434_vm4, %v6307_v38, 16.0 }
 0x4cd   :  { %v1437_v44 = vsel %vm1423_vm2, %v1435_v40, inf  ;;  %v1438_v45 = vsel %vm1423_vm2, %v1436_v41, inf }
 0x4ce   :  { %v1439_v46 = vmin.f32 %v1437_v44, %v1438_v45 }
 0x4d0   :  { %v1440_v47 = vrot.slane %v1439_v46, 4 }
 0x4d2   :  { %v1441_v48 = vmin.f32 %v1439_v46, %v1440_v47 }
 0x4d4   :  { %v1442_v49 = vrot.slane %v1441_v48, 2 }
 0x4d6   :  { %v1443_v50 = vmin.f32 %v1441_v48, %v1442_v49 }
 0x4d8   :  { %v1444_v51 = vrot.slane %v1443_v50, 1 }
 0x4da   :  { %v1445_v52 = vmin.f32 %v1443_v50, %v1444_v51 }
 0x4dc   :  { %1517 = vperm.xlu0 %6065, %v1445_v52   ;;  %vm1446_vm5 = vcmp.eq.f32.partialorder %v6305_v37, %v1445_v52  ;;  %vm1447_vm6 = vcmp.eq.f32.partialorder %v6307_v38, %v1445_v52 }
 0x4dd   :  { %v1448_v54 = vsel %vm1446_vm5, -1e+30, %v1416_v25  ;;  %v1449_v55 = vsel %vm1447_vm6, -1e+30, %v1417_v24  ;;  %v1483_v2 = vsel %vm1446_vm5, %v6294_v53, 0.0  ;;  %v1484_v3 = vsel %vm1447_vm6, %v6290_v15, 0.0 }
 0x4de   :  { %v1450_v56 = vsel %vm1423_vm2, %v1448_v54, -inf  ;;  %v1451_v57 = vsel %vm1423_vm2, %v1449_v55, -inf  ;;  %v1631_v6 = vsel %vm1446_vm5, %v6296_v17, 0.0  ;;  %v1632_v7 = vsel %vm1447_vm6, %v6292_v16, 0.0 }
 0x4df   :  { %v1452_v59 = vmax.f32 %v1450_v56, %v1451_v57  ;;  %v1485_v12 = vsel %vm1423_vm2, %v1483_v2, 0.0  ;;  %v1486_v13 = vsel %vm1423_vm2, %v1484_v3, 0.0  ;;  %v1633_v14 = vsel %vm1423_vm2, %v1631_v6, 0.0 }
 0x4e0   :  { %v1634_v58 = vsel %vm1423_vm2, %v1632_v7, 0.0  ;;  %v1487_v25 = vadd.f32 %v1486_v13, %v1485_v12 }
 0x4e1   :  { %v1453_v60 = vrot.slane %v1452_v59, 4  ;;  %v1635_v26 = vadd.f32 %v1634_v58, %v1633_v14 }
 0x4e2   :  { %v1488_v30 = vrot.slane %v1487_v25, 4 }
 0x4e3   :  { %v1454_v61 = vmax.f32 %v1452_v59, %v1453_v60  ;;  %v1636_v31 = vrot.slane %v1635_v26, 4 }
 0x4e4   :  { %v1489_v34 = vadd.f32 %v1488_v30, %v1487_v25 }
 0x4e5   :  { %v1455_v62 = vrot.slane %v1454_v61, 2  ;;  %v1637_v35 = vadd.f32 %v1636_v31, %v1635_v26 }
 0x4e6   :  { %v1490_v48 = vrot.slane %v1489_v34, 2 }
 0x4e7   :  { %v1456_v63 = vmax.f32 %v1454_v61, %v1455_v62  ;;  %v1638_v49 = vrot.slane %v1637_v35, 2 }
 0x4e9   :  { %v1457_v0 = vrot.slane %v1456_v63, 1 }
 0x4eb   :  { %v1458_v1 = vmax.f32 %v1456_v63, %v1457_v0 }
 0x4ed   :  { %vm1459_vm7 = vcmp.ge.f32.partialorder %v1448_v54, %v1458_v1  ;;  %vm1460_vm8 = vcmp.ge.f32.partialorder %v1449_v55, %v1458_v1  ;;  %v1491_v54 = vadd.f32 %v1490_v48, %v1489_v34 }
 0x4ee   :  { %v1461_v4 = vsel %vm1459_vm7, %v6305_v37, 16.0  ;;  %v1462_v5 = vsel %vm1460_vm8, %v6307_v38, 16.0 }
 0x4ef   :  { %v1463_v8 = vsel %vm1423_vm2, %v1461_v4, inf  ;;  %v1464_v10 = vsel %vm1423_vm2, %v1462_v5, inf  ;;  %v1492_v57 = vrot.slane %v1491_v54, 1 }
 0x4f0   :  { %v1465_v11 = vmin.f32 %v1463_v8, %v1464_v10 }
 0x4f1   :  { %v1493_v2 = vadd.f32 %v1492_v57, %v1491_v54  ;;  %v157_v54 = vld [vmem:[%s4908_s11 + $0x18] sm:$0xff] }
 0x4f2   :  { %v1466_v19 = vrot.slane %v1465_v11, 4 }
 0x4f4   :  { %v1467_v24 = vmin.f32 %v1465_v11, %v1466_v19 }
 0x4f6   :  { %v1468_v28 = vrot.slane %v1467_v24, 2 }
 0x4f8   :  { %v1469_v29 = vmin.f32 %v1467_v24, %v1468_v28 }
 0x4fa   :  { %v1470_v32 = vrot.slane %v1469_v29, 1 }
 0x4fc   :  { %v1471_v33 = vmin.f32 %v1469_v29, %v1470_v32 }
 0x4fe   :  { %1535 = vperm.xlu1 %6066, %v1471_v33   ;;  %vm1494_vm9 = vcmp.eq.f32.partialorder %v6305_v37, %v1471_v33  ;;  %vm1495_vm10 = vcmp.eq.f32.partialorder %v6307_v38, %v1471_v33 }
 0x4ff   :  { %v1496_v36 = vsel %vm1494_vm9, %v6294_v53, 0.0  ;;  %v1497_v39 = vsel %vm1495_vm10, %v6290_v15, 0.0  ;;  %v1642_v40 = vsel %vm1494_vm9, %v6296_v17, 0.0  ;;  %v1643_v41 = vsel %vm1495_vm10, %v6292_v16, 0.0 }
 0x500   :  { %v1498_v44 = vsel %vm1423_vm2, %v1496_v36, 0.0  ;;  %v1499_v45 = vsel %vm1423_vm2, %v1497_v39, 0.0  ;;  %v1644_v46 = vsel %vm1423_vm2, %v1642_v40, 0.0  ;;  %v1645_v47 = vsel %vm1423_vm2, %v1643_v41, 0.0  ;;  %v155_v36 = vld [vmem:[%s4908_s11 + $0x8] sm:$0xff] }
 0x501   :  { %v1500_v50 = vadd.f32 %v1499_v45, %v1498_v44  ;;  %v1646_v51 = vadd.f32 %v1645_v47, %v1644_v46  ;;  %v1639_v15 = vadd.f32 %v1638_v49, %v1637_v35  ;;  %v154_v35 = vld [vmem:[%s4908_s11] sm:$0xff]  ;;  %v1473_v40 = vand.u32 127, %v1418_v27 }
 0x502   :  { %v5850_v39 = vpack.c.bf16 %v155_v36, %v154_v35 }
 0x503   :  { %v1501_v52 = vrot.slane %v1500_v50, 4  ;;  %v1647_v53 = vrot.slane %v1646_v51, 4  ;;  %v1640_v59 = vrot.slane %v1639_v15, 1  ;;  %v1474_v41 = vcvt.s32.f32 %v1473_v40  ;;  %v2041_v40 = vld [vmem:[%s4912_s29 + $0x10] sm:$0xff] }
 0x504   :  { %5851 = vmatprep.subr.bf16.mxu0 %v5850_v39 }
 0x505   :  { %v1502_v55 = vadd.f32 %v1501_v52, %v1500_v50  ;;  %v1648_v17 = vadd.f32 %v1647_v53, %v1646_v51  ;;  %v1641_v3 = vadd.f32 %v1640_v59, %v1639_v15  ;;  %v1475_v44 = vsub.f32 %v1474_v41, %v6305_v37  ;;  %v156_v53 = vld [vmem:[%s4908_s11 + $0x10] sm:$0xff]  ;;  %s4913_s11 = sld [smem:[%s6752_s0 + %s6113_s8]]  }
 0x506   :  { %v1476_v45 = vsub.f32 %v1474_v41, %v6307_v38  ;;  %v5854_v59 = vpack.c.bf16 %v157_v54, %v156_v53  ;;  %v2046_v53 = vld [vmem:[%s4914_s7 + $0x10] sm:$0xff]  ;;  %v2047_v54 = vld [vmem:[%s4914_s7 + $0x18] sm:$0xff]  ;;  %s4929_s8 = sld [smem:[%s6752_s0 + %s6127_s5]]  }
 0x507   :  { %v1503_v56 = vrot.slane %v1502_v55, 2  ;;  %v1649_v16 = vrot.slane %v1648_v17, 2  ;;  %v1479_v47 = vadd.f32 16.0, %v1475_v44  ;;  %vm1477_vm11 = vcmp.lt.f32.partialorder %v1475_v44, 0.0 }
 0x508   :  { %v1480_v48 = vadd.f32 16.0, %v1476_v45  ;;  %vm1478_vm12 = vcmp.lt.f32.partialorder %v1476_v45, 0.0 }
 0x509   :  { %v1504_v60 = vadd.f32 %v1503_v56, %v1502_v55  ;;  %v1650_v61 = vadd.f32 %v1649_v16, %v1648_v17  ;;  %v6357_v50 = vsel %vm1477_vm11, %v1479_v47, %v1475_v44  ;;  %v2042_v44 = vld [vmem:[%s4912_s29 + $0x18] sm:$0xff]  ;;  %v130_v47 = vld [vmem:[%s6428_s3 + $0x8] sm:$0xff] }
 0x50a   :  { %v6359_v51 = vsel %vm1478_vm12, %v1480_v48, %v1476_v45  ;;  %v5878_v45 = vpack.c.bf16 %v2042_v44, %v2041_v40  ;;  %v2044_v48 = vld [vmem:[%s4914_s7] sm:$0xff] }
 0x50b   :  { %v1505_v62 = vrot.slane %v1504_v60, 1  ;;  %v1651_v63 = vrot.slane %v1650_v61, 1 }
 0x50d   :  { %v1506_v0 = vadd.f32 %v1505_v62, %v1504_v60  ;;  %v1652_v1 = vadd.f32 %v1651_v63, %v1650_v61 }
 0x50f   :  { %v1507_v4 = vmax.f32 %v1493_v2, %v1506_v0  ;;  %v1653_v5 = vmax.f32 %v1641_v3, %v1652_v1 }
 0x511   :  { %v1508_v6 = vsub.f32 %v1493_v2, %v1507_v4  ;;  %v1511_v7 = vsub.f32 %v1506_v0, %v1507_v4  ;;  %v1654_v8 = vsub.f32 %v1641_v3, %v1653_v5  ;;  %v1657_v10 = vsub.f32 %v1652_v1, %v1653_v5 }
 0x513   :  { %v1509_v11 = vmul.f32 1.442695, %v1508_v6  ;;  %v1512_v12 = vmul.f32 1.442695, %v1511_v7  ;;  %v1655_v13 = vmul.f32 1.442695, %v1654_v8 }
 0x514   :  { %v1658_v14 = vmul.f32 1.442695, %v1657_v10  ;;  %v6395_v8 = vld [vmem:[%s6392_s15] sm:$0xff] }
 0x515   :  { %6067 = vpow2.f32 %v1509_v11  ;;  %v2034_v10 = vld [vmem:[%s6402_s19] sm:$0xff]  ;;  %v2035_v11 = vld [vmem:[%s6402_s19 + $0x8] sm:$0xff] }
 0x516   :  { %6069 = vpow2.f32 %v1512_v12  ;;  %v5866_v12 = vpack.c.bf16 %v2035_v11, %v2034_v10 }
 0x517   :  { %6071 = vpow2.f32 %v1655_v13  ;;  %v4977_v13 = vld [vmem:[%s4909_s24] ss:$0 sm:$0xff]  ;;  %s6117_s24 = smov 19  }
 0x518   :  { %6073 = vpow2.f32 %v1658_v14  ;;  %s6639_s28 = sld [smem:[%s6752_s0 + %s6117_s24]]  }
 0x51f   :  { %v6068_v58 = vpop.eup %6067 }
 0x520   :  { %v6070_v19 = vpop.eup %6069 }
 0x521   :  { %v6072_v24 = vpop.eup %6071  ;;  %v1514_v25 = vadd.f32 %v6070_v19, %v6068_v58 }
 0x522   :  { %v6074_v26 = vpop.eup %6073 }
 0x523   :  { %6075 = vrcp.f32 %v1514_v25  ;;  %v1660_v28 = vadd.f32 %v6074_v26, %v6072_v24 }
 0x525   :  { %6077 = vrcp.f32 %v1660_v28 }
 0x52d   :  { %v6076_v29 = vpop.eup %6075 }
 0x52e   :  { %v1523_v30 = vmul.f32 %v6076_v29, %v6068_v58  ;;  %v1540_v31 = vmul.f32 %v6076_v29, %v6070_v19 }
 0x52f   :  { %v6078_v32 = vpop.eup %6077 }
 0x530   :  { %1526 = vperm.xlu1 %6066, %v1523_v30   ;;  %v1662_v33 = vmul.f32 %v6078_v32, %v6072_v24  ;;  %v1672_v34 = vmul.f32 %v6078_v32, %v6074_v26  ;;  %v6416_v32 = vld [vmem:[%s6392_s15 + $0x8] sm:$0xff] }
 0x534   :  { %1543 = vperm.xlu1 %6066, %v1540_v31  }
 0x538   :  { %1665 = vperm.xlu1 %6066, %v1662_v33   ;;  %v2039_v33 = vld [vmem:[%s4912_s29] sm:$0xff] }
 0x53c   :  { %1675 = vperm.xlu1 %6066, %v1672_v34   ;;  %v2040_v34 = vld [vmem:[%s4912_s29 + $0x8] sm:$0xff]  ;;  %s6118_s29 = smov 18  }
 0x53d   :  { %s4917_s2 = sld [smem:[%s6752_s0 + %s6118_s29]]  }
 0x55b   :  { %v1518_v52 = vpop.permute.xlu0 %1517 }
 0x55c   :  { %vm1520_vm13 = vcmp.eq.f32.partialorder %v6357_v50, %v1518_v52  ;;  %vm1521_vm14 = vcmp.eq.f32.partialorder %v6359_v51, %v1518_v52 }
 0x57d   :  { %v1536_v46 = vpop.permute.xlu1 %1535 }
 0x57e   :  { %vm1538_vm15 = vcmp.eq.f32.partialorder %v6357_v50, %v1536_v46  ;;  %vm1539_vm3 = vcmp.eq.f32.partialorder %v6359_v51, %v1536_v46  ;;  %v129_v46 = vld [vmem:[%s6428_s3] sm:$0xff] }
 0x5af   :  { %v1527_v49 = vpop.permute.xlu1 %1526 }
 0x5b0   :  { %v1529_v15 = vsel %vm1520_vm13, %v1527_v49, 0.0  ;;  %v1530_v55 = vsel %vm1521_vm14, %v1527_v49, 0.0  ;;  %v2045_v49 = vld [vmem:[%s4914_s7 + $0x8] sm:$0xff]  ;;  %s6120_s7 = smov 21  }
 0x5b1   :  { %v5882_v52 = vpack.c.bf16 %v2045_v49, %v2044_v48  ;;  %s6688_s10 = sld [smem:[%s6752_s0 + %s6120_s7]]  }
 0x5b3   :  { %v1544_v27 = vpop.permute.xlu1 %1543 }
 0x5b4   :  { %v1546_v17 = vsel %vm1538_vm15, %v1544_v27, 0.0  ;;  %v1547_v56 = vsel %vm1539_vm3, %v1544_v27, 0.0 }
 0x5b5   :  { %v1548_v16 = vadd.f32 %v1546_v17, %v1529_v15  ;;  %v1549_v57 = vadd.f32 %v1547_v56, %v1530_v55  ;;  %v5886_v56 = vpack.c.bf16 %v2047_v54, %v2046_v53 }
 0x5b7   :  { %5452 = vmatprep.mubr.msk.f32.mxu0 %vm445_vm1, %v1548_v16  ;;  %v1666_v60 = vpop.permute.xlu1 %1665 }
 0x5b8   :  { %5453 = vmatmul.mubr.msk.f32.vlgmr.msra.gmra.mrb[20].mxu0 %vm445_vm1, %v1549_v57  ;;  %v1668_v62 = vsel %vm1520_vm13, %v1666_v60, 0.0  ;;  %v1669_v63 = vsel %vm1521_vm14, %v1666_v60, 0.0 }
 0x5b9   :  { %5853 = vmatpush3.bf16.msra.mxu0 %v5850_v39  ;;  %v2037_v39 = vld [vmem:[%s6402_s19 + $0x18] sm:$0xff] }
 0x5ba   :  { %5855 = vmatprep.subr.bf16.mxu0 %v5854_v59 }
 0x5bb   :  { %v1676_v61 = vpop.permute.xlu1 %1675 }
 0x5bc   :  { %v1678_v0 = vsel %vm1538_vm15, %v1676_v61, 0.0  ;;  %v1679_v1 = vsel %vm1539_vm3, %v1676_v61, 0.0 }
 0x5bd   :  { %v1680_v2 = vadd.f32 %v1678_v0, %v1668_v62  ;;  %v1681_v3 = vadd.f32 %v1679_v1, %v1669_v63  ;;  %5857 = vmatpush3.bf16.msra.mxu0 %v5854_v59  ;;  %v4987_v62 = vld [vmem:[%s4913_s11] ss:$0 sm:$0xff]  ;;  %v131_v1 = vld [vmem:[%s6428_s3 + $0x10] sm:$0xff]  ;;  %s6121_s11 = smov 22  }
 0x5be   :  { %5867 = vmatprep.subr.bf16.mxu0 %v5866_v12  ;;  %s6693_s14 = sld [smem:[%s6752_s0 + %s6121_s11]]  }
 0x5bf   :  { %5459 = vmatprep.mubr.msk.f32.mxu1 %vm445_vm1, %v1680_v2  ;;  %v132_v2 = vld [vmem:[%s6428_s3 + $0x18] sm:$0xff]  ;;  %s6119_s3 = smov 20  }
 0x5c0   :  { %5460 = vmatmul.mubr.msk.f32.vlgmr.msra.gmra.mrb[16].mxu1 %vm445_vm1, %v1681_v3  ;;  %s4919_s6 = sld [smem:[%s6752_s0 + %s6119_s3]]  }
 0x5c1   :  { %5480 = vmatprep.mubr.msk.f32.mxu1 %vm445_vm1, %v6395_v8 }
 0x68b   :  { %v5454_v4 = vpop.f32.mrb[20].mxu0 }
 0x68c   :  { %v1622_v5 = vpop.f32.mrb[21].mxu0 }
 0x68d   :  { %5470 = vmatprep.mubr.msk.f32.mxu0 %vm165_vm0, %v1622_v5  ;;  %v4982_v5 = vld [vmem:[%s4911_s16] ss:$0 sm:$0xff]  ;;  %s6122_s16 = smov 23  }
 0x68e   :  { %5471 = vmatmul.mubr.msk.f32.vlgmr.msra.gmra.mrb[22].mxu0 %vm165_vm0, %v5454_v4 }
 0x68f   :  { %5869 = vmatpush3.bf16.msra.mxu0 %v5866_v12 }
 0x693   :  { %v5461_v6 = vpop.f32.mrb[16].mxu1 }
 0x694   :  { %v1754_v7 = vpop.f32.mrb[17].mxu1 }
 0x695   :  { %5473 = vmatprep.mubr.msk.f32.mxu0 %vm165_vm0, %v1754_v7 }
 0x696   :  { %5474 = vmatmul.mubr.msk.f32.gmra.mrb[24].mxu0 %vm165_vm0, %v5461_v6 }
 0x761   :  { %v5472_v14 = vpop.f32.mrb[22].mxu0 }
 0x762   :  { %v1861_v58 = vadd.f32 %v5472_v14, %v6155_v18  ;;  %v1841_v19 = vpop.f32.mrb[23].mxu0 }
 0x763   :  { %v1860_v24 = vadd.f32 %v1841_v19, %v6148_v9  ;;  %v4992_v19 = vld [vmem:[%s4915_s20] ss:$0 sm:$0xff] }
 0x764   :  { %v1871_v25 = vadd.f32 %v4977_v13, %v1861_v58 }
 0x765   :  { %v1870_v26 = vadd.f32 %v4977_v13, %v1860_v24 }
 0x767   :  { %v5858_v28 = vpack.c.bf16 %v1871_v25, %v1870_v26 }
 0x769   :  { %v5475_v29 = vpop.f32.mrb[24].mxu0  ;;  %5859 = vmatprep.subr.bf16.mxu1 %v5858_v28 }
 0x76a   :  { %v1863_v30 = vadd.f32 %v5475_v29, %v6165_v21  ;;  %v1851_v31 = vpop.f32.mrb[25].mxu0  ;;  %5861 = vmatpush3.bf16.msra.mxu1 %v5858_v28  ;;  %v5874_v21 = vpack.c.bf16 %v2040_v34, %v2039_v33 }
 0x76b   :  { %v1862_v18 = vadd.f32 %v1851_v31, %v6158_v20  ;;  %v2036_v20 = vld [vmem:[%s6402_s19 + $0x10] sm:$0xff]  ;;  %s4922_s19 = sld [smem:[%s6752_s0 + %s6122_s16]]  }
 0x76c   :  { %v1873_v9 = vadd.f32 %v4977_v13, %v1863_v30  ;;  %v5870_v41 = vpack.c.bf16 %v2037_v39, %v2036_v20  ;;  %v6507_v30 = vld [vmem:[%s6191_s25] sm:$0xff] }
 0x76d   :  { %v1872_v35 = vadd.f32 %v4977_v13, %v1862_v18  ;;  %5481 = vmatmul.mubr.msk.f32.vlgmr.msra.gmra.mrb[18].mxu1 %vm445_vm1, %v6416_v32 }
 0x76e   :  { %5487 = vmatprep.mubr.msk.f32.mxu1 %vm445_vm1, %v6395_v8  ;;  %5871 = vmatprep.subr.bf16.mxu0 %v5870_v41 }
 0x76f   :  { %v5862_v36 = vpack.c.bf16 %v1873_v9, %v1872_v35  ;;  %5873 = vmatpush3.bf16.msra.mxu0 %v5870_v41 }
 0x770   :  { %5883 = vmatprep.subr.bf16.mxu0 %v5882_v52 }
 0x771   :  { %5863 = vmatprep.subr.bf16.mxu1 %v5862_v36 }
 0x772   :  { %5865 = vmatpush3.bf16.msra.mxu1 %v5862_v36 }
 0x773   :  { %5875 = vmatprep.subr.bf16.mxu1 %v5874_v21 }
 0x775   :  { %5488 = vmatmul.mubr.msk.f32.vlgmr.msra.gmra.mrb[20].mxu1 %vm445_vm1, %v6416_v32 }
 0x776   :  { %5877 = vmatpush3.bf16.msra.mxu1 %v5874_v21  ;;  %5512 = vmatprep.mubr.msk.f32.mxu1 %vm165_vm0, %v129_v46 }
 0x777   :  { %5879 = vmatprep.subr.bf16.mxu1 %v5878_v45 }
 0x77a   :  { %5881 = vmatpush3.bf16.msra.mxu1 %v5878_v45 }
 0x77d   :  { %5513 = vmatmul.mubr.msk.f32.vlgmr.msra.gmra.mrb[22].mxu1 %vm165_vm0, %v130_v47 }
 0x77e   :  { %5515 = vmatprep.mubr.msk.f32.mxu1 %vm165_vm0, %v131_v1 }
 0x781   :  { %5516 = vmatmul.mubr.msk.f32.gmra.mrb[24].mxu1 %vm165_vm0, %v132_v2 }
 0x782   :  { %5536 = vmatprep.mubr.msk.f32.mxu1 %vm445_vm1, %v6194_v22 }
 0x840   :  { %v6439_v27 = vpop.f32.mrb[18].mxu1 }
 0x841   :  { %v6441_v15 = vpop.f32.mrb[19].mxu1  ;;  %v6447_v17 = vsub.f32 %v1871_v25, %v6439_v27 }
 0x842   :  { %v6444_v55 = vsub.f32 %v1870_v26, %v6441_v15 }
 0x844   :  { %5498 = vmatprep.mubr.msk.f32.mxu0 %vm165_vm0, %v6444_v55 }
 0x845   :  { %5499 = vmatmul.mubr.msk.f32.vlgmr.msra.gmra.mrb[26].mxu0 %vm165_vm0, %v6447_v17 }
 0x846   :  { %5885 = vmatpush3.bf16.msra.mxu0 %v5882_v52 }
 0x847   :  { %5887 = vmatprep.subr.bf16.mxu0 %v5886_v56 }
 0x848   :  { %v6453_v16 = vpop.f32.mrb[20].mxu1 }
 0x849   :  { %v6455_v57 = vpop.f32.mrb[21].mxu1  ;;  %v6461_v60 = vsub.f32 %v1873_v9, %v6453_v16 }
 0x84a   :  { %v6458_v59 = vsub.f32 %v1872_v35, %v6455_v57  ;;  %5889 = vmatpush3.bf16.msra.mxu0 %v5886_v56 }
 0x84c   :  { %5501 = vmatprep.mubr.msk.f32.mxu0 %vm165_vm0, %v6458_v59 }
 0x84d   :  { %5502 = vmatmul.mubr.msk.f32.gmra.mrb[28].mxu0 %vm165_vm0, %v6461_v60 }
 0x84e   :  { %5526 = vmatprep.mubr.msk.f32.mxu0 %vm165_vm0, %v129_v46 }
 0x850   :  { %v5514_v61 = vpop.f32.mrb[22].mxu1 }
 0x851   :  { %5527 = vmatmul.mubr.msk.f32.vlgmr.msra.gmra.mrb[30].mxu0 %vm165_vm0, %v130_v47  ;;  %v2247_v63 = vadd.f32 %v5514_v61, %v4987_v62  ;;  %v2241_v0 = vpop.f32.mrb[23].mxu1 }
 0x852   :  { %v2242_v3 = vadd.f32 %v4987_v62, %v2241_v0  ;;  %5529 = vmatprep.mubr.msk.f32.mxu0 %vm165_vm0, %v131_v1 }
 0x854   :  { %v5898_v4 = vpack.c.bf16 %v2247_v63, %v2242_v3  ;;  %v5517_v31 = vpop.f32.mrb[24].mxu1 }
 0x855   :  { %5530 = vmatmul.mubr.msk.f32.gmra.mrb[32].mxu0 %vm165_vm0, %v132_v2  ;;  %v2257_v9 = vadd.f32 %v5517_v31, %v4987_v62  ;;  %v2251_v33 = vpop.f32.mrb[25].mxu1 }
 0x856   :  { %5550 = vmatprep.mubr.msk.f32.mxu0 %vm445_vm1, %v6194_v22  ;;  %5899 = vmatprep.subr.bf16.mxu0 %v5898_v4  ;;  %v2252_v36 = vadd.f32 %v4987_v62, %v2251_v33 }
 0x857   :  { %5901 = vmatpush3.bf16.msra.mxu0 %v5898_v4 }
 0x858   :  { %v5922_v20 = vpack.c.bf16 %v2257_v9, %v2252_v36 }
 0x85a   :  { %5551 = vmatmul.mubr.msk.f32.vlgmr.msra.gmra.mrb[34].mxu0 %vm445_vm1, %v6213_v42 }
 0x85b   :  { %5564 = vmatprep.mubr.msk.f32.mxu0 %vm445_vm1, %v6194_v22 }
 0x918   :  { %v5500_v6 = vpop.f32.mrb[26].mxu0 }
 0x919   :  { %v2144_v7 = vadd.f32 %v5500_v6, %v4982_v5  ;;  %v2138_v10 = vpop.f32.mrb[27].mxu0 }
 0x91a   :  { %v2139_v11 = vadd.f32 %v4982_v5, %v2138_v10 }
 0x91c   :  { %v5890_v12 = vpack.c.bf16 %v2144_v7, %v2139_v11 }
 0x91e   :  { %5891 = vmatprep.subr.bf16.mxu1 %v5890_v12 }
 0x91f   :  { %5893 = vmatpush3.bf16.msra.mxu1 %v5890_v12 }
 0x920   :  { %v5503_v13 = vpop.f32.mrb[28].mxu0  ;;  %5895 = vmatprep.subr.bf16.mxu1 %v5890_v12 }
 0x921   :  { %v2154_v22 = vadd.f32 %v5503_v13, %v4982_v5  ;;  %v2148_v14 = vpop.f32.mrb[29].mxu0  ;;  %v6519_v13 = vld [vmem:[%s6186_s21 + $0x8] sm:$0xff] }
 0x922   :  { %v2149_v58 = vadd.f32 %v4982_v5, %v2148_v14  ;;  %5537 = vmatmul.mubr.msk.f32.vlgmr.msra.gmra.mrb[26].mxu1 %vm445_vm1, %v6213_v42  ;;  %v6093_v14 = vld [vmem:[%s6186_s21] sm:$0xff]  ;;  %s6116_s21 = smov 17  }
 0x923   :  { %5897 = vmatpush3.bf16.msra.mxu1 %v5890_v12  ;;  %5543 = vmatprep.mubr.msk.f32.mxu1 %vm445_vm1, %v6197_v23  ;;  %s4916_s23 = sld [smem:[%s6752_s0 + %s6116_s21]]  }
 0x924   :  { %v6496_v24 = vpack.c.bf16 %v2154_v22, %v2149_v58  ;;  %5903 = vmatprep.subr.bf16.mxu1 %v5898_v4  ;;  %v5528_v25 = vpop.f32.mrb[30].mxu0 }
 0x925   :  { %v2338_v26 = vadd.f32 %v5528_v25, %v4992_v19  ;;  %v2332_v28 = vpop.f32.mrb[31].mxu0 }
 0x926   :  { %5544 = vmatmul.mubr.msk.f32.vlgmr.msra.gmra.mrb[28].mxu1 %vm445_vm1, %v6216_v43  ;;  %v2333_v29 = vadd.f32 %v4992_v19, %v2332_v28 }
 0x927   :  { %5905 = vmatpush3.bf16.msra.mxu1 %v5898_v4  ;;  %5557 = vmatprep.mubr.msk.f32.mxu1 %vm445_vm1, %v6197_v23 }
 0x928   :  { %v6502_v42 = vpack.c.bf16 %v2338_v26, %v2333_v29  ;;  %v5531_v18 = vpop.f32.mrb[32].mxu0 }
 0x929   :  { %v2348_v34 = vadd.f32 %v5531_v18, %v4992_v19  ;;  %v2342_v35 = vpop.f32.mrb[33].mxu0 }
 0x92a   :  { %5558 = vmatmul.mubr.msk.f32.vlgmr.msra.gmra.mrb[30].mxu1 %vm445_vm1, %v6216_v43  ;;  %v2343_v21 = vadd.f32 %v4992_v19, %v2342_v35  ;;  %v6094_v19 = vld [vmem:[%s6191_s25 + $0x8] sm:$0xff] }
 0x92b   :  { %5571 = vmatprep.mubr.msk.f32.mxu1 %vm445_vm1, %v6507_v30 }
 0x92c   :  { %v6511_v23 = vpack.c.bf16 %v2348_v34, %v2343_v21 }
 0x92d   :  { %v5552_v39 = vpop.f32.mrb[34].mxu0 }
 0x92e   :  { %v2567_v40 = vpop.f32.mrb[35].mxu0 }
 0x9f5   :  { %v5538_v41 = vpop.f32.mrb[26].mxu1 }
 0x9f6   :  { %v2652_v43 = vmul.f32 %v5552_v39, %v5538_v41  ;;  %v2417_v44 = vpop.f32.mrb[27].mxu1 }
 0x9f7   :  { %v2651_v45 = vmul.f32 %v2567_v40, %v2417_v44 }
 0x9f9   :  { %v5545_v46 = vpop.f32.mrb[28].mxu1 }
 0x9fa   :  { %v2666_v47 = vmul.f32 %v5552_v39, %v5545_v46  ;;  %v2492_v48 = vpop.f32.mrb[29].mxu1 }
 0x9fb   :  { %v2665_v49 = vmul.f32 %v2567_v40, %v2492_v48 }
 0x9fd   :  { %v5559_v52 = vpop.f32.mrb[30].mxu1 }
 0x9fe   :  { %v2654_v53 = vmul.f32 %v5559_v52, %v5545_v46  ;;  %v2664_v54 = vmul.f32 %v5559_v52, %v5538_v41  ;;  %v2642_v56 = vpop.f32.mrb[31].mxu1 }
 0x9ff   :  { %v2653_v61 = vmul.f32 %v2642_v56, %v2492_v48  ;;  %v2663_v62 = vmul.f32 %v2642_v56, %v2417_v44 }
 0xa00   :  { %v2656_v63 = vadd.f32 %v2654_v53, %v2652_v43  ;;  %v2668_v0 = vsub.f32 %v2664_v54, %v2666_v47 }
 0xa01   :  { %v2655_v1 = vadd.f32 %v2653_v61, %v2651_v45  ;;  %v2667_v2 = vsub.f32 %v2663_v62, %v2665_v49 }
 0xa02   :  { %v2660_v3 = vsel %vm165_vm0, %v2656_v63, 0.0  ;;  %v2672_v6 = vsel %vm165_vm0, %v2668_v0, 0.0 }
 0xa03   :  { %2661 = vadd.xlane.f32.xlu0 %v2660_v3  ;;  %v2657_v4 = vsel %vm165_vm0, %v2655_v1, 0.0  ;;  %v2669_v5 = vsel %vm165_vm0, %v2667_v2, 0.0 }
 0xa04   :  { %2658 = vadd.xlane.f32.xlu1 %v2657_v4 }
 0xa08   :  { %2670 = vadd.xlane.f32.xlu1 %v2669_v5 }
 0xa0c   :  { %2673 = vadd.xlane.f32.xlu1 %v2672_v6 }
 0xa90   :  { %v2662_v7 = vpop.xlane.xlu0 %2661 }
 0xa91   :  { %v2659_v10 = vpop.xlane.xlu1 %2658 }
 0xa92   :  { %v5906_v11 = vpack.c.bf16 %v2662_v7, %v2659_v10 }
 0xa94   :  { %5907 = vmatprep.subr.bf16.mxu0 %v5906_v11 }
 0xa95   :  { %5909 = vmatpush3.bf16.msra.mxu0 %v5906_v11  ;;  %v2671_v12 = vpop.xlane.xlu1 %2670 }
 0xa96   :  { %5915 = vmatprep.subr.bf16.mxu0 %v6496_v24 }
 0xa98   :  { %5565 = vmatmul.mubr.msk.f32.vlgmr.msra.gmra.mrb[36].mxu0 %vm445_vm1, %v6519_v13 }
 0xa99   :  { %v2674_v22 = vpop.xlane.xlu1 %2673  ;;  %5917 = vmatpush3.bf16.msra.mxu0 %v6496_v24  ;;  %5578 = vmatprep.mubr.msk.f32.mxu0 %vm445_vm1, %v6093_v14 }
 0xa9a   :  { %v5910_v58 = vpack.c.bf16 %v2674_v22, %v2671_v12  ;;  %5923 = vmatprep.subr.bf16.mxu0 %v5922_v20 }
 0xa9c   :  { %5911 = vmatprep.subr.bf16.mxu1 %v5910_v58  ;;  %5579 = vmatmul.mubr.msk.f32.vlgmr.msra.gmra.mrb[38].mxu0 %vm445_vm1, %v6519_v13 }
 0xa9d   :  { %5913 = vmatpush3.bf16.msra.mxu1 %v5910_v58  ;;  %5925 = vmatpush3.bf16.msra.mxu0 %v5922_v20 }
 0xa9e   :  { %5919 = vmatprep.subr.bf16.mxu1 %v6496_v24  ;;  %5592 = vmatprep.mubr.msk.f32.mxu0 %vm445_vm1, %v6093_v14 }
 0xaa0   :  { %5572 = vmatmul.mubr.msk.f32.vlgmr.msra.gmra.mrb[32].mxu1 %vm445_vm1, %v6094_v19  ;;  %5593 = vmatmul.mubr.msk.f32.vlgmr.msra.gmra.mrb[40].mxu0 %vm445_vm1, %v6519_v13 }
 0xaa1   :  { %5921 = vmatpush3.bf16.msra.mxu1 %v6496_v24  ;;  %5585 = vmatprep.mubr.msk.f32.mxu1 %vm445_vm1, %v6507_v30 }
 0xaa2   :  { %5927 = vmatprep.subr.bf16.mxu1 %v5922_v20  ;;  %5606 = vmatprep.mubr.msk.f32.mxu0 %vm445_vm1, %v6093_v14 }
 0xaa4   :  { %5586 = vmatmul.mubr.msk.f32.vlgmr.msra.gmra.mrb[34].mxu1 %vm445_vm1, %v6094_v19 }
 0xaa5   :  { %5929 = vmatpush3.bf16.msra.mxu1 %v5922_v20  ;;  %5599 = vmatprep.mubr.msk.f32.mxu1 %vm445_vm1, %v6507_v30 }
 0xaa8   :  { %5600 = vmatmul.mubr.msk.f32.vlgmr.msra.gmra.mrb[36].mxu1 %vm445_vm1, %v6094_v19 }
 0xaa9   :  { %5613 = vmatprep.mubr.msk.f32.mxu1 %vm445_vm1, %v6507_v30 }
 0xb6b   :  { %v5566_v25 = vpop.f32.mrb[36].mxu0 }
 0xb6c   :  { %v2741_v26 = vpop.f32.mrb[37].mxu0 }
 0xb6f   :  { %v5580_v24 = vpop.f32.mrb[38].mxu0 }
 0xb70   :  { %v2895_v28 = vpop.f32.mrb[39].mxu0 }
 0xb73   :  { %v5573_v29 = vpop.f32.mrb[32].mxu1  ;;  %v5594_v31 = vpop.f32.mrb[40].mxu0 }
 0xb74   :  { %v2826_v18 = vsub.f32 %v5566_v25, %v5573_v29  ;;  %v2816_v9 = vpop.f32.mrb[33].mxu1  ;;  %v3130_v33 = vmul.f32 %v5594_v31, %v5580_v24  ;;  %v3045_v34 = vpop.f32.mrb[41].mxu0 }
 0xb75   :  { %v2825_v35 = vsub.f32 %v2741_v26, %v2816_v9  ;;  %v3129_v36 = vmul.f32 %v3045_v34, %v2895_v28 }
 0xb76   :  { %v6555_v12 = vmul.f32 0.001953125, %v2826_v18 }
 0xb77   :  { %v5587_v21 = vpop.f32.mrb[34].mxu1 }
 0xb78   :  { %v3144_v20 = vmul.f32 %v5594_v31, %v5587_v21  ;;  %v2970_v39 = vpop.f32.mrb[35].mxu1 }
 0xb79   :  { %v3143_v40 = vmul.f32 %v3045_v34, %v2970_v39 }
 0xb7b   :  { %v5601_v41 = vpop.f32.mrb[36].mxu1 }
 0xb7c   :  { %v3132_v43 = vmul.f32 %v5601_v41, %v5587_v21  ;;  %v3142_v44 = vmul.f32 %v5601_v41, %v5580_v24  ;;  %v3120_v30 = vpop.f32.mrb[37].mxu1 }
 0xb7d   :  { %v3131_v45 = vmul.f32 %v3120_v30, %v2970_v39  ;;  %v3141_v46 = vmul.f32 %v3120_v30, %v2895_v28 }
 0xb7e   :  { %v3134_v47 = vadd.f32 %v3132_v43, %v3130_v33  ;;  %v3146_v48 = vsub.f32 %v3142_v44, %v3144_v20 }
 0xb7f   :  { %v3133_v49 = vadd.f32 %v3131_v45, %v3129_v36  ;;  %v3145_v52 = vsub.f32 %v3141_v46, %v3143_v40 }
 0xb80   :  { %v3138_v53 = vsel %vm165_vm0, %v3134_v47, 0.0  ;;  %v3150_v56 = vsel %vm165_vm0, %v3146_v48, 0.0 }
 0xb81   :  { %3139 = vadd.xlane.f32.xlu1 %v3138_v53  ;;  %v3135_v54 = vsel %vm165_vm0, %v3133_v49, 0.0  ;;  %v3147_v61 = vsel %vm165_vm0, %v3145_v52, 0.0 }
 0xb82   :  { %3136 = vadd.xlane.f32.xlu0 %v3135_v54 }
 0xb85   :  { %3151 = vadd.xlane.f32.xlu1 %v3150_v56 }
 0xb86   :  { %3148 = vadd.xlane.f32.xlu0 %v3147_v61 }
 0xc0e   :  { %v3140_v62 = vpop.xlane.xlu1 %3139 }
 0xc0f   :  { %v3137_v63 = vpop.xlane.xlu0 %3136 }
 0xc10   :  { %v5930_v0 = vpack.c.bf16 %v3140_v62, %v3137_v63 }
 0xc12   :  { %v3152_v1 = vpop.xlane.xlu1 %3151  ;;  %5931 = vmatprep.subr.bf16.mxu0 %v5930_v0 }
 0xc13   :  { %5933 = vmatpush3.bf16.msra.mxu0 %v5930_v0  ;;  %v3149_v2 = vpop.xlane.xlu0 %3148 }
 0xc14   :  { %v5934_v3 = vpack.c.bf16 %v3152_v1, %v3149_v2  ;;  %5939 = vmatprep.subr.bf16.mxu0 %v6502_v42 }
 0xc16   :  { %5935 = vmatprep.subr.bf16.mxu1 %v5934_v3  ;;  %5607 = vmatmul.mubr.msk.f32.vlgmr.msra.gmra.mrb[42].mxu0 %vm445_vm1, %v6519_v13  ;;  %v6559_v13 = vmul.f32 0.001953125, %v2825_v35 }
 0xc17   :  { %5937 = vmatpush3.bf16.msra.mxu1 %v5934_v3  ;;  %5941 = vmatpush3.bf16.msra.mxu0 %v6502_v42 }
 0xc18   :  { %5943 = vmatprep.subr.bf16.mxu1 %v6511_v23 }
 0xc1a   :  { %5614 = vmatmul.mubr.msk.f32.vlgmr.msra.gmra.mrb[38].mxu1 %vm445_vm1, %v6094_v19 }
 0xc1b   :  { %5945 = vmatpush3.bf16.msra.mxu1 %v6511_v23 }
 0xce9   :  { %v5608_v4 = vpop.f32.mrb[42].mxu0 }
 0xcea   :  { %v3219_v5 = vpop.f32.mrb[43].mxu0 }
 0xced   :  { %v5615_v6 = vpop.f32.mrb[38].mxu1 }
 0xcee   :  { %v3304_v7 = vsub.f32 %v5608_v4, %v5615_v6  ;;  %v3294_v10 = vpop.f32.mrb[39].mxu1 }
 0xcef   :  { %v3303_v11 = vsub.f32 %v3219_v5, %v3294_v10 }
 0xcf0   :  { %v6557_v22 = vmul.f32 0.001953125, %v3304_v7 }
 0xcf1   :  { %v6561_v14 = vmul.f32 0.001953125, %v3303_v11 }
 0xcf2   :  { %v3308_v42 = vadd.f32 %v6557_v22, %v6555_v12 }
 0xcf3   :  { %v3307_v23 = vadd.f32 %v6561_v14, %v6559_v13 }
 0xcf4   :  { %v3310_v58 = vmul.f32 0.5, %v3308_v42 }
 0xcf5   :  { %v3309_v19 = vmul.f32 0.5, %v3307_v23 }
 0xcf6   :  { %v3312_v25 = vsel %vm1423_vm2, %v3310_v58, -inf }
 0xcf7   :  { %v3311_v26 = vsel %vm1423_vm2, %v3309_v19, -inf }
 0xcf8   :  { %v3313_v24 = vmax.f32 %v3311_v26, %v3312_v25 }
 0xcfa   :  { %v3314_v28 = vrot.slane %v3313_v24, 4 }
 0xcfc   :  { %v3315_v29 = vmax.f32 %v3313_v24, %v3314_v28 }
 0xcfe   :  { %v3316_v31 = vrot.slane %v3315_v29, 2 }
 0xd00   :  { %v3317_v18 = vmax.f32 %v3315_v29, %v3316_v31 }
 0xd02   :  { %v3318_v9 = vrot.slane %v3317_v18, 1 }
 0xd04   :  { %v3319_v33 = vmax.f32 %v3317_v18, %v3318_v9 }
 0xd06   :  { %vm3320_vm4 = vcmp.ge.f32.partialorder %v3309_v19, %v3319_v33  ;;  %vm3321_vm5 = vcmp.ge.f32.partialorder %v3310_v58, %v3319_v33 }
 0xd07   :  { %v3322_v34 = vsel %vm3320_vm4, %v6305_v37, 16.0  ;;  %v3323_v35 = vsel %vm3321_vm5, %v6307_v38, 16.0 }
 0xd08   :  { %v3324_v36 = vsel %vm1423_vm2, %v3322_v34, inf  ;;  %v3325_v21 = vsel %vm1423_vm2, %v3323_v35, inf }
 0xd09   :  { %v3326_v20 = vmin.f32 %v3324_v36, %v3325_v21 }
 0xd0b   :  { %v3327_v39 = vrot.slane %v3326_v20, 4 }
 0xd0d   :  { %v3328_v40 = vmin.f32 %v3326_v20, %v3327_v39 }
 0xd0f   :  { %v3329_v41 = vrot.slane %v3328_v40, 2 }
 0xd11   :  { %v3330_v43 = vmin.f32 %v3328_v40, %v3329_v41 }
 0xd13   :  { %v3331_v44 = vrot.slane %v3330_v43, 1 }
 0xd15   :  { %v3332_v30 = vmin.f32 %v3330_v43, %v3331_v44 }
 0xd17   :  { %3393 = vperm.xlu0 %6065, %v3332_v30   ;;  %vm3333_vm6 = vcmp.eq.f32.partialorder %v6305_v37, %v3332_v30  ;;  %vm3334_vm7 = vcmp.eq.f32.partialorder %v6307_v38, %v3332_v30 }
 0xd18   :  { %v3335_v45 = vsel %vm3333_vm6, -1e+30, %v3309_v19  ;;  %v3336_v46 = vsel %vm3334_vm7, -1e+30, %v3310_v58  ;;  %v3359_v63 = vsel %vm3333_vm6, %v6559_v13, 0.0  ;;  %v3360_v0 = vsel %vm3334_vm7, %v6555_v12, 0.0 }
 0xd19   :  { %v3337_v47 = vsel %vm1423_vm2, %v3335_v45, -inf  ;;  %v3338_v48 = vsel %vm1423_vm2, %v3336_v46, -inf  ;;  %v3507_v3 = vsel %vm3333_vm6, %v6561_v14, 0.0  ;;  %v3508_v4 = vsel %vm3334_vm7, %v6557_v22, 0.0 }
 0xd1a   :  { %v3339_v49 = vmax.f32 %v3337_v47, %v3338_v48  ;;  %v3361_v10 = vsel %vm1423_vm2, %v3359_v63, 0.0  ;;  %v3362_v11 = vsel %vm1423_vm2, %v3360_v0, 0.0  ;;  %v3509_v42 = vsel %vm1423_vm2, %v3507_v3, 0.0 }
 0xd1b   :  { %v3510_v23 = vsel %vm1423_vm2, %v3508_v4, 0.0  ;;  %v3363_v25 = vadd.f32 %v3362_v11, %v3361_v10 }
 0xd1c   :  { %v3340_v52 = vrot.slane %v3339_v49, 4  ;;  %v3511_v26 = vadd.f32 %v3510_v23, %v3509_v42 }
 0xd1d   :  { %v3364_v29 = vrot.slane %v3363_v25, 4 }
 0xd1e   :  { %v3341_v53 = vmax.f32 %v3339_v49, %v3340_v52  ;;  %v3512_v31 = vrot.slane %v3511_v26, 4 }
 0xd1f   :  { %v3365_v33 = vadd.f32 %v3364_v29, %v3363_v25 }
 0xd20   :  { %v3342_v54 = vrot.slane %v3341_v53, 2  ;;  %v3513_v34 = vadd.f32 %v3512_v31, %v3511_v26 }
 0xd21   :  { %v3366_v44 = vrot.slane %v3365_v33, 2 }
 0xd22   :  { %v3343_v56 = vmax.f32 %v3341_v53, %v3342_v54 }
 0xd24   :  { %v3344_v61 = vrot.slane %v3343_v56, 1 }
 0xd26   :  { %v3345_v62 = vmax.f32 %v3343_v56, %v3344_v61 }
 0xd28   :  { %vm3346_vm8 = vcmp.ge.f32.partialorder %v3335_v45, %v3345_v62  ;;  %vm3347_vm9 = vcmp.ge.f32.partialorder %v3336_v46, %v3345_v62  ;;  %v3367_v46 = vadd.f32 %v3366_v44, %v3365_v33  ;;  %v2052_v44 = vld [vmem:[%s4916_s23 + $0x18] sm:$0xff] }
 0xd29   :  { %v3348_v1 = vsel %vm3346_vm8, %v6305_v37, 16.0  ;;  %v3349_v2 = vsel %vm3347_vm9, %v6307_v38, 16.0 }
 0xd2a   :  { %v3350_v5 = vsel %vm1423_vm2, %v3348_v1, inf  ;;  %v3351_v6 = vsel %vm1423_vm2, %v3349_v2, inf  ;;  %v3368_v49 = vrot.slane %v3367_v46, 1 }
 0xd2b   :  { %v3352_v7 = vmin.f32 %v3350_v5, %v3351_v6 }
 0xd2c   :  { %v3369_v62 = vadd.f32 %v3368_v49, %v3367_v46 }
 0xd2d   :  { %v3353_v58 = vrot.slane %v3352_v7, 4 }
 0xd2f   :  { %v3354_v19 = vmin.f32 %v3352_v7, %v3353_v58 }
 0xd31   :  { %v3355_v24 = vrot.slane %v3354_v19, 2 }
 0xd33   :  { %v3356_v28 = vmin.f32 %v3354_v19, %v3355_v24 }
 0xd35   :  { %v3357_v18 = vrot.slane %v3356_v28, 1 }
 0xd37   :  { %v3358_v9 = vmin.f32 %v3356_v28, %v3357_v18 }
 0xd39   :  { %3411 = vperm.xlu1 %6066, %v3358_v9   ;;  %vm3370_vm10 = vcmp.eq.f32.partialorder %v6305_v37, %v3358_v9  ;;  %vm3371_vm11 = vcmp.eq.f32.partialorder %v6307_v38, %v3358_v9  ;;  %v3514_v37 = vrot.slane %v3513_v34, 2 }
 0xd3a   :  { %v3372_v35 = vsel %vm3370_vm10, %v6559_v13, 0.0  ;;  %v3373_v36 = vsel %vm3371_vm11, %v6555_v12, 0.0  ;;  %v3518_v21 = vsel %vm3370_vm10, %v6561_v14, 0.0  ;;  %v3519_v20 = vsel %vm3371_vm11, %v6557_v22, 0.0 }
 0xd3b   :  { %v3374_v39 = vsel %vm1423_vm2, %v3372_v35, 0.0  ;;  %v3375_v40 = vsel %vm1423_vm2, %v3373_v36, 0.0  ;;  %v3520_v41 = vsel %vm1423_vm2, %v3518_v21, 0.0  ;;  %v3521_v43 = vsel %vm1423_vm2, %v3519_v20, 0.0  ;;  %v2049_v35 = vld [vmem:[%s4916_s23] sm:$0xff]  ;;  %v2050_v36 = vld [vmem:[%s4916_s23 + $0x8] sm:$0xff] }
 0xd3c   :  { %v3376_v30 = vadd.f32 %v3375_v40, %v3374_v39  ;;  %v3522_v38 = vadd.f32 %v3521_v43, %v3520_v41  ;;  %v3515_v12 = vadd.f32 %v3514_v37, %v3513_v34  ;;  %v5946_v21 = vpack.c.bf16 %v2050_v36, %v2049_v35  ;;  %v2051_v43 = vld [vmem:[%s4916_s23 + $0x10] sm:$0xff] }
 0xd3e   :  { %v3377_v45 = vrot.slane %v3376_v30, 4  ;;  %v3523_v13 = vrot.slane %v3522_v38, 4  ;;  %v3516_v52 = vrot.slane %v3515_v12, 1  ;;  %5947 = vmatprep.subr.bf16.mxu0 %v5946_v21 }
 0xd40   :  { %v3378_v47 = vadd.f32 %v3377_v45, %v3376_v30  ;;  %v3524_v14 = vadd.f32 %v3523_v13, %v3522_v38  ;;  %v3517_v63 = vadd.f32 %v3516_v52, %v3515_v12  ;;  %v5950_v12 = vpack.c.bf16 %v2052_v44, %v2051_v43 }
 0xd42   :  { %v3379_v48 = vrot.slane %v3378_v47, 2  ;;  %v3525_v22 = vrot.slane %v3524_v14, 2 }
 0xd44   :  { %v3380_v53 = vadd.f32 %v3379_v48, %v3378_v47  ;;  %v3526_v54 = vadd.f32 %v3525_v22, %v3524_v14 }
 0xd46   :  { %v3381_v56 = vrot.slane %v3380_v53, 1  ;;  %v3527_v61 = vrot.slane %v3526_v54, 1 }
 0xd48   :  { %v3382_v0 = vadd.f32 %v3381_v56, %v3380_v53  ;;  %v3528_v1 = vadd.f32 %v3527_v61, %v3526_v54 }
 0xd4a   :  { %v3529_v2 = vmax.f32 %v3517_v63, %v3528_v1  ;;  %v3383_v3 = vmax.f32 %v3369_v62, %v3382_v0 }
 0xd4c   :  { %v3530_v4 = vsub.f32 %v3517_v63, %v3529_v2  ;;  %v3384_v5 = vsub.f32 %v3369_v62, %v3383_v3  ;;  %v3387_v6 = vsub.f32 %v3382_v0, %v3383_v3  ;;  %v3533_v7 = vsub.f32 %v3528_v1, %v3529_v2  ;;  %v3904_v62 = vld [vmem:[%s6639_s28] sm:$0xff]  ;;  %v3905_v63 = vld [vmem:[%s6639_s28 + $0x8] sm:$0xff] }
 0xd4d   :  { %v5962_v0 = vpack.c.bf16 %v3905_v63, %v3904_v62  ;;  %v5029_v1 = vld [vmem:[%s4917_s2] ss:$0 sm:$0xff]  ;;  %v6096_v62 = vld [vmem:[%s6392_s15 + $0x8] sm:$0xff]  ;;  %v4278_v63 = vld [vmem:[%s6688_s10 + $0x10] sm:$0xff] }
 0xd4e   :  { %v3531_v10 = vmul.f32 1.442695, %v3530_v4  ;;  %v3385_v11 = vmul.f32 1.442695, %v3384_v5  ;;  %v3388_v42 = vmul.f32 1.442695, %v3387_v6 }
 0xd4f   :  { %v3534_v23 = vmul.f32 1.442695, %v3533_v7 }
 0xd50   :  { %6079 = vpow2.f32 %v3531_v10 }
 0xd51   :  { %6081 = vpow2.f32 %v3385_v11 }
 0xd52   :  { %6083 = vpow2.f32 %v3388_v42 }
 0xd53   :  { %6085 = vpow2.f32 %v3534_v23 }
 0xd5a   :  { %v6080_v58 = vpop.eup %6079 }
 0xd5b   :  { %v6082_v19 = vpop.eup %6081 }
 0xd5c   :  { %v6084_v25 = vpop.eup %6083 }
 0xd5d   :  { %v6086_v26 = vpop.eup %6085  ;;  %v3390_v24 = vadd.f32 %v6084_v25, %v6082_v19 }
 0xd5e   :  { %v3536_v28 = vadd.f32 %v6086_v26, %v6080_v58 }
 0xd5f   :  { %6087 = vrcp.f32 %v3390_v24  ;;  %v3909_v24 = vld [vmem:[%s4919_s6 + $0x8] sm:$0xff] }
 0xd60   :  { %6089 = vrcp.f32 %v3536_v28 }
 0xd69   :  { %v6088_v29 = vpop.eup %6087 }
 0xd6a   :  { %v3416_v31 = vmul.f32 %v6088_v29, %v6084_v25  ;;  %v3399_v18 = vmul.f32 %v6088_v29, %v6082_v19  ;;  %v6090_v9 = vpop.eup %6089 }
 0xd6b   :  { %v3548_v33 = vmul.f32 %v6090_v9, %v6086_v26  ;;  %v3538_v34 = vmul.f32 %v6090_v9, %v6080_v58 }
 0xd6c   :  { %3419 = vperm.xlu0 %6065, %v3416_v31   ;;  %3402 = vperm.xlu1 %6066, %v3399_v18  }
 0xd70   :  { %3551 = vperm.xlu0 %6065, %v3548_v33   ;;  %3541 = vperm.xlu1 %6066, %v3538_v34  }
 0xd96   :  { %v3394_v20 = vpop.permute.xlu0 %3393 }
 0xd97   :  { %vm3396_vm2 = vcmp.eq.f32.partialorder %v6357_v50, %v3394_v20  ;;  %vm3397_vm14 = vcmp.eq.f32.partialorder %v6359_v51, %v3394_v20 }
 0xdb8   :  { %v3412_v39 = vpop.permute.xlu1 %3411 }
 0xdb9   :  { %vm3414_vm12 = vcmp.eq.f32.partialorder %v6357_v50, %v3412_v39  ;;  %vm3415_vm13 = vcmp.eq.f32.partialorder %v6359_v51, %v3412_v39  ;;  %v3911_v39 = vld [vmem:[%s4919_s6 + $0x18] sm:$0xff] }
 0xdeb   :  { %v3420_v40 = vpop.permute.xlu0 %3419  ;;  %v3403_v41 = vpop.permute.xlu1 %3402 }
 0xdec   :  { %v3405_v37 = vsel %vm3396_vm2, %v3403_v41, 0.0  ;;  %v3422_v30 = vsel %vm3414_vm12, %v3420_v40, 0.0  ;;  %v3423_v38 = vsel %vm3415_vm13, %v3420_v40, 0.0  ;;  %v3406_v45 = vsel %vm3397_vm14, %v3403_v41, 0.0 }
 0xded   :  { %v3424_v13 = vadd.f32 %v3422_v30, %v3405_v37  ;;  %v3425_v46 = vadd.f32 %v3423_v38, %v3406_v45 }
 0xdef   :  { %v3552_v47 = vpop.permute.xlu0 %3551  ;;  %5620 = vmatprep.mubr.msk.f32.mxu0 %vm445_vm1, %v3424_v13  ;;  %v3542_v14 = vpop.permute.xlu1 %3541 }
 0xdf0   :  { %v3554_v48 = vsel %vm3414_vm12, %v3552_v47, 0.0  ;;  %v3555_v22 = vsel %vm3415_vm13, %v3552_v47, 0.0  ;;  %v3544_v49 = vsel %vm3396_vm2, %v3542_v14, 0.0  ;;  %v3545_v52 = vsel %vm3397_vm14, %v3542_v14, 0.0  ;;  %5621 = vmatmul.mubr.msk.f32.vlgmr.msra.gmra.mrb[44].mxu0 %vm445_vm1, %v3425_v46  ;;  %v4277_v47 = vld [vmem:[%s6688_s10 + $0x8] sm:$0xff] }
 0xdf1   :  { %v3556_v53 = vadd.f32 %v3554_v48, %v3544_v49  ;;  %v3557_v54 = vadd.f32 %v3555_v22, %v3545_v52  ;;  %5949 = vmatpush3.bf16.msra.mxu0 %v5946_v21 }
 0xdf2   :  { %5951 = vmatprep.subr.bf16.mxu0 %v5950_v12 }
 0xdf3   :  { %5627 = vmatprep.mubr.msk.f32.mxu1 %vm445_vm1, %v3556_v53 }
 0xdf4   :  { %5628 = vmatmul.mubr.msk.f32.vlgmr.msra.gmra.mrb[40].mxu1 %vm445_vm1, %v3557_v54  ;;  %v4280_v54 = vld [vmem:[%s6693_s14] sm:$0xff] }
 0xdf5   :  { %5953 = vmatpush3.bf16.msra.mxu0 %v5950_v12  ;;  %5648 = vmatprep.mubr.msk.f32.mxu1 %vm445_vm1, %v6395_v8  ;;  %v4276_v12 = vld [vmem:[%s6688_s10] sm:$0xff] }
 0xdf6   :  { %5963 = vmatprep.subr.bf16.mxu0 %v5962_v0  ;;  %v5986_v49 = vpack.c.bf16 %v4277_v47, %v4276_v12 }
 0xec3   :  { %v5622_v56 = vpop.f32.mrb[44].mxu0 }
 0xec4   :  { %v3498_v50 = vpop.f32.mrb[45].mxu0 }
 0xec5   :  { %5638 = vmatprep.mubr.msk.f32.mxu0 %vm165_vm0, %v3498_v50 }
 0xec6   :  { %5639 = vmatmul.mubr.msk.f32.vlgmr.msra.gmra.mrb[46].mxu0 %vm165_vm0, %v5622_v56  ;;  %v4281_v56 = vld [vmem:[%s6693_s14 + $0x8] sm:$0xff] }
 0xec7   :  { %v5629_v51 = vpop.f32.mrb[40].mxu1  ;;  %5965 = vmatpush3.bf16.msra.mxu0 %v5962_v0  ;;  %v4279_v0 = vld [vmem:[%s6688_s10 + $0x18] sm:$0xff] }
 0xec8   :  { %v3630_v61 = vpop.f32.mrb[41].mxu1 }
 0xec9   :  { %5641 = vmatprep.mubr.msk.f32.mxu0 %vm165_vm0, %v3630_v61  ;;  %v5994_v61 = vpack.c.bf16 %v4281_v56, %v4280_v54 }
 0xeca   :  { %5642 = vmatmul.mubr.msk.f32.gmra.mrb[48].mxu0 %vm165_vm0, %v5629_v51 }
 0xf99   :  { %v5640_v2 = vpop.f32.mrb[46].mxu0 }
 0xf9a   :  { %v3737_v3 = vadd.f32 %v5640_v2, %v6447_v17  ;;  %v3717_v4 = vpop.f32.mrb[47].mxu0  ;;  %v3907_v17 = vld [vmem:[%s6639_s28 + $0x18] sm:$0xff]  ;;  %v5990_v2 = vpack.c.bf16 %v4279_v0, %v4278_v63 }
 0xf9b   :  { %v3736_v5 = vadd.f32 %v3717_v4, %v6444_v55  ;;  %v3906_v55 = vld [vmem:[%s6639_s28 + $0x10] sm:$0xff] }
 0xf9c   :  { %v3747_v6 = vadd.f32 %v5029_v1, %v3737_v3  ;;  %v4283_v3 = vld [vmem:[%s6693_s14 + $0x18] sm:$0xff] }
 0xf9d   :  { %v3746_v7 = vadd.f32 %v5029_v1, %v3736_v5  ;;  %v5643_v10 = vpop.f32.mrb[48].mxu0  ;;  %v4284_v5 = vld [vmem:[%s4922_s19] sm:$0xff] }
 0xf9e   :  { %v3739_v11 = vadd.f32 %v5643_v10, %v6461_v60  ;;  %v3727_v42 = vpop.f32.mrb[49].mxu0  ;;  %v3908_v60 = vld [vmem:[%s4919_s6] sm:$0xff] }
 0xf9f   :  { %v3738_v23 = vadd.f32 %v3727_v42, %v6458_v59  ;;  %v5954_v58 = vpack.c.bf16 %v3747_v6, %v3746_v7  ;;  %v5966_v59 = vpack.c.bf16 %v3907_v17, %v3906_v55  ;;  %v5970_v28 = vpack.c.bf16 %v3909_v24, %v3908_v60  ;;  %v4287_v42 = vld [vmem:[%s4922_s19 + $0x18] sm:$0xff] }
 0xfa0   :  { %v3749_v19 = vadd.f32 %v5029_v1, %v3739_v11  ;;  %v4286_v11 = vld [vmem:[%s4922_s19 + $0x10] sm:$0xff] }
 0xfa1   :  { %v3748_v25 = vadd.f32 %v5029_v1, %v3738_v23  ;;  %5955 = vmatprep.subr.bf16.mxu1 %v5954_v58  ;;  %5967 = vmatprep.subr.bf16.mxu0 %v5966_v59  ;;  %v4282_v1 = vld [vmem:[%s6693_s14 + $0x10] sm:$0xff]  ;;  %v6006_v55 = vpack.c.bf16 %v4287_v42, %v4286_v11 }
 0xfa2   :  { %5957 = vmatpush3.bf16.msra.mxu1 %v5954_v58  ;;  %5969 = vmatpush3.bf16.msra.mxu0 %v5966_v59  ;;  %v5998_v4 = vpack.c.bf16 %v4283_v3, %v4282_v1 }
 0xfa3   :  { %v5958_v26 = vpack.c.bf16 %v3749_v19, %v3748_v25 }
 0xfa5   :  { %5649 = vmatmul.mubr.msk.f32.vlgmr.msra.gmra.mrb[42].mxu1 %vm445_vm1, %v6416_v32  ;;  %5959 = vmatprep.subr.bf16.mxu1 %v5958_v26 }
 0xfa6   :  { %5961 = vmatpush3.bf16.msra.mxu1 %v5958_v26  ;;  %5655 = vmatprep.mubr.msk.f32.mxu1 %vm445_vm1, %v6395_v8 }
 0xfa7   :  { %5971 = vmatprep.subr.bf16.mxu1 %v5970_v28 }
 0xfa9   :  { %5656 = vmatmul.mubr.msk.f32.vlgmr.msra.gmra.mrb[44].mxu1 %vm445_vm1, %v6416_v32 }
 0xfaa   :  { %5973 = vmatpush3.bf16.msra.mxu1 %v5970_v28 }
0x1078   :  { %v5650_v29 = vpop.f32.mrb[42].mxu1 }
0x1079   :  { %v6662_v31 = vadd.f32 %v5650_v29, %v6439_v27  ;;  %v3816_v32 = vpop.f32.mrb[43].mxu1  ;;  %v3826_v33 = vsub.f32 %v3747_v6, %v5650_v29  ;;  %v4285_v6 = vld [vmem:[%s4922_s19 + $0x8] sm:$0xff] }
0x107a   :  { %v3825_v18 = vsub.f32 %v3746_v7, %v3816_v32  ;;  %v6665_v9 = vadd.f32 %v3816_v32, %v6441_v15  ;;  %v3910_v15 = vld [vmem:[%s4919_s6 + $0x10] sm:$0xff]  ;;  %v6002_v7 = vpack.c.bf16 %v4285_v6, %v4284_v5 }
0x107c   :  { %v5657_v34 = vpop.f32.mrb[44].mxu1  ;;  %5666 = vmatprep.mubr.msk.f32.mxu0 %vm165_vm0, %v3825_v18 }
0x107d   :  { %v6669_v35 = vadd.f32 %v5657_v34, %v6453_v16  ;;  %v3893_v36 = vpop.f32.mrb[45].mxu1  ;;  %5667 = vmatmul.mubr.msk.f32.vlgmr.msra.gmra.mrb[50].mxu0 %vm165_vm0, %v3826_v33  ;;  %v3903_v27 = vsub.f32 %v3749_v19, %v5657_v34  ;;  %v5974_v16 = vpack.c.bf16 %v3911_v39, %v3910_v15 }
0x107e   :  { %v3902_v21 = vsub.f32 %v3748_v25, %v3893_v36  ;;  %v6673_v20 = vadd.f32 %v3893_v36, %v6455_v57 }
0x107f   :  { %5975 = vmatprep.subr.bf16.mxu1 %v5974_v16 }
0x1080   :  { %5669 = vmatprep.mubr.msk.f32.mxu0 %vm165_vm0, %v3902_v21  ;;  %5977 = vmatpush3.bf16.msra.mxu1 %v5974_v16 }
0x1081   :  { %5670 = vmatmul.mubr.msk.f32.gmra.mrb[52].mxu0 %vm165_vm0, %v3903_v27 }
0x1082   :  { %5690 = vmatprep.mubr.msk.f32.mxu0 %vm445_vm1, %v6395_v8  ;;  %v6095_v8 = vld [vmem:[%s6392_s15] sm:$0xff]  ;;  %s6123_s15 = smov 29  }
0x1083   :  { %s4928_s25 = sld [smem:[%s6752_s0 + %s6123_s15]]  }
0x1150   :  { %v5668_v40 = vpop.f32.mrb[50].mxu0 }
0x1151   :  { %v3990_v41 = vpop.f32.mrb[51].mxu0  ;;  %v4010_v44 = vmax.f32 %v5668_v40, 0.0  ;;  %v4291_v40 = vld [vmem:[%s4927_s30 + $0x8] sm:$0xff] }
0x1152   :  { %v4009_v43 = vmax.f32 %v3990_v41, 0.0 }
0x1154   :  { %v5671_v57 = vpop.f32.mrb[52].mxu0  ;;  %5680 = vmatprep.mubr.msk.f32.mxu1 %vm165_vm0, %v4009_v43  ;;  %v4880_v43 = vld [vmem:[%s4901_s4 + $0x8] sm:$0xff] }
0x1155   :  { %v4000_v37 = vpop.f32.mrb[53].mxu0  ;;  %5681 = vmatmul.mubr.msk.f32.vlgmr.msra.gmra.mrb[46].mxu1 %vm165_vm0, %v4010_v44  ;;  %v4012_v38 = vmax.f32 %v5671_v57, 0.0  ;;  %v4879_v44 = vld [vmem:[%s4901_s4] sm:$0xff] }
0x1156   :  { %v4011_v30 = vmax.f32 %v4000_v37, 0.0 }
0x1158   :  { %5683 = vmatprep.mubr.msk.f32.mxu1 %vm165_vm0, %v4011_v30 }
0x1159   :  { %5684 = vmatmul.mubr.msk.f32.gmra.mrb[48].mxu1 %vm165_vm0, %v4012_v38 }
0x115a   :  { %5697 = vmatprep.mubr.msk.f32.mxu1 %vm445_vm1, %v6095_v8  ;;  %v4882_v8 = vld [vmem:[%s4901_s4 + $0x18] sm:$0xff] }
0x1228   :  { %v5682_v45 = vpop.f32.mrb[46].mxu1 }
0x1229   :  { %v4111_v13 = vadd.f32 %v5682_v45, %v3826_v33  ;;  %v4091_v46 = vpop.f32.mrb[47].mxu1  ;;  %v4881_v45 = vld [vmem:[%s4901_s4 + $0x10] sm:$0xff] }
0x122a   :  { %v4110_v14 = vadd.f32 %v4091_v46, %v3825_v18 }
0x122c   :  { %v5978_v48 = vpack.c.bf16 %v4111_v13, %v4110_v14  ;;  %v5685_v22 = vpop.f32.mrb[48].mxu1 }
0x122d   :  { %v4113_v52 = vadd.f32 %v5685_v22, %v3903_v27  ;;  %v4101_v53 = vpop.f32.mrb[49].mxu1 }
0x122e   :  { %v4112_v50 = vadd.f32 %v4101_v53, %v3902_v21  ;;  %5979 = vmatprep.subr.bf16.mxu0 %v5978_v48  ;;  %v4290_v21 = vld [vmem:[%s4927_s30] sm:$0xff] }
0x122f   :  { %5981 = vmatpush3.bf16.msra.mxu0 %v5978_v48 }
0x1230   :  { %v5982_v51 = vpack.c.bf16 %v4113_v52, %v4112_v50  ;;  %5987 = vmatprep.subr.bf16.mxu0 %v5986_v49 }
0x1232   :  { %5691 = vmatmul.mubr.msk.f32.vlgmr.msra.gmra.mrb[54].mxu0 %vm445_vm1, %v6096_v62  ;;  %5983 = vmatprep.subr.bf16.mxu1 %v5982_v51 }
0x1233   :  { %5985 = vmatpush3.bf16.msra.mxu1 %v5982_v51  ;;  %5989 = vmatpush3.bf16.msra.mxu0 %v5986_v49 }
0x1234   :  { %5995 = vmatprep.subr.bf16.mxu1 %v5994_v61  ;;  %5991 = vmatprep.subr.bf16.mxu0 %v5990_v2 }
0x1236   :  { %5698 = vmatmul.mubr.msk.f32.vlgmr.msra.gmra.mrb[50].mxu1 %vm445_vm1, %v6096_v62 }
0x1237   :  { %5997 = vmatpush3.bf16.msra.mxu1 %v5994_v61  ;;  %5993 = vmatpush3.bf16.msra.mxu0 %v5990_v2 }
0x1238   :  { %5999 = vmatprep.subr.bf16.mxu1 %v5998_v4  ;;  %6003 = vmatprep.subr.bf16.mxu0 %v6002_v7 }
0x123b   :  { %6001 = vmatpush3.bf16.msra.mxu1 %v5998_v4 }
0x1305   :  { %v5692_v10 = vpop.f32.mrb[54].mxu0 }
0x1306   :  { %v4190_v23 = vsub.f32 %v4111_v13, %v5692_v10  ;;  %v4273_v58 = vadd.f32 %v5692_v10, %v6662_v31  ;;  %v4180_v19 = vpop.f32.mrb[55].mxu0  ;;  %v4288_v31 = vld [vmem:[%s4926_s26] sm:$0xff] }
0x1307   :  { %v4189_v25 = vsub.f32 %v4110_v14, %v4180_v19  ;;  %v4272_v26 = vadd.f32 %v6665_v9, %v4180_v19 }
0x1308   :  { %4876 = vst.msk [vmem:[%s4928_s25 + $0x8] sm:$0xff] %vm165_vm0, %v4190_v23 }
0x1309   :  { %4875 = vst.msk [vmem:[%s4928_s25] sm:$0xff] %vm165_vm0, %v4189_v25  ;;  %v5699_v17 = vpop.f32.mrb[50].mxu1  ;;  %5708 = vmatprep.mubr.msk.f32.mxu0 %vm165_vm0, %v4272_v26  ;;  %5722 = vmatprep.mubr.msk.f32.mxu1 %vm165_vm0, %v4272_v26 }
0x130a   :  { %v4267_v59 = vsub.f32 %v4113_v52, %v5699_v17  ;;  %v4275_v60 = vadd.f32 %v5699_v17, %v6669_v35  ;;  %v4257_v24 = vpop.f32.mrb[51].mxu1  ;;  %5709 = vmatmul.mubr.msk.f32.vlgmr.msra.gmra.mrb[56].mxu0 %vm165_vm0, %v4273_v58  ;;  %5723 = vmatmul.mubr.msk.f32.vlgmr.msra.gmra.mrb[52].mxu1 %vm165_vm0, %v4273_v58  ;;  %v4289_v35 = vld [vmem:[%s4926_s26 + $0x8] sm:$0xff] }
0x130b   :  { %v4266_v28 = vsub.f32 %v4112_v50, %v4257_v24  ;;  %v4274_v29 = vadd.f32 %v6673_v20, %v4257_v24  ;;  %6005 = vmatpush3.bf16.msra.mxu0 %v6002_v7 }
0x130c   :  { %4878 = vst.msk [vmem:[%s4928_s25 + $0x18] sm:$0xff] %vm165_vm0, %v4267_v59  ;;  %6007 = vmatprep.subr.bf16.mxu0 %v6006_v55 }
0x130d   :  { %4877 = vst.msk [vmem:[%s4928_s25 + $0x10] sm:$0xff] %vm165_vm0, %v4266_v28  ;;  %5711 = vmatprep.mubr.msk.f32.mxu0 %vm165_vm0, %v4274_v29  ;;  %5725 = vmatprep.mubr.msk.f32.mxu1 %vm165_vm0, %v4274_v29 }
0x130e   :  { %5712 = vmatmul.mubr.msk.f32.gmra.mrb[58].mxu0 %vm165_vm0, %v4275_v60  ;;  %5726 = vmatmul.mubr.msk.f32.gmra.mrb[54].mxu1 %vm165_vm0, %v4275_v60 }
0x130f   :  { %6009 = vmatpush3.bf16.msra.mxu0 %v6006_v55  ;;  %5736 = vmatprep.mubr.msk.f32.mxu0 %vm165_vm0, %v4272_v26 }
0x1310   :  { %5746 = vmatprep.mubr.msk.f32.mxu1 %vm445_vm1, %v4288_v31 }
0x1312   :  { %5737 = vmatmul.mubr.msk.f32.vlgmr.msra.gmra.mrb[60].mxu0 %vm165_vm0, %v4273_v58 }
0x1313   :  { %5739 = vmatprep.mubr.msk.f32.mxu0 %vm165_vm0, %v4274_v29 }
0x1316   :  { %5740 = vmatmul.mubr.msk.f32.gmra.mrb[62].mxu0 %vm165_vm0, %v4275_v60  ;;  %vm4887_vm0 = vcmask 31744  }
0x13dd   :  { %v5710_v32 = vpop.f32.mrb[56].mxu0 }
0x13de   :  { %v4370_v18 = vpop.f32.mrb[57].mxu0 }
0x13df   :  { %v6010_v9 = vpack.c.bf16 %v5710_v32, %v4370_v18 }
0x13e1   :  { %v5713_v33 = vpop.f32.mrb[58].mxu0  ;;  %6011 = vmatprep.subr.bf16.mxu1 %v6010_v9 }
0x13e2   :  { %v4380_v34 = vpop.f32.mrb[59].mxu0  ;;  %6013 = vmatpush3.bf16.msra.mxu1 %v6010_v9 }
0x13e3   :  { %v6018_v36 = vpack.c.bf16 %v5713_v33, %v4380_v34 }
0x13e5   :  { %v5738_v20 = vpop.f32.mrb[60].mxu0  ;;  %5747 = vmatmul.mubr.msk.f32.vlgmr.msra.gmra.mrb[52].mxu1 %vm445_vm1, %v4289_v35 }
0x13e6   :  { %v4540_v27 = vpop.f32.mrb[61].mxu0  ;;  %5753 = vmatprep.mubr.msk.f32.mxu1 %vm445_vm1, %v4290_v21 }
0x13e7   :  { %v6014_v15 = vpack.c.bf16 %v5738_v20, %v4540_v27 }
0x13e9   :  { %v5741_v39 = vpop.f32.mrb[62].mxu0  ;;  %6015 = vmatprep.subr.bf16.mxu1 %v6014_v15 }
0x13ea   :  { %v4550_v16 = vpop.f32.mrb[63].mxu0  ;;  %6017 = vmatpush3.bf16.msra.mxu1 %v6014_v15 }
0x13eb   :  { %v6022_v41 = vpack.c.bf16 %v5741_v39, %v4550_v16  ;;  %6019 = vmatprep.subr.bf16.mxu1 %v6018_v36 }
0x13ed   :  { %5754 = vmatmul.mubr.msk.f32.vlgmr.msra.gmra.mrb[52].mxu1 %vm445_vm1, %v4291_v40 }
0x13ee   :  { %6021 = vmatpush3.bf16.msra.mxu1 %v6018_v36  ;;  %5760 = vmatprep.mubr.msk.f32.mxu1 %vm445_vm1, %v4288_v31 }
0x13ef   :  { %6023 = vmatprep.subr.bf16.mxu1 %v6022_v41 }
0x13f1   :  { %5761 = vmatmul.mubr.msk.f32.vlgmr.msra.gmra.mrb[54].mxu1 %vm445_vm1, %v4289_v35 }
0x13f2   :  { %6025 = vmatpush3.bf16.msra.mxu1 %v6022_v41  ;;  %5767 = vmatprep.mubr.msk.f32.mxu1 %vm445_vm1, %v4290_v21 }
0x13f9   :  { %5768 = vmatmul.mubr.msk.f32.vlgmr.msra.gmra.mrb[54].mxu1 %vm445_vm1, %v4291_v40 }
0x14c0   :  { %v5755_v57 = vpop.f32.mrb[52].mxu1 }
0x14c1   :  { %v4884_v37 = vadd.f32 %v5755_v57, %v4880_v43  ;;  %v4712_v30 = vpop.f32.mrb[53].mxu1 }
0x14c2   :  { %v4883_v38 = vadd.f32 %v4879_v44, %v4712_v30 }
0x14c3   :  { %4889 = vst.msk [vmem:[%s4929_s8 + $0x8] sm:$0xff] %vm4887_vm0, %v4884_v37 }
0x14c4   :  { %4888 = vst.msk [vmem:[%s4929_s8] sm:$0xff] %vm4887_vm0, %v4883_v38 }
0x14cc   :  { %v5769_v13 = vpop.f32.mrb[54].mxu1 }
0x14cd   :  { %v4886_v46 = vadd.f32 %v5769_v13, %v4882_v8  ;;  %v4864_v12 = vpop.f32.mrb[55].mxu1 }
0x14ce   :  { %v4885_v47 = vadd.f32 %v4881_v45, %v4864_v12 }
0x14cf   :  { %4891 = vst.msk [vmem:[%s4929_s8 + $0x18] sm:$0xff] %vm4887_vm0, %v4886_v46 }
0x14d0   :  { %4890 = vst.msk [vmem:[%s4929_s8 + $0x10] sm:$0xff] %vm4887_vm0, %v4885_v47 }

</bundles_post_ra>
